<compile_context>
chip_gen: v5e
topology: v5e:2x2
jax: 0.10.0
libtpu: 0.0.40
codegen_flags: <defaults>
</compile_context>

<pallas_src>
import jax
import jax.numpy as jnp
from jax.experimental import pallas as pl
from jax.experimental.pallas import tpu as pltpu

H = 500    # hidden width of the reference module
HP = 512   # padded hidden width (multiple of 128)


def _round_up(n, m):
    return ((n + m - 1) // m) * m


# ----------------------------- Pallas kernel --------------------------------
def _branch(x_ref, w1_ref, b1_ref, w2_ref, b2_ref, w3_ref, b3_ref,
            w4t_ref, b4_ref):
    """One (K -> HP -> HP -> HP -> 1) MLP branch. Returns (TB, 1) float32."""
    # layer 1: K is tiny (2 / 6) -> VPU broadcast-FMA instead of a K=2 MXU pass
    k_in = w1_ref.shape[0]
    xv = x_ref[...]                                        # (TB, K) f32
    h = b1_ref[...]                                        # (1, HP) broadcast
    for k in range(k_in):                                  # static unroll
        h = h + xv[:, k:k + 1] * w1_ref[k:k + 1, :]
    h = jnp.maximum(h, 0.0)                                # (TB, HP) f32

    # layers 2/3: 512x512 bf16 weights, f32 accumulation on the MXU
    h = jnp.dot(h.astype(jnp.bfloat16), w2_ref[...],
                preferred_element_type=jnp.float32)
    h = jnp.maximum(h + b2_ref[...], 0.0)
    h = jnp.dot(h.astype(jnp.bfloat16), w3_ref[...],
                preferred_element_type=jnp.float32)
    h = jnp.maximum(h + b3_ref[...], 0.0)

    # layer 4: N=1 -> VPU multiply + XLU cross-lane reduce (free slots vs MXU)
    y = jnp.sum(h * w4t_ref[...], axis=-1, keepdims=True) + b4_ref[...]
    return y                                               # (TB, 1) f32


def separable_kernel(x_ref, z_ref,
                     w1x_ref, b1x_ref, w2x_ref, b2x_ref, w3x_ref, b3x_ref,
                     w4x_ref, b4x_ref,
                     w1z_ref, b1z_ref, w2z_ref, b2z_ref, w3z_ref, b3z_ref,
                     w4z_ref, b4z_ref,
                     c_ref, o_ref):
    yx = _branch(x_ref, w1x_ref, b1x_ref, w2x_ref, b2x_ref,
                 w3x_ref, b3x_ref, w4x_ref, b4x_ref)
    yz = _branch(z_ref, w1z_ref, b1z_ref, w2z_ref, b2z_ref,
                 w3z_ref, b3z_ref, w4z_ref, b4z_ref)
    # linear5 (2 -> 1): scalars from SMEM, then 0.5 * sigmoid (EUP exp + recip)
    y = yx * c_ref[0] + yz * c_ref[1] + c_ref[2]
    o_ref[...] = 0.5 * jax.nn.sigmoid(y)


# ------------------------------ wrapper --------------------------------------
def _pad_branch(w1, b1, w2, b2, w3, b3, w4, b4):
    """Zero-pad hidden width H->HP (exact) and cast the big weights to bf16."""
    k_in = w1.shape[0]
    w1p = jnp.zeros((k_in, HP), jnp.float32).at[:, :H].set(w1)
    b1p = jnp.zeros((1, HP), jnp.float32).at[:, :H].set(b1)
    w2p = jnp.zeros((HP, HP), jnp.float32).at[:H, :H].set(w2).astype(jnp.bfloat16)
    b2p = jnp.zeros((1, HP), jnp.float32).at[:, :H].set(b2)
    w3p = jnp.zeros((HP, HP), jnp.float32).at[:H, :H].set(w3).astype(jnp.bfloat16)
    b3p = jnp.zeros((1, HP), jnp.float32).at[:, :H].set(b3)
    w4t = jnp.zeros((1, HP), jnp.float32).at[:, :H].set(w4.T)     # (1, HP)
    b4p = b4.reshape(1, 1).astype(jnp.float32)                    # (1, 1)
    return (w1p, b1p, w2p, b2p, w3p, b3p, w4t, b4p)


def separable_demo_forward(x, z, params):
    """x: (B, Kx) f32, z: (B, Kz) f32. Returns (B,) f32 in (0, 0.5)."""
    (w1x, b1x, w2x, b2x, w3x, b3x, w4x, b4x,
     w1z, b1z, w2z, b2z, w3z, b3z, w4z, b4z, c) = params

    B, kx = x.shape
    kz = z.shape[1]

    # Batch tiling: TB multiple of 8; batch blocks shard across TCs (v7x).
    TB = min(256, _round_up(B, 8))
    B_pad = _round_up(B, TB)
    if B_pad != B:
        x = jnp.pad(x, ((0, B_pad - B), (0, 0)))
        z = jnp.pad(z, ((0, B_pad - B), (0, 0)))

    bx = _pad_branch(w1x, b1x, w2x, b2x, w3x, b3x, w4x, b4x)
    bz = _pad_branch(w1z, b1z, w2z, b2z, w3z, b3z, w4z, b4z)
    weight_args = (*bx, *bz)

    def tile_spec(feat):
        return pl.BlockSpec((TB, feat), lambda i: (i, 0))

    def const_spec(shape):
        # Full-array block, constant index map -> DMA'd once, resident in VMEM.
        return pl.BlockSpec(shape, lambda i, _nd=len(shape): (0,) * _nd)

    in_specs = ([tile_spec(kx), tile_spec(kz)]
                + [const_spec(a.shape) for a in weight_args]
                + [pl.BlockSpec(memory_space=pltpu.MemorySpace.SMEM)])

    flops = 2 * B_pad * (kx * HP + kz * HP + 4 * HP * HP + 2 * HP + 2)
    bytes_accessed = int(
        sum(int(a.size) * a.dtype.itemsize for a in weight_args)
        + x.size * 4 + z.size * 4 + B_pad * 4 + c.size * 4)

    out = pl.pallas_call(
        separable_kernel,
        out_shape=jax.ShapeDtypeStruct((B_pad, 1), jnp.float32),
        grid=(B_pad // TB,),
        in_specs=in_specs,
        out_specs=pl.BlockSpec((TB, 1), lambda i: (i, 0)),
        compiler_params=pltpu.CompilerParams(
            dimension_semantics=("parallel",)),
        cost_estimate=pl.CostEstimate(
            flops=flops, transcendentals=B_pad, bytes_accessed=bytes_accessed),
    )(x, z, *weight_args, c)

    # torch.squeeze on (B, 1) -> (B,)
    return jnp.squeeze(out[:B], axis=-1)


# ----------------------- pure-JAX reference (f32) ----------------------------
def reference_forward(x, z, params):
    (w1x, b1x, w2x, b2x, w3x, b3x, w4x, b4x,
     w1z, b1z, w2z, b2z, w3z, b3z, w4z, b4z, c) = params

    def branch(v, w1, b1, w2, b2, w3, b3, w4, b4):
        h = jnp.maximum(v @ w1 + b1, 0.0)
        h = jnp.maximum(h @ w2 + b2, 0.0)
        h = jnp.maximum(h @ w3 + b3, 0.0)
        return h @ w4 + b4

    yx = branch(x, w1x, b1x, w2x, b2x, w3x, b3x, w4x, b4x)
    yz = branch(z, w1z, b1z, w2z, b2z, w3z, b3z, w4z, b4z)
    y = yx * c[0] + yz * c[1] + c[2]
    return jnp.squeeze(0.5 * jax.nn.sigmoid(y), axis=-1)


# ------------------------- deterministic param init --------------------------
def _init_linear(key, fan_in, fan_out):
    # torch.nn.Linear default init: U(-1/sqrt(fan_in), 1/sqrt(fan_in)).
    bound = 1.0 / (fan_in ** 0.5)
    kw, kb = jax.random.split(key)
    w = jax.random.uniform(kw, (fan_in, fan_out), jnp.float32, -bound, bound)
    b = jax.random.uniform(kb, (1, fan_out), jnp.float32, -bound, bound)
    return w, b


def init_params(key, kx, kz):
    keys = jax.random.split(key, 9)
    w1x, b1x = _init_linear(keys[0], kx, H)
    w2x, b2x = _init_linear(keys[1], H, H)
    w3x, b3x = _init_linear(keys[2], H, H)
    w4x, b4x = _init_linear(keys[3], H, 1)
    w1z, b1z = _init_linear(keys[4], kz, H)
    w2z, b2z = _init_linear(keys[5], H, H)
    w3z, b3z = _init_linear(keys[6], H, H)
    w4z, b4z = _init_linear(keys[7], H, 1)
    w5, b5 = _init_linear(keys[8], 2, 1)                 # linear5: 2 -> 1
    c = jnp.concatenate([w5[:, 0], b5[0]]).astype(jnp.float32)  # [w5_x, w5_z, b5]
    return (w1x, b1x, w2x, b2x, w3x, b3x, w4x, b4x,
            w1z, b1z, w2z, b2z, w3z, b3z, w4z, b4z, c)


# --------------------------------- main ---------------------------------------
if __name__ == "__main__":
    key = jax.random.PRNGKey(0)
    kp, kx_in, kz_in = jax.random.split(key, 3)

    B, KX, KZ = 8, 2, 6          # x = ['score1', 'choice1'], z = demographics
    params = init_params(kp, KX, KZ)

    x = jax.random.normal(kx_in, (B, KX), jnp.float32)
    z = jax.random.normal(kz_in, (B, KZ), jnp.float32)

    y = separable_demo_forward(x, z, params)
    y = jax.block_until_ready(y)

    y_ref = reference_forward(x, z, params)

    assert y.shape == (B,)
    assert bool(jnp.all(jnp.isfinite(y)))
    assert bool(jnp.all((y >= 0.0) & (y <= 0.5)))             # 0.5*sigmoid range
    # bf16 hidden weights vs f32 reference: loose tolerance on a (0,0.5) output.
    assert bool(jnp.max(jnp.abs(y - y_ref)) < 2e-2)

    print("KERNEL_OK")
</pallas_src>

<mosaic_0001>
module attributes {stable_mosaic.version = 11 : i64} {
  func.func @separable_kernel(%arg0: i32, %arg1: memref<8x2xf32, #tpu.memory_space<vmem>>, %arg2: memref<8x6xf32, #tpu.memory_space<vmem>>, %arg3: memref<2x512xf32, #tpu.memory_space<vmem>>, %arg4: memref<1x512xf32, #tpu.memory_space<vmem>>, %arg5: memref<512x512xbf16, #tpu.memory_space<vmem>>, %arg6: memref<1x512xf32, #tpu.memory_space<vmem>>, %arg7: memref<512x512xbf16, #tpu.memory_space<vmem>>, %arg8: memref<1x512xf32, #tpu.memory_space<vmem>>, %arg9: memref<1x512xf32, #tpu.memory_space<vmem>>, %arg10: memref<1x1xf32, #tpu.memory_space<vmem>>, %arg11: memref<6x512xf32, #tpu.memory_space<vmem>>, %arg12: memref<1x512xf32, #tpu.memory_space<vmem>>, %arg13: memref<512x512xbf16, #tpu.memory_space<vmem>>, %arg14: memref<1x512xf32, #tpu.memory_space<vmem>>, %arg15: memref<512x512xbf16, #tpu.memory_space<vmem>>, %arg16: memref<1x512xf32, #tpu.memory_space<vmem>>, %arg17: memref<1x512xf32, #tpu.memory_space<vmem>>, %arg18: memref<1x1xf32, #tpu.memory_space<vmem>>, %arg19: memref<3xf32, #tpu.memory_space<smem>>, %arg20: memref<8x1xf32, #tpu.memory_space<vmem>>) attributes {dimension_semantics = [#tpu.dimension_semantics<parallel>], iteration_bounds = array<i64: 1>, scalar_prefetch = 0 : i64, scratch_operands = 0 : i64, tpu.core_type = #tpu.core_type<tc>, window_params = [{transform_indices = @transform_0, window_bounds = array<i64: 8, 2>}, {transform_indices = @transform_1, window_bounds = array<i64: 8, 6>}, {pipeline_mode = #tpu.pipeline_mode<synchronous>, transform_indices = @transform_2, window_bounds = array<i64: 2, 512>}, {pipeline_mode = #tpu.pipeline_mode<synchronous>, transform_indices = @transform_3, window_bounds = array<i64: 1, 512>}, {pipeline_mode = #tpu.pipeline_mode<synchronous>, transform_indices = @transform_4, window_bounds = array<i64: 512, 512>}, {pipeline_mode = #tpu.pipeline_mode<synchronous>, transform_indices = @transform_5, window_bounds = array<i64: 1, 512>}, {pipeline_mode = #tpu.pipeline_mode<synchronous>, transform_indices = @transform_6, window_bounds = array<i64: 512, 512>}, {pipeline_mode = #tpu.pipeline_mode<synchronous>, transform_indices = @transform_7, window_bounds = array<i64: 1, 512>}, {pipeline_mode = #tpu.pipeline_mode<synchronous>, transform_indices = @transform_8, window_bounds = array<i64: 1, 512>}, {pipeline_mode = #tpu.pipeline_mode<synchronous>, transform_indices = @transform_9, window_bounds = array<i64: 1, 1>}, {pipeline_mode = #tpu.pipeline_mode<synchronous>, transform_indices = @transform_10, window_bounds = array<i64: 6, 512>}, {pipeline_mode = #tpu.pipeline_mode<synchronous>, transform_indices = @transform_11, window_bounds = array<i64: 1, 512>}, {pipeline_mode = #tpu.pipeline_mode<synchronous>, transform_indices = @transform_12, window_bounds = array<i64: 512, 512>}, {pipeline_mode = #tpu.pipeline_mode<synchronous>, transform_indices = @transform_13, window_bounds = array<i64: 1, 512>}, {pipeline_mode = #tpu.pipeline_mode<synchronous>, transform_indices = @transform_14, window_bounds = array<i64: 512, 512>}, {pipeline_mode = #tpu.pipeline_mode<synchronous>, transform_indices = @transform_15, window_bounds = array<i64: 1, 512>}, {pipeline_mode = #tpu.pipeline_mode<synchronous>, transform_indices = @transform_16, window_bounds = array<i64: 1, 512>}, {pipeline_mode = #tpu.pipeline_mode<synchronous>, transform_indices = @transform_17, window_bounds = array<i64: 1, 1>}, {transform_indices = @transform_18, window_bounds = array<i64: 3>}, {transform_indices = @transform_19, window_bounds = array<i64: 8, 1>}]} {
    %c0 = arith.constant 0 : index
    %c0_0 = arith.constant 0 : index
    %0 = vector.load %arg1[%c0, %c0_0] : memref<8x2xf32, #tpu.memory_space<vmem>>, vector<8x2xf32>
    %c0_1 = arith.constant 0 : index
    %c0_2 = arith.constant 0 : index
    %1 = vector.load %arg4[%c0_1, %c0_2] : memref<1x512xf32, #tpu.memory_space<vmem>>, vector<1x512xf32>
    %2 = vector.extract_strided_slice %0 {offsets = [0, 0], sizes = [8, 1], strides = [1, 1]} : vector<8x2xf32> to vector<8x1xf32>
    %c0_3 = arith.constant 0 : index
    %c0_4 = arith.constant 0 : index
    %3 = vector.load %arg3[%c0_3, %c0_4] : memref<2x512xf32, #tpu.memory_space<vmem>>, vector<1x512xf32>
    %4 = vector.broadcast %2 : vector<8x1xf32> to vector<8x512xf32>
    %5 = vector.broadcast %3 : vector<1x512xf32> to vector<8x512xf32>
    %6 = arith.mulf %4, %5 : vector<8x512xf32>
    %7 = vector.broadcast %1 : vector<1x512xf32> to vector<8x512xf32>
    %8 = arith.addf %7, %6 : vector<8x512xf32>
    %9 = vector.extract_strided_slice %0 {offsets = [0, 1], sizes = [8, 1], strides = [1, 1]} : vector<8x2xf32> to vector<8x1xf32>
    %c1 = arith.constant 1 : index
    %c0_5 = arith.constant 0 : index
    %10 = vector.load %arg3[%c1, %c0_5] : memref<2x512xf32, #tpu.memory_space<vmem>>, vector<1x512xf32>
    %11 = vector.broadcast %9 : vector<8x1xf32> to vector<8x512xf32>
    %12 = vector.broadcast %10 : vector<1x512xf32> to vector<8x512xf32>
    %13 = arith.mulf %11, %12 : vector<8x512xf32>
    %14 = arith.addf %8, %13 : vector<8x512xf32>
    %cst = arith.constant 0.000000e+00 : f32
    %15 = vector.broadcast %cst : f32 to vector<8x512xf32>
    %16 = arith.maximumf %14, %15 : vector<8x512xf32>
    %17 = arith.truncf %16 : vector<8x512xf32> to vector<8x512xbf16>
    %c0_6 = arith.constant 0 : index
    %c0_7 = arith.constant 0 : index
    %18 = vector.load %arg5[%c0_6, %c0_7] : memref<512x512xbf16, #tpu.memory_space<vmem>>, vector<512x512xbf16>
    %cst_8 = arith.constant dense<0.000000e+00> : vector<8x512xf32>
    %19 = tpu.matmul %17, %18, %cst_8 {dimension_numbers = #tpu.dot_dimension_numbers<[1], [0], [0], [1], [0, 0, 1, 1], [], []>} : vector<8x512xbf16>, vector<512x512xbf16>, vector<8x512xf32> -> vector<8x512xf32>
    %c0_9 = arith.constant 0 : index
    %c0_10 = arith.constant 0 : index
    %20 = vector.load %arg6[%c0_9, %c0_10] : memref<1x512xf32, #tpu.memory_space<vmem>>, vector<1x512xf32>
    %21 = vector.broadcast %20 : vector<1x512xf32> to vector<8x512xf32>
    %22 = arith.addf %19, %21 : vector<8x512xf32>
    %cst_11 = arith.constant 0.000000e+00 : f32
    %23 = vector.broadcast %cst_11 : f32 to vector<8x512xf32>
    %24 = arith.maximumf %22, %23 : vector<8x512xf32>
    %25 = arith.truncf %24 : vector<8x512xf32> to vector<8x512xbf16>
    %c0_12 = arith.constant 0 : index
    %c0_13 = arith.constant 0 : index
    %26 = vector.load %arg7[%c0_12, %c0_13] : memref<512x512xbf16, #tpu.memory_space<vmem>>, vector<512x512xbf16>
    %cst_14 = arith.constant dense<0.000000e+00> : vector<8x512xf32>
    %27 = tpu.matmul %25, %26, %cst_14 {dimension_numbers = #tpu.dot_dimension_numbers<[1], [0], [0], [1], [0, 0, 1, 1], [], []>} : vector<8x512xbf16>, vector<512x512xbf16>, vector<8x512xf32> -> vector<8x512xf32>
    %c0_15 = arith.constant 0 : index
    %c0_16 = arith.constant 0 : index
    %28 = vector.load %arg8[%c0_15, %c0_16] : memref<1x512xf32, #tpu.memory_space<vmem>>, vector<1x512xf32>
    %29 = vector.broadcast %28 : vector<1x512xf32> to vector<8x512xf32>
    %30 = arith.addf %27, %29 : vector<8x512xf32>
    %cst_17 = arith.constant 0.000000e+00 : f32
    %31 = vector.broadcast %cst_17 : f32 to vector<8x512xf32>
    %32 = arith.maximumf %30, %31 : vector<8x512xf32>
    %c0_18 = arith.constant 0 : index
    %c0_19 = arith.constant 0 : index
    %33 = vector.load %arg9[%c0_18, %c0_19] : memref<1x512xf32, #tpu.memory_space<vmem>>, vector<1x512xf32>
    %34 = vector.broadcast %33 : vector<1x512xf32> to vector<8x512xf32>
    %35 = arith.mulf %32, %34 : vector<8x512xf32>
    %cst_20 = arith.constant dense<0.000000e+00> : vector<8xf32>
    %36 = vector.multi_reduction <add>, %35, %cst_20 [1] : vector<8x512xf32> to vector<8xf32>
    %37 = vector.shape_cast %36 : vector<8xf32> to vector<8x1xf32>
    %c0_21 = arith.constant 0 : index
    %c0_22 = arith.constant 0 : index
    %38 = vector.load %arg10[%c0_21, %c0_22] : memref<1x1xf32, #tpu.memory_space<vmem>>, vector<1x1xf32>
    %39 = vector.broadcast %38 : vector<1x1xf32> to vector<8x1xf32>
    %40 = arith.addf %37, %39 : vector<8x1xf32>
    %c0_23 = arith.constant 0 : index
    %c0_24 = arith.constant 0 : index
    %41 = vector.load %arg2[%c0_23, %c0_24] : memref<8x6xf32, #tpu.memory_space<vmem>>, vector<8x6xf32>
    %c0_25 = arith.constant 0 : index
    %c0_26 = arith.constant 0 : index
    %42 = vector.load %arg12[%c0_25, %c0_26] : memref<1x512xf32, #tpu.memory_space<vmem>>, vector<1x512xf32>
    %43 = vector.extract_strided_slice %41 {offsets = [0, 0], sizes = [8, 1], strides = [1, 1]} : vector<8x6xf32> to vector<8x1xf32>
    %c0_27 = arith.constant 0 : index
    %c0_28 = arith.constant 0 : index
    %44 = vector.load %arg11[%c0_27, %c0_28] : memref<6x512xf32, #tpu.memory_space<vmem>>, vector<1x512xf32>
    %45 = vector.broadcast %43 : vector<8x1xf32> to vector<8x512xf32>
    %46 = vector.broadcast %44 : vector<1x512xf32> to vector<8x512xf32>
    %47 = arith.mulf %45, %46 : vector<8x512xf32>
    %48 = vector.broadcast %42 : vector<1x512xf32> to vector<8x512xf32>
    %49 = arith.addf %48, %47 : vector<8x512xf32>
    %50 = vector.extract_strided_slice %41 {offsets = [0, 1], sizes = [8, 1], strides = [1, 1]} : vector<8x6xf32> to vector<8x1xf32>
    %c1_29 = arith.constant 1 : index
    %c0_30 = arith.constant 0 : index
    %51 = vector.load %arg11[%c1_29, %c0_30] : memref<6x512xf32, #tpu.memory_space<vmem>>, vector<1x512xf32>
    %52 = vector.broadcast %50 : vector<8x1xf32> to vector<8x512xf32>
    %53 = vector.broadcast %51 : vector<1x512xf32> to vector<8x512xf32>
    %54 = arith.mulf %52, %53 : vector<8x512xf32>
    %55 = arith.addf %49, %54 : vector<8x512xf32>
    %56 = vector.extract_strided_slice %41 {offsets = [0, 2], sizes = [8, 1], strides = [1, 1]} : vector<8x6xf32> to vector<8x1xf32>
    %c2 = arith.constant 2 : index
    %c0_31 = arith.constant 0 : index
    %57 = vector.load %arg11[%c2, %c0_31] : memref<6x512xf32, #tpu.memory_space<vmem>>, vector<1x512xf32>
    %58 = vector.broadcast %56 : vector<8x1xf32> to vector<8x512xf32>
    %59 = vector.broadcast %57 : vector<1x512xf32> to vector<8x512xf32>
    %60 = arith.mulf %58, %59 : vector<8x512xf32>
    %61 = arith.addf %55, %60 : vector<8x512xf32>
    %62 = vector.extract_strided_slice %41 {offsets = [0, 3], sizes = [8, 1], strides = [1, 1]} : vector<8x6xf32> to vector<8x1xf32>
    %c3 = arith.constant 3 : index
    %c0_32 = arith.constant 0 : index
    %63 = vector.load %arg11[%c3, %c0_32] : memref<6x512xf32, #tpu.memory_space<vmem>>, vector<1x512xf32>
    %64 = vector.broadcast %62 : vector<8x1xf32> to vector<8x512xf32>
    %65 = vector.broadcast %63 : vector<1x512xf32> to vector<8x512xf32>
    %66 = arith.mulf %64, %65 : vector<8x512xf32>
    %67 = arith.addf %61, %66 : vector<8x512xf32>
    %68 = vector.extract_strided_slice %41 {offsets = [0, 4], sizes = [8, 1], strides = [1, 1]} : vector<8x6xf32> to vector<8x1xf32>
    %c4 = arith.constant 4 : index
    %c0_33 = arith.constant 0 : index
    %69 = vector.load %arg11[%c4, %c0_33] : memref<6x512xf32, #tpu.memory_space<vmem>>, vector<1x512xf32>
    %70 = vector.broadcast %68 : vector<8x1xf32> to vector<8x512xf32>
    %71 = vector.broadcast %69 : vector<1x512xf32> to vector<8x512xf32>
    %72 = arith.mulf %70, %71 : vector<8x512xf32>
    %73 = arith.addf %67, %72 : vector<8x512xf32>
    %74 = vector.extract_strided_slice %41 {offsets = [0, 5], sizes = [8, 1], strides = [1, 1]} : vector<8x6xf32> to vector<8x1xf32>
    %c5 = arith.constant 5 : index
    %c0_34 = arith.constant 0 : index
    %75 = vector.load %arg11[%c5, %c0_34] : memref<6x512xf32, #tpu.memory_space<vmem>>, vector<1x512xf32>
    %76 = vector.broadcast %74 : vector<8x1xf32> to vector<8x512xf32>
    %77 = vector.broadcast %75 : vector<1x512xf32> to vector<8x512xf32>
    %78 = arith.mulf %76, %77 : vector<8x512xf32>
    %79 = arith.addf %73, %78 : vector<8x512xf32>
    %cst_35 = arith.constant 0.000000e+00 : f32
    %80 = vector.broadcast %cst_35 : f32 to vector<8x512xf32>
    %81 = arith.maximumf %79, %80 : vector<8x512xf32>
    %82 = arith.truncf %81 : vector<8x512xf32> to vector<8x512xbf16>
    %c0_36 = arith.constant 0 : index
    %c0_37 = arith.constant 0 : index
    %83 = vector.load %arg13[%c0_36, %c0_37] : memref<512x512xbf16, #tpu.memory_space<vmem>>, vector<512x512xbf16>
    %cst_38 = arith.constant dense<0.000000e+00> : vector<8x512xf32>
    %84 = tpu.matmul %82, %83, %cst_38 {dimension_numbers = #tpu.dot_dimension_numbers<[1], [0], [0], [1], [0, 0, 1, 1], [], []>} : vector<8x512xbf16>, vector<512x512xbf16>, vector<8x512xf32> -> vector<8x512xf32>
    %c0_39 = arith.constant 0 : index
    %c0_40 = arith.constant 0 : index
    %85 = vector.load %arg14[%c0_39, %c0_40] : memref<1x512xf32, #tpu.memory_space<vmem>>, vector<1x512xf32>
    %86 = vector.broadcast %85 : vector<1x512xf32> to vector<8x512xf32>
    %87 = arith.addf %84, %86 : vector<8x512xf32>
    %cst_41 = arith.constant 0.000000e+00 : f32
    %88 = vector.broadcast %cst_41 : f32 to vector<8x512xf32>
    %89 = arith.maximumf %87, %88 : vector<8x512xf32>
    %90 = arith.truncf %89 : vector<8x512xf32> to vector<8x512xbf16>
    %c0_42 = arith.constant 0 : index
    %c0_43 = arith.constant 0 : index
    %91 = vector.load %arg15[%c0_42, %c0_43] : memref<512x512xbf16, #tpu.memory_space<vmem>>, vector<512x512xbf16>
    %cst_44 = arith.constant dense<0.000000e+00> : vector<8x512xf32>
    %92 = tpu.matmul %90, %91, %cst_44 {dimension_numbers = #tpu.dot_dimension_numbers<[1], [0], [0], [1], [0, 0, 1, 1], [], []>} : vector<8x512xbf16>, vector<512x512xbf16>, vector<8x512xf32> -> vector<8x512xf32>
    %c0_45 = arith.constant 0 : index
    %c0_46 = arith.constant 0 : index
    %93 = vector.load %arg16[%c0_45, %c0_46] : memref<1x512xf32, #tpu.memory_space<vmem>>, vector<1x512xf32>
    %94 = vector.broadcast %93 : vector<1x512xf32> to vector<8x512xf32>
    %95 = arith.addf %92, %94 : vector<8x512xf32>
    %cst_47 = arith.constant 0.000000e+00 : f32
    %96 = vector.broadcast %cst_47 : f32 to vector<8x512xf32>
    %97 = arith.maximumf %95, %96 : vector<8x512xf32>
    %c0_48 = arith.constant 0 : index
    %c0_49 = arith.constant 0 : index
    %98 = vector.load %arg17[%c0_48, %c0_49] : memref<1x512xf32, #tpu.memory_space<vmem>>, vector<1x512xf32>
    %99 = vector.broadcast %98 : vector<1x512xf32> to vector<8x512xf32>
    %100 = arith.mulf %97, %99 : vector<8x512xf32>
    %cst_50 = arith.constant dense<0.000000e+00> : vector<8xf32>
    %101 = vector.multi_reduction <add>, %100, %cst_50 [1] : vector<8x512xf32> to vector<8xf32>
    %102 = vector.shape_cast %101 : vector<8xf32> to vector<8x1xf32>
    %c0_51 = arith.constant 0 : index
    %c0_52 = arith.constant 0 : index
    %103 = vector.load %arg18[%c0_51, %c0_52] : memref<1x1xf32, #tpu.memory_space<vmem>>, vector<1x1xf32>
    %104 = vector.broadcast %103 : vector<1x1xf32> to vector<8x1xf32>
    %105 = arith.addf %102, %104 : vector<8x1xf32>
    %c0_53 = arith.constant 0 : index
    %106 = memref.load %arg19[%c0_53] : memref<3xf32, #tpu.memory_space<smem>>
    %107 = vector.broadcast %106 : f32 to vector<8x1xf32>
    %108 = arith.mulf %40, %107 : vector<8x1xf32>
    %c1_54 = arith.constant 1 : index
    %109 = memref.load %arg19[%c1_54] : memref<3xf32, #tpu.memory_space<smem>>
    %110 = vector.broadcast %109 : f32 to vector<8x1xf32>
    %111 = arith.mulf %105, %110 : vector<8x1xf32>
    %112 = arith.addf %108, %111 : vector<8x1xf32>
    %c2_55 = arith.constant 2 : index
    %113 = memref.load %arg19[%c2_55] : memref<3xf32, #tpu.memory_space<smem>>
    %114 = vector.broadcast %113 : f32 to vector<8x1xf32>
    %115 = arith.addf %112, %114 : vector<8x1xf32>
    %116 = arith.negf %115 : vector<8x1xf32>
    %117 = math.exp %116 : vector<8x1xf32>
    %cst_56 = arith.constant 1.000000e+00 : f32
    %118 = vector.broadcast %cst_56 : f32 to vector<8x1xf32>
    %119 = arith.addf %118, %117 : vector<8x1xf32>
    %120 = arith.divf %118, %119 : vector<8x1xf32>
    %cst_57 = arith.constant 5.000000e-01 : f32
    %121 = vector.broadcast %cst_57 : f32 to vector<8x1xf32>
    %122 = arith.mulf %121, %120 : vector<8x1xf32>
    %c0_58 = arith.constant 0 : index
    %c0_59 = arith.constant 0 : index
    %123 = vector.load %arg20[%c0_58, %c0_59] : memref<8x1xf32, #tpu.memory_space<vmem>>, vector<8x1xf32>
    tpu.vector_store %arg20[%c0_58, %c0_59], %122 {strides = array<i32>} : memref<8x1xf32, #tpu.memory_space<vmem>>, vector<8x1xf32>,
    return
  }
  func.func @transform_0(%arg0: i32) -> (i32, i32) {
    %c0_i32 = arith.constant 0 : i32
    %c0_i32_0 = arith.constant 0 : i32
    return %arg0, %c0_i32 : i32, i32
  }
  func.func @transform_1(%arg0: i32) -> (i32, i32) {
    %c0_i32 = arith.constant 0 : i32
    %c0_i32_0 = arith.constant 0 : i32
    return %arg0, %c0_i32 : i32, i32
  }
  func.func @transform_2(%arg0: i32) -> (i32, i32) {
    %c0_i32 = arith.constant 0 : i32
    %c0_i32_0 = arith.constant 0 : i32
    %c0_i32_1 = arith.constant 0 : i32
    return %c0_i32, %c0_i32_0 : i32, i32
  }
  func.func @transform_3(%arg0: i32) -> (i32, i32) {
    %c0_i32 = arith.constant 0 : i32
    %c0_i32_0 = arith.constant 0 : i32
    %c0_i32_1 = arith.constant 0 : i32
    return %c0_i32, %c0_i32_0 : i32, i32
  }
  func.func @transform_4(%arg0: i32) -> (i32, i32) {
    %c0_i32 = arith.constant 0 : i32
    %c0_i32_0 = arith.constant 0 : i32
    %c0_i32_1 = arith.constant 0 : i32
    return %c0_i32, %c0_i32_0 : i32, i32
  }
  func.func @transform_5(%arg0: i32) -> (i32, i32) {
    %c0_i32 = arith.constant 0 : i32
    %c0_i32_0 = arith.constant 0 : i32
    %c0_i32_1 = arith.constant 0 : i32
    return %c0_i32, %c0_i32_0 : i32, i32
  }
  func.func @transform_6(%arg0: i32) -> (i32, i32) {
    %c0_i32 = arith.constant 0 : i32
    %c0_i32_0 = arith.constant 0 : i32
    %c0_i32_1 = arith.constant 0 : i32
    return %c0_i32, %c0_i32_0 : i32, i32
  }
  func.func @transform_7(%arg0: i32) -> (i32, i32) {
    %c0_i32 = arith.constant 0 : i32
    %c0_i32_0 = arith.constant 0 : i32
    %c0_i32_1 = arith.constant 0 : i32
    return %c0_i32, %c0_i32_0 : i32, i32
  }
  func.func @transform_8(%arg0: i32) -> (i32, i32) {
    %c0_i32 = arith.constant 0 : i32
    %c0_i32_0 = arith.constant 0 : i32
    %c0_i32_1 = arith.constant 0 : i32
    return %c0_i32, %c0_i32_0 : i32, i32
  }
  func.func @transform_9(%arg0: i32) -> (i32, i32) {
    %c0_i32 = arith.constant 0 : i32
    %c0_i32_0 = arith.constant 0 : i32
    %c0_i32_1 = arith.constant 0 : i32
    return %c0_i32, %c0_i32_0 : i32, i32
  }
  func.func @transform_10(%arg0: i32) -> (i32, i32) {
    %c0_i32 = arith.constant 0 : i32
    %c0_i32_0 = arith.constant 0 : i32
    %c0_i32_1 = arith.constant 0 : i32
    return %c0_i32, %c0_i32_0 : i32, i32
  }
  func.func @transform_11(%arg0: i32) -> (i32, i32) {
    %c0_i32 = arith.constant 0 : i32
    %c0_i32_0 = arith.constant 0 : i32
    %c0_i32_1 = arith.constant 0 : i32
    return %c0_i32, %c0_i32_0 : i32, i32
  }
  func.func @transform_12(%arg0: i32) -> (i32, i32) {
    %c0_i32 = arith.constant 0 : i32
    %c0_i32_0 = arith.constant 0 : i32
    %c0_i32_1 = arith.constant 0 : i32
    return %c0_i32, %c0_i32_0 : i32, i32
  }
  func.func @transform_13(%arg0: i32) -> (i32, i32) {
    %c0_i32 = arith.constant 0 : i32
    %c0_i32_0 = arith.constant 0 : i32
    %c0_i32_1 = arith.constant 0 : i32
    return %c0_i32, %c0_i32_0 : i32, i32
  }
  func.func @transform_14(%arg0: i32) -> (i32, i32) {
    %c0_i32 = arith.constant 0 : i32
    %c0_i32_0 = arith.constant 0 : i32
    %c0_i32_1 = arith.constant 0 : i32
    return %c0_i32, %c0_i32_0 : i32, i32
  }
  func.func @transform_15(%arg0: i32) -> (i32, i32) {
    %c0_i32 = arith.constant 0 : i32
    %c0_i32_0 = arith.constant 0 : i32
    %c0_i32_1 = arith.constant 0 : i32
    return %c0_i32, %c0_i32_0 : i32, i32
  }
  func.func @transform_16(%arg0: i32) -> (i32, i32) {
    %c0_i32 = arith.constant 0 : i32
    %c0_i32_0 = arith.constant 0 : i32
    %c0_i32_1 = arith.constant 0 : i32
    return %c0_i32, %c0_i32_0 : i32, i32
  }
  func.func @transform_17(%arg0: i32) -> (i32, i32) {
    %c0_i32 = arith.constant 0 : i32
    %c0_i32_0 = arith.constant 0 : i32
    %c0_i32_1 = arith.constant 0 : i32
    return %c0_i32, %c0_i32_0 : i32, i32
  }
  func.func @transform_18(%arg0: i32) -> i32 {
    %c0_i32 = arith.constant 0 : i32
    %c0_i32_0 = arith.constant 0 : i32
    return %c0_i32 : i32
  }
  func.func @transform_19(%arg0: i32) -> (i32, i32) {
    %c0_i32 = arith.constant 0 : i32
    %c0_i32_0 = arith.constant 0 : i32
    return %arg0, %c0_i32 : i32, i32
  }
}

</mosaic_0001>

<bundles_post_ra>
// kernel: tpu_custom_call.1
= control target key start
LH: loop header
LB: loop body
LE: loop exit
PB: predicated region body
PF: predicated region fallthrough
CT: control target
= control target key end

     0   :  { %s7822_s0 = inlined_call_operand.vmem [shape: f32[8,2], index: 0, kind: input, shape index: {}]   ;;  %s7823_s1 = inlined_call_operand.vmem [shape: f32[8,6], index: 1, kind: input, shape index: {}]   ;;  %s7824_s2 = inlined_call_operand.hbm [shape: f32[2,512], index: 2, kind: input, shape index: {}]   ;;  %s7825_s3 = inlined_call_operand.vmem [shape: f32[1,512], index: 3, kind: input, shape index: {}]   ;;  %s7826_s4 = inlined_call_operand.hbm [shape: bf16[512,512], index: 4, kind: input, shape index: {}]   ;;  %s7827_s5 = inlined_call_operand.vmem [shape: f32[1,512], index: 5, kind: input, shape index: {}]   ;;  %s7828_s6 = inlined_call_operand.hbm [shape: bf16[512,512], index: 6, kind: input, shape index: {}]   ;;  %s7829_s7 = inlined_call_operand.vmem [shape: f32[1,512], index: 7, kind: input, shape index: {}]   ;;  %s7830_s8 = inlined_call_operand.hbm [shape: f32[1,512], index: 8, kind: input, shape index: {}]   ;;  %s7831_s9 = inlined_call_operand.<no memory space> [shape: f32[1,1], index: 9, kind: input, shape index: {}]   ;;  %s7832_s10 = inlined_call_operand.hbm [shape: f32[6,512], index: 10, kind: input, shape index: {}]   ;;  %s7833_s11 = inlined_call_operand.hbm [shape: f32[1,512], index: 11, kind: input, shape index: {}]   ;;  %s7834_s12 = inlined_call_operand.hbm [shape: bf16[512,512], index: 12, kind: input, shape index: {}]   ;;  %s7835_s13 = inlined_call_operand.vmem [shape: f32[1,512], index: 13, kind: input, shape index: {}]   ;;  %s7836_s14 = inlined_call_operand.hbm [shape: bf16[512,512], index: 14, kind: input, shape index: {}]   ;;  %s7837_s15 = inlined_call_operand.hbm [shape: f32[1,512], index: 15, kind: input, shape index: {}]   ;;  %s7838_s16 = inlined_call_operand.vmem [shape: f32[1,512], index: 16, kind: input, shape index: {}]   ;;  %s7839_s18 = inlined_call_operand.vmem [shape: f32[3], index: 18, kind: input, shape index: {}]   ;;  %s7840_s19 = inlined_call_operand.vmem [shape: f32[8,1], index: 19, kind: output, shape index: {}]   ;;  %s7841_s17 = inlined_call_operand.<no memory space> [shape: f32[1,1], index: 17, kind: input, shape index: {}]  }
   0x1   :  { %7842 = sst [smem:[#allocation26_spill]] %s7822_s0  ;;  %v24_v0 = vstv %s7831_s9  ;;  %v26_v1 = vstv %s7841_s17 }
   0x2   :  { %7843 = sst [smem:[#allocation27_spill]] %s7823_s1  ;;  %25 = vst [vmem:[#allocation2] sm:$0x1] %v24_v0 }
   0x3   :  { %7844 = sst [smem:[#allocation28_spill]] %s7824_s2  ;;  %27 = vst [vmem:[#allocation3] sm:$0x1] %v26_v1 }
   0x4   :  { %7845 = sst [smem:[#allocation29_spill]] %s7825_s3 }
   0x5   :  { %28 = vsyncpa [#allocation5], 0 }
   0x6   :  { %29 = vsyncpa [#allocation8], 0 }
   0x7   :  { %30 = vsyncpa [#allocation11], 0 }
   0x8   :  { %31 = vsyncpa [#allocation14], 0 }
   0x9   :  { %32 = vsyncpa [#allocation17], 0  ;;  %s55_s2 = sshll.u32 %s7826_s4, 4  ;;  %s56_s2 = int_to_ptr.hbm [resolvable:$true] %s55_s2 }
   0xa   :  { %33 = vsyncpa [#allocation6], 0  ;;  %s7325_s23 = smov [#allocation7]   ;;  %s86_s17 = sshll.u32 %s7830_s8, 4  ;;  %s87_s17 = int_to_ptr.hbm [resolvable:$true] %s86_s17 }
   0xb   :  { %s57_s24 = sshll.u32 %s7325_s23, 4  ;;  %s7326_s3 = smov 256   ;;  %s58_s24 = int_to_ptr.vmem [resolvable:$true] %s57_s24 }
   0xc   :  { %s7327_s26 = smov 16   ;;  %s7328_s27 = smov [#allocation10]  }
   0xd   :  { %63 = dma.hbm_to_vmem [thread:$0]  %s56_s2, 16384, %s58_s24, [#allocation8], %s7326_s3, %s7326_s3, %s7327_s26  }
   0xe   :  { %s88_s28 = sshll.u32 %s7328_s27, 4  ;;  %s110_s0 = sshll.u32 %s7833_s11, 4  ;;  %s89_s28 = int_to_ptr.vmem [resolvable:$true] %s88_s28  ;;  %s111_s0 = int_to_ptr.hbm [resolvable:$true] %s110_s0 }
   0xf   :  { %91 = dma.hbm_to_vmem [thread:$0]  %s87_s17, 64, %s89_s28, [#allocation11]  }
  0x10   :  { %s135_s8 = sshll.u32 %s7836_s14, 4  ;;  %s7329_s21 = smov [#allocation13]   ;;  %s136_s8 = int_to_ptr.hbm [resolvable:$true] %s135_s8 }
  0x11   :  { %s112_s1 = sshll.u32 %s7329_s21, 4  ;;  %s7330_s22 = smov [#allocation16]   ;;  %s113_s1 = int_to_ptr.vmem [resolvable:$true] %s112_s1 }
  0x12   :  { %115 = dma.hbm_to_vmem [thread:$0]  %s111_s0, 64, %s113_s1, [#allocation14]  }
  0x13   :  { %s137_s2 = sshll.u32 %s7330_s22, 4  ;;  %s7846_s9 = sld [smem:[#allocation28_spill]]  ;;  %s138_s2 = int_to_ptr.vmem [resolvable:$true] %s137_s2 }
  0x14   :  { %143 = dma.hbm_to_vmem [thread:$0]  %s136_s8, 16384, %s138_s2, [#allocation17], %s7326_s3, %s7326_s3, %s7327_s26  }
  0x15   :  { %s70_s14 = sshll.u32 %s7828_s6, 4  ;;  %s7331_s27 = smov [#allocation4]   ;;  %s71_s14 = int_to_ptr.hbm [resolvable:$true] %s70_s14 }
  0x16   :  { %s45_s28 = sshll.u32 %s7331_s27, 4  ;;  %s7332_s29 = smov [#allocation9]   ;;  %s46_s28 = int_to_ptr.vmem [resolvable:$true] %s45_s28 }
  0x17   :  { %s72_s4 = sshll.u32 %s7332_s29, 4  ;;  %s99_s20 = sshll.u32 %s7832_s10, 4  ;;  %s73_s4 = int_to_ptr.vmem [resolvable:$true] %s72_s4  ;;  %s100_s20 = int_to_ptr.hbm [resolvable:$true] %s99_s20 }
  0x18   :  { %78 = dma.hbm_to_vmem [thread:$0]  %s71_s14, 16384, %s73_s4, [#allocation8], %s7326_s3, %s7326_s3, %s7327_s26  }
  0x19   :  { %s43_s25 = sshll.u32 %s7846_s9, 4  ;;  %s120_s6 = sshll.u32 %s7834_s12, 4  ;;  %s44_s25 = int_to_ptr.hbm [resolvable:$true] %s43_s25  ;;  %s121_s6 = int_to_ptr.hbm [resolvable:$true] %s120_s6 }
  0x1a   :  { %48 = dma.hbm_to_vmem [thread:$0]  %s44_s25, 128, %s46_s28, [#allocation5]  }
  0x1b   :  { %s7333_s1 = smov [#allocation12]   ;;  %s7334_s2 = smov [#allocation15]  }
  0x1c   :  { %s101_s22 = sshll.u32 %s7333_s1, 4  ;;  %s122_s23 = sshll.u32 %s7334_s2, 4  ;;  %s102_s22 = int_to_ptr.vmem [resolvable:$true] %s101_s22  ;;  %s123_s23 = int_to_ptr.vmem [resolvable:$true] %s122_s23 }
  0x1d   :  { %104 = dma.hbm_to_vmem [thread:$0]  %s100_s20, 512, %s102_s22, [#allocation11]  }
  0x1e   :  { %s149_s10 = sshll.u32 %s7837_s15, 4  ;;  %s164_s12 = sshll.u32 %s7839_s18, 4  ;;  %s150_s10 = int_to_ptr.hbm [resolvable:$true] %s149_s10  ;;  %s165_s12 = int_to_ptr.vmem [resolvable:$true] %s164_s12 }
  0x1f   :  { %128 = dma.hbm_to_vmem [thread:$0]  %s121_s6, 16384, %s123_s23, [#allocation14], %s7326_s3, %s7326_s3, %s7327_s26  }
  0x20   :  { %s7335_s17 = smov [#allocation18]   ;;  %s7336_s27 = smov [#allocation19]  }
  0x21   :  { %s151_s14 = sshll.u32 %s7335_s17, 4  ;;  %s152_s14 = int_to_ptr.vmem [resolvable:$true] %s151_s14 }
  0x22   :  { %154 = dma.hbm_to_vmem [thread:$0]  %s150_s10, 64, %s152_s14, [#allocation17]  }
  0x23   :  { %167 = dma.vmem_to_smem %s165_s12, 16, %s7336_s27, [#allocation6]  }
  0x24   :  { %7313 = dma.done.wait [#allocation5], 128  }
  0x25   :  { %7314 = vsyncadd [#allocation5], 4294967168 }
  0x26   :  { %7315 = dma.done.wait [#allocation8], 32768  }
  0x27   :  { %7316 = vsyncadd [#allocation8], 4294934528 }
  0x28   :  { %7317 = dma.done.wait [#allocation11], 576  }
  0x29   :  { %7318 = vsyncadd [#allocation11], 4294966720 }
  0x2a   :  { %7319 = dma.done.wait [#allocation14], 16448  }
  0x2b   :  { %7320 = vsyncadd [#allocation14], 4294950848 }
  0x2c   :  { %7321 = dma.done.wait [#allocation17], 16448  }
  0x2d   :  { %7322 = vsyncadd [#allocation17], 4294950848 }
  0x2e   :  { %7323 = dma.done.wait [#allocation6], 16  }
  0x2f   :  { %7324 = vsyncadd [#allocation6], 4294967280 }
  0x30   :  { %208 = sfence }
  0x31   :  { %s7847_s3 = sld [smem:[#allocation26_spill]]  ;;  %v4603_v3 = vld [vmem:[#allocation7 + $0xe0] sm:$0xf]  ;;  %v7337_v4 = vmov 0   ;;  %v6570_v5 = vld [vmem:[#allocation7 + $0xec] sm:$0xf0] }
  0x32   :  { %7070 = vset.pattern.permute.xlu0 %v7337_v4  ;;  %v4731_v6 = vld [vmem:[#allocation7 + $0x1e0] sm:$0xf]  ;;  %v6602_v7 = vld [vmem:[#allocation7 + $0x1ec] sm:$0xf0]  ;;  %7072 = vset.pattern.permute.xlu1 %v7337_v4  ;;  %v4604_v8 = vor.u32 %v6570_v5, %v4603_v3  ;;  %v7338_v43 = vmov 1   ;;  %s7848_s29 = sld [smem:[#allocation29_spill]] }
  0x33   :  { %v4732_v9 = vor.u32 %v6602_v7, %v4731_v6  ;;  %v4859_v10 = vld [vmem:[#allocation7 + $0x2e0] sm:$0xf]  ;;  %v6634_v11 = vld [vmem:[#allocation7 + $0x2ec] sm:$0xf0]  ;;  %s7849_s30 = sld [smem:[#allocation27_spill]]  ;;  %vm4477_vm4 = vcmask 7168  }
  0x34   :  { %v4987_v12 = vld [vmem:[#allocation7 + $0x3e0] sm:$0xf]  ;;  %v4860_v13 = vor.u32 %v6634_v11, %v4859_v10  ;;  %v6666_v14 = vld [vmem:[#allocation7 + $0x3ec] sm:$0xf0]  ;;  %1052 = vmatpush.bf16.msra.mxu0 %v4604_v8  ;;  %s6537_s22 = sld [smem:[#allocation19 + $0x1]] }
  0x35   :  { %v4587_v15 = vld [vmem:[#allocation7 + $0xc0] sm:$0xf]  ;;  %v6566_v16 = vld [vmem:[#allocation7 + $0xcc] sm:$0xf0]  ;;  %1065 = vmatpush.bf16.msra.mxu1 %v4732_v9  ;;  %v4988_v17 = vor.u32 %v6666_v14, %v4987_v12  ;;  %s6538_s2 = sld [smem:[#allocation19 + $0x2]] }
  0x36   :  { %v4588_v18 = vor.u32 %v6566_v16, %v4587_v15  ;;  %v4715_v19 = vld [vmem:[#allocation7 + $0x1c0] sm:$0xf]  ;;  %v6598_v20 = vld [vmem:[#allocation7 + $0x1cc] sm:$0xf0]  ;;  %1078 = vmatpush.bf16.msra.mxu2 %v4860_v13 }
  0x37   :  { %v209_v2 = vld [vmem:[%s7847_s3] sm:$0xff]  ;;  %v4843_v21 = vld [vmem:[#allocation7 + $0x2c0] sm:$0xf]  ;;  %v4716_v22 = vor.u32 %v6598_v20, %v4715_v19  ;;  %v6630_v23 = vld [vmem:[#allocation7 + $0x2cc] sm:$0xf0]  ;;  %1091 = vmatpush.bf16.msra.mxu3 %v4988_v17 }
  0x38   :  { %214 = vperm.xlu0 %7070, %v209_v2   ;;  %v4971_v24 = vld [vmem:[#allocation7 + $0x3c0] sm:$0xf]  ;;  %v6662_v25 = vld [vmem:[#allocation7 + $0x3cc] sm:$0xf0]  ;;  %v4844_v26 = vor.u32 %v6630_v23, %v4843_v21  ;;  %1053 = vmatpush.bf16.msra.mxu0 %v4588_v18 }
  0x39   :  { %v4972_v27 = vor.u32 %v6662_v25, %v4971_v24  ;;  %v4571_v28 = vld [vmem:[#allocation7 + $0xa0] sm:$0xf]  ;;  %v6562_v29 = vld [vmem:[#allocation7 + $0xac] sm:$0xf0]  ;;  %1066 = vmatpush.bf16.msra.mxu1 %v4716_v22 }
  0x3a   :  { %v4699_v30 = vld [vmem:[#allocation7 + $0x1a0] sm:$0xf]  ;;  %v6594_v31 = vld [vmem:[#allocation7 + $0x1ac] sm:$0xf0]  ;;  %v4572_v34 = vor.u32 %v6562_v29, %v4571_v28  ;;  %1079 = vmatpush.bf16.msra.mxu2 %v4844_v26 }
  0x3b   :  { %v4827_v32 = vld [vmem:[#allocation7 + $0x2a0] sm:$0xf]  ;;  %v6626_v33 = vld [vmem:[#allocation7 + $0x2ac] sm:$0xf0]  ;;  %v4700_v35 = vor.u32 %v6594_v31, %v4699_v30  ;;  %1092 = vmatpush.bf16.msra.mxu3 %v4972_v27 }
  0x3c   :  { %v4955_v36 = vld [vmem:[#allocation7 + $0x3a0] sm:$0xf]  ;;  %v6658_v37 = vld [vmem:[#allocation7 + $0x3ac] sm:$0xf0]  ;;  %v4828_v39 = vor.u32 %v6626_v33, %v4827_v32  ;;  %1054 = vmatpush.bf16.msra.mxu0 %v4572_v34  ;;  %v6568_v33 = vld [vmem:[#allocation7 + $0xe4] sm:$0xf] }
  0x3d   :  { %v4555_v38 = vld [vmem:[#allocation7 + $0x80] sm:$0xf]  ;;  %v6558_v40 = vld [vmem:[#allocation7 + $0x8c] sm:$0xf0]  ;;  %v4956_v44 = vor.u32 %v6658_v37, %v4955_v36  ;;  %1067 = vmatpush.bf16.msra.mxu1 %v4700_v35  ;;  %v4605_v34 = vld [vmem:[#allocation7 + $0xf0] sm:$0xf0] }
  0x3e   :  { %v4683_v41 = vld [vmem:[#allocation7 + $0x180] sm:$0xf]  ;;  %v6590_v42 = vld [vmem:[#allocation7 + $0x18c] sm:$0xf0]  ;;  %v4556_v49 = vor.u32 %v6558_v40, %v4555_v38  ;;  %1080 = vmatpush.bf16.msra.mxu2 %v4828_v39  ;;  %v6600_v35 = vld [vmem:[#allocation7 + $0x1e4] sm:$0xf] }
  0x3f   :  { %v4811_v45 = vld [vmem:[#allocation7 + $0x280] sm:$0xf]  ;;  %v6622_v46 = vld [vmem:[#allocation7 + $0x28c] sm:$0xf0]  ;;  %v4684_v50 = vor.u32 %v6590_v42, %v4683_v41  ;;  %1093 = vmatpush.bf16.msra.mxu3 %v4956_v44  ;;  %v4733_v36 = vld [vmem:[#allocation7 + $0x1f0] sm:$0xf0] }
  0x40   :  { %7071 = vset.pattern.permute.xlu0 %v7338_v43  ;;  %v4939_v47 = vld [vmem:[#allocation7 + $0x380] sm:$0xf]  ;;  %v6654_v48 = vld [vmem:[#allocation7 + $0x38c] sm:$0xf0]  ;;  %v4812_v52 = vor.u32 %v6622_v46, %v4811_v45  ;;  %1055 = vmatpush.bf16.msra.mxu0 %v4556_v49  ;;  %v6632_v37 = vld [vmem:[#allocation7 + $0x2e4] sm:$0xf]  ;;  %v4608_v45 = vor.u32 %v6568_v33, %v4605_v34 }
  0x41   :  { %246 = vperm.xlu0 %7071, %v209_v2   ;;  %v4539_v51 = vld [vmem:[#allocation7 + $0x60] sm:$0xf]  ;;  %v6554_v53 = vld [vmem:[#allocation7 + $0x6c] sm:$0xf0]  ;;  %v4940_v56 = vor.u32 %v6654_v48, %v4939_v47  ;;  %1068 = vmatpush.bf16.msra.mxu1 %v4684_v50  ;;  %v4861_v40 = vld [vmem:[#allocation7 + $0x2f0] sm:$0xf0]  ;;  %v4736_v48 = vor.u32 %v6600_v35, %v4733_v36 }
  0x42   :  { %v4667_v54 = vld [vmem:[#allocation7 + $0x160] sm:$0xf]  ;;  %v6586_v55 = vld [vmem:[#allocation7 + $0x16c] sm:$0xf0]  ;;  %v4540_v61 = vor.u32 %v6554_v53, %v4539_v51  ;;  %1081 = vmatpush.bf16.msra.mxu2 %v4812_v52  ;;  %v6664_v41 = vld [vmem:[#allocation7 + $0x3e4] sm:$0xf]  ;;  %v4864_v52 = vor.u32 %v6632_v37, %v4861_v40 }
  0x43   :  { %v4795_v57 = vld [vmem:[#allocation7 + $0x260] sm:$0xf]  ;;  %v6618_v58 = vld [vmem:[#allocation7 + $0x26c] sm:$0xf0]  ;;  %v4668_v62 = vor.u32 %v6586_v55, %v4667_v54  ;;  %1094 = vmatpush.bf16.msra.mxu3 %v4940_v56  ;;  %v4989_v42 = vld [vmem:[#allocation7 + $0x3f0] sm:$0xf0] }
  0x44   :  { %v4923_v59 = vld [vmem:[#allocation7 + $0x360] sm:$0xf]  ;;  %v6650_v60 = vld [vmem:[#allocation7 + $0x36c] sm:$0xf0]  ;;  %v4796_v0 = vor.u32 %v6618_v58, %v4795_v57  ;;  %1056 = vmatpush.bf16.msra.mxu0 %v4540_v61  ;;  %v6564_v46 = vld [vmem:[#allocation7 + $0xc4] sm:$0xf]  ;;  %v4992_v53 = vor.u32 %v6664_v41, %v4989_v42 }
  0x45   :  { %v4523_v63 = vld [vmem:[#allocation7 + $0x40] sm:$0xf]  ;;  %v6550_v1 = vld [vmem:[#allocation7 + $0x4c] sm:$0xf0]  ;;  %v4924_v4 = vor.u32 %v6650_v60, %v4923_v59  ;;  %1069 = vmatpush.bf16.msra.mxu1 %v4668_v62  ;;  %v4589_v49 = vld [vmem:[#allocation7 + $0xd0] sm:$0xf0] }
  0x46   :  { %v4651_v2 = vld [vmem:[#allocation7 + $0x140] sm:$0xf]  ;;  %v6582_v3 = vld [vmem:[#allocation7 + $0x14c] sm:$0xf0]  ;;  %v4524_v9 = vor.u32 %v6550_v1, %v4523_v63  ;;  %1082 = vmatpush.bf16.msra.mxu2 %v4796_v0  ;;  %v6596_v50 = vld [vmem:[#allocation7 + $0x1c4] sm:$0xf]  ;;  %v4592_v58 = vor.u32 %v6564_v46, %v4589_v49 }
  0x47   :  { %v4779_v5 = vld [vmem:[#allocation7 + $0x240] sm:$0xf]  ;;  %v6614_v6 = vld [vmem:[#allocation7 + $0x24c] sm:$0xf0]  ;;  %v4652_v10 = vor.u32 %v6582_v3, %v4651_v2  ;;  %1095 = vmatpush.bf16.msra.mxu3 %v4924_v4  ;;  %v4717_v51 = vld [vmem:[#allocation7 + $0x1d0] sm:$0xf0] }
  0x48   :  { %v4907_v7 = vld [vmem:[#allocation7 + $0x340] sm:$0xf]  ;;  %v6646_v8 = vld [vmem:[#allocation7 + $0x34c] sm:$0xf0]  ;;  %v4780_v12 = vor.u32 %v6614_v6, %v4779_v5  ;;  %1057 = vmatpush.bf16.msra.mxu0 %v4524_v9  ;;  %v6628_v54 = vld [vmem:[#allocation7 + $0x2c4] sm:$0xf]  ;;  %v4720_v59 = vor.u32 %v6596_v50, %v4717_v51 }
  0x49   :  { %v4507_v11 = vld [vmem:[#allocation7 + $0x20] sm:$0xf]  ;;  %v6546_v13 = vld [vmem:[#allocation7 + $0x2c] sm:$0xf0]  ;;  %v4908_v16 = vor.u32 %v6646_v8, %v4907_v7  ;;  %1070 = vmatpush.bf16.msra.mxu1 %v4652_v10  ;;  %v4845_v55 = vld [vmem:[#allocation7 + $0x2d0] sm:$0xf0] }
  0x4a   :  { %v4635_v14 = vld [vmem:[#allocation7 + $0x120] sm:$0xf]  ;;  %v6578_v15 = vld [vmem:[#allocation7 + $0x12c] sm:$0xf0]  ;;  %v4508_v22 = vor.u32 %v6546_v13, %v4507_v11  ;;  %1083 = vmatpush.bf16.msra.mxu2 %v4780_v12  ;;  %v6660_v56 = vld [vmem:[#allocation7 + $0x3c4] sm:$0xf]  ;;  %v4848_v62 = vor.u32 %v6628_v54, %v4845_v55 }
  0x4b   :  { %v4763_v17 = vld [vmem:[#allocation7 + $0x220] sm:$0xf]  ;;  %v6610_v18 = vld [vmem:[#allocation7 + $0x22c] sm:$0xf0]  ;;  %v4636_v23 = vor.u32 %v6578_v15, %v4635_v14  ;;  %1096 = vmatpush.bf16.msra.mxu3 %v4908_v16  ;;  %v4973_v57 = vld [vmem:[#allocation7 + $0x3d0] sm:$0xf0] }
  0x4c   :  { %v4891_v19 = vld [vmem:[#allocation7 + $0x320] sm:$0xf]  ;;  %v6642_v20 = vld [vmem:[#allocation7 + $0x32c] sm:$0xf0]  ;;  %v4764_v27 = vor.u32 %v6610_v18, %v4763_v17  ;;  %1058 = vmatpush.bf16.msra.mxu0 %v4508_v22  ;;  %v6560_v60 = vld [vmem:[#allocation7 + $0xa4] sm:$0xf]  ;;  %v4976_v63 = vor.u32 %v6660_v56, %v4973_v57 }
  0x4d   :  { %v4491_v21 = vld [vmem:[#allocation7] sm:$0xf]  ;;  %v6542_v24 = vld [vmem:[#allocation7 + $0xc] sm:$0xf0]  ;;  %v4892_v31 = vor.u32 %v6642_v20, %v4891_v19  ;;  %1071 = vmatpush.bf16.msra.mxu1 %v4636_v23  ;;  %v4573_v61 = vld [vmem:[#allocation7 + $0xb0] sm:$0xf0] }
  0x4e   :  { %v4619_v25 = vld [vmem:[#allocation7 + $0x100] sm:$0xf]  ;;  %v6574_v26 = vld [vmem:[#allocation7 + $0x10c] sm:$0xf0]  ;;  %v4492_v38 = vor.u32 %v6542_v24, %v4491_v21  ;;  %1084 = vmatpush.bf16.msra.mxu2 %v4764_v27  ;;  %v6592_v0 = vld [vmem:[#allocation7 + $0x1a4] sm:$0xf]  ;;  %v4576_v6 = vor.u32 %v6560_v60, %v4573_v61 }
  0x4f   :  { %v4747_v28 = vld [vmem:[#allocation7 + $0x200] sm:$0xf]  ;;  %v6606_v29 = vld [vmem:[#allocation7 + $0x20c] sm:$0xf0]  ;;  %v4620_v39 = vor.u32 %v6574_v26, %v4619_v25  ;;  %1097 = vmatpush.bf16.msra.mxu3 %v4892_v31  ;;  %v4701_v1 = vld [vmem:[#allocation7 + $0x1b0] sm:$0xf0] }
  0x50   :  { %v4875_v30 = vld [vmem:[#allocation7 + $0x300] sm:$0xf]  ;;  %v6638_v32 = vld [vmem:[#allocation7 + $0x30c] sm:$0xf0]  ;;  %v4748_v44 = vor.u32 %v6606_v29, %v4747_v28  ;;  %1059 = vmatpush.bf16.msra.mxu0 %v4492_v38  ;;  %v6624_v2 = vld [vmem:[#allocation7 + $0x2a4] sm:$0xf]  ;;  %v4704_v7 = vor.u32 %v6592_v0, %v4701_v1 }
  0x51   :  { %v4876_v47 = vor.u32 %v6638_v32, %v4875_v30  ;;  %1072 = vmatpush.bf16.msra.mxu1 %v4620_v39  ;;  %v4829_v3 = vld [vmem:[#allocation7 + $0x2b0] sm:$0xf0]  ;;  %v6656_v4 = vld [vmem:[#allocation7 + $0x3a4] sm:$0xf] }
  0x52   :  { %1085 = vmatpush.bf16.msra.mxu2 %v4748_v44  ;;  %v4957_v5 = vld [vmem:[#allocation7 + $0x3b0] sm:$0xf0]  ;;  %v4832_v8 = vor.u32 %v6624_v2, %v4829_v3  ;;  %v6556_v10 = vld [vmem:[#allocation7 + $0x84] sm:$0xf] }
  0x53   :  { %1098 = vmatpush.bf16.msra.mxu3 %v4876_v47  ;;  %v4960_v9 = vor.u32 %v6656_v4, %v4957_v5  ;;  %v4557_v11 = vld [vmem:[#allocation7 + $0x90] sm:$0xf0]  ;;  %v6588_v12 = vld [vmem:[#allocation7 + $0x184] sm:$0xf] }
  0x54   :  { %1104 = vmatpush.bf16.msrb.mxu0 %v4608_v45  ;;  %v4560_v13 = vor.u32 %v6556_v10, %v4557_v11  ;;  %v4685_v14 = vld [vmem:[#allocation7 + $0x190] sm:$0xf0]  ;;  %v6620_v15 = vld [vmem:[#allocation7 + $0x284] sm:$0xf] }
  0x55   :  { %1117 = vmatpush.bf16.msrb.mxu1 %v4736_v48  ;;  %v4813_v16 = vld [vmem:[#allocation7 + $0x290] sm:$0xf0]  ;;  %v4688_v17 = vor.u32 %v6588_v12, %v4685_v14  ;;  %v6652_v19 = vld [vmem:[#allocation7 + $0x384] sm:$0xf] }
  0x56   :  { %1130 = vmatpush.bf16.msrb.mxu2 %v4864_v52  ;;  %v4816_v18 = vor.u32 %v6620_v15, %v4813_v16  ;;  %v4941_v20 = vld [vmem:[#allocation7 + $0x390] sm:$0xf0]  ;;  %v6552_v22 = vld [vmem:[#allocation7 + $0x64] sm:$0xf] }
  0x57   :  { %1143 = vmatpush.bf16.msrb.mxu3 %v4992_v53  ;;  %v4944_v21 = vor.u32 %v6652_v19, %v4941_v20  ;;  %v4541_v23 = vld [vmem:[#allocation7 + $0x70] sm:$0xf0]  ;;  %v6584_v24 = vld [vmem:[#allocation7 + $0x164] sm:$0xf] }
  0x58   :  { %1105 = vmatpush.bf16.msrb.mxu0 %v4592_v58  ;;  %v4544_v25 = vor.u32 %v6552_v22, %v4541_v23  ;;  %v4669_v26 = vld [vmem:[#allocation7 + $0x170] sm:$0xf0]  ;;  %v6616_v27 = vld [vmem:[#allocation7 + $0x264] sm:$0xf] }
  0x59   :  { %1118 = vmatpush.bf16.msrb.mxu1 %v4720_v59  ;;  %v4797_v28 = vld [vmem:[#allocation7 + $0x270] sm:$0xf0]  ;;  %v4672_v29 = vor.u32 %v6584_v24, %v4669_v26  ;;  %v6648_v31 = vld [vmem:[#allocation7 + $0x364] sm:$0xf] }
  0x5a   :  { %1131 = vmatpush.bf16.msrb.mxu2 %v4848_v62  ;;  %v4800_v30 = vor.u32 %v6616_v27, %v4797_v28  ;;  %v4925_v32 = vld [vmem:[#allocation7 + $0x370] sm:$0xf0]  ;;  %v6548_v33 = vld [vmem:[#allocation7 + $0x44] sm:$0xf] }
  0x5b   :  { %1144 = vmatpush.bf16.msrb.mxu3 %v4976_v63  ;;  %v4928_v34 = vor.u32 %v6648_v31, %v4925_v32  ;;  %v4525_v35 = vld [vmem:[#allocation7 + $0x50] sm:$0xf0]  ;;  %v6580_v36 = vld [vmem:[#allocation7 + $0x144] sm:$0xf] }
  0x5c   :  { %1106 = vmatpush.bf16.msrb.mxu0 %v4576_v6  ;;  %v4653_v37 = vld [vmem:[#allocation7 + $0x150] sm:$0xf0]  ;;  %v4528_v38 = vor.u32 %v6548_v33, %v4525_v35  ;;  %v6612_v40 = vld [vmem:[#allocation7 + $0x244] sm:$0xf] }
  0x5d   :  { %1119 = vmatpush.bf16.msrb.mxu1 %v4704_v7  ;;  %v4656_v39 = vor.u32 %v6580_v36, %v4653_v37  ;;  %v4781_v41 = vld [vmem:[#allocation7 + $0x250] sm:$0xf0]  ;;  %v6644_v42 = vld [vmem:[#allocation7 + $0x344] sm:$0xf]  ;;  %v4611_v36 = vld [vmem:[#allocation7 + $0xe8] sm:$0xf] }
  0x5e   :  { %1132 = vmatpush.bf16.msrb.mxu2 %v4832_v8  ;;  %v4784_v44 = vor.u32 %v6612_v40, %v4781_v41  ;;  %v4909_v45 = vld [vmem:[#allocation7 + $0x350] sm:$0xf0]  ;;  %v6544_v47 = vld [vmem:[#allocation7 + $0x24] sm:$0xf]  ;;  %v6571_v41 = vld [vmem:[#allocation7 + $0xf4] sm:$0xf0] }
  0x5f   :  { %1145 = vmatpush.bf16.msrb.mxu3 %v4960_v9  ;;  %v4912_v46 = vor.u32 %v6644_v42, %v4909_v45  ;;  %v4509_v48 = vld [vmem:[#allocation7 + $0x30] sm:$0xf0]  ;;  %v6576_v49 = vld [vmem:[#allocation7 + $0x124] sm:$0xf]  ;;  %v4739_v42 = vld [vmem:[#allocation7 + $0x1e8] sm:$0xf] }
  0x60   :  { %1107 = vmatpush.bf16.msrb.mxu0 %v4560_v13  ;;  %v4512_v50 = vor.u32 %v6544_v47, %v4509_v48  ;;  %v4637_v51 = vld [vmem:[#allocation7 + $0x130] sm:$0xf0]  ;;  %v6608_v52 = vld [vmem:[#allocation7 + $0x224] sm:$0xf]  ;;  %v4867_v45 = vld [vmem:[#allocation7 + $0x2e8] sm:$0xf] }
  0x61   :  { %1120 = vmatpush.bf16.msrb.mxu1 %v4688_v17  ;;  %v4765_v53 = vld [vmem:[#allocation7 + $0x230] sm:$0xf0]  ;;  %v4640_v54 = vor.u32 %v6576_v49, %v4637_v51  ;;  %v6640_v56 = vld [vmem:[#allocation7 + $0x324] sm:$0xf]  ;;  %v4995_v47 = vld [vmem:[#allocation7 + $0x3e8] sm:$0xf] }
  0x62   :  { %1133 = vmatpush.bf16.msrb.mxu2 %v4816_v18  ;;  %v4768_v55 = vor.u32 %v6608_v52, %v4765_v53  ;;  %v4893_v57 = vld [vmem:[#allocation7 + $0x330] sm:$0xf0]  ;;  %v6540_v58 = vld [vmem:[#allocation7 + $0x4] sm:$0xf]  ;;  %v6667_v52 = vld [vmem:[#allocation7 + $0x3f4] sm:$0xf0]  ;;  %v4612_v53 = vor.u32 %v6571_v41, %v4611_v36 }
  0x63   :  { %1146 = vmatpush.bf16.msrb.mxu3 %v4944_v21  ;;  %v4896_v59 = vor.u32 %v6640_v56, %v4893_v57  ;;  %v4493_v60 = vld [vmem:[#allocation7 + $0x10] sm:$0xf0]  ;;  %v6572_v61 = vld [vmem:[#allocation7 + $0x104] sm:$0xf]  ;;  %v6587_v36 = vld [vmem:[#allocation7 + $0x174] sm:$0xf0] }
  0x64   :  { %1108 = vmatpush.bf16.msrb.mxu0 %v4544_v25  ;;  %v4621_v62 = vld [vmem:[#allocation7 + $0x110] sm:$0xf0]  ;;  %v4496_v63 = vor.u32 %v6540_v58, %v4493_v60  ;;  %v6604_v1 = vld [vmem:[#allocation7 + $0x204] sm:$0xf]  ;;  %v6567_v60 = vld [vmem:[#allocation7 + $0xd4] sm:$0xf0] }
  0x65   :  { %1121 = vmatpush.bf16.msrb.mxu1 %v4672_v29  ;;  %v4624_v0 = vor.u32 %v6572_v61, %v4621_v62  ;;  %v4749_v2 = vld [vmem:[#allocation7 + $0x210] sm:$0xf0]  ;;  %v6636_v3 = vld [vmem:[#allocation7 + $0x304] sm:$0xf]  ;;  %v4996_v62 = vor.u32 %v6667_v52, %v4995_v47  ;;  %v4915_v52 = vld [vmem:[#allocation7 + $0x348] sm:$0xf] }
  0x66   :  { %1134 = vmatpush.bf16.msrb.mxu2 %v4800_v30  ;;  %v4752_v4 = vor.u32 %v6604_v1, %v4749_v2  ;;  %v4877_v5 = vld [vmem:[#allocation7 + $0x310] sm:$0xf0]  ;;  %v211_v7 = vld [vmem:[#allocation4] ss:$2 sm:$0xf] }
  0x67   :  { %1147 = vmatpush.bf16.msrb.mxu3 %v4928_v34  ;;  %v4880_v6 = vor.u32 %v6636_v3, %v4877_v5  ;;  %v210_v9 = vld [vmem:[%s7848_s29] sm:$0xf]  ;;  %v218_v10 = vperm.slane %v211_v7, 0  ;;  %v219_v11 = vperm.slane %v211_v7, 1  ;;  %v220_v12 = vperm.slane %v211_v7, 2 }
  0x68   :  { %1109 = vmatpush.bf16.msrb.mxu0 %v4528_v38  ;;  %v221_v13 = vperm.slane %v211_v7, 3  ;;  %v244_v14 = vld [vmem:[#allocation4 + $0x1] ss:$2 sm:$0xf]  ;;  %v231_v15 = vperm.slane %v210_v9, 0  ;;  %v232_v16 = vperm.slane %v210_v9, 1 }
  0x69   :  { %1122 = vmatpush.bf16.msrb.mxu1 %v4656_v39  ;;  %v233_v17 = vperm.slane %v210_v9, 2  ;;  %v234_v18 = vperm.slane %v210_v9, 3  ;;  %v250_v23 = vperm.slane %v244_v14, 0  ;;  %v251_v24 = vperm.slane %v244_v14, 1  ;;  %v4851_v1 = vld [vmem:[#allocation7 + $0x2c8] sm:$0xf] }
  0x6a   :  { %1135 = vmatpush.bf16.msrb.mxu2 %v4784_v44  ;;  %v252_v25 = vperm.slane %v244_v14, 2  ;;  %v253_v26 = vperm.slane %v244_v14, 3  ;;  %v6603_v44 = vld [vmem:[#allocation7 + $0x1f4] sm:$0xf0]  ;;  %v4979_v3 = vld [vmem:[#allocation7 + $0x3c8] sm:$0xf] }
  0x6b   :  { %1148 = vmatpush.bf16.msrb.mxu3 %v4912_v46  ;;  %v6635_v46 = vld [vmem:[#allocation7 + $0x2f4] sm:$0xf0]  ;;  %v4579_v7 = vld [vmem:[#allocation7 + $0xa8] sm:$0xf] }
  0x6c   :  { %1110 = vmatpush.bf16.msrb.mxu0 %v4512_v50  ;;  %v4868_v61 = vor.u32 %v6635_v46, %v4867_v45  ;;  %v6631_v2 = vld [vmem:[#allocation7 + $0x2d4] sm:$0xf0] }
  0x6d   :  { %1123 = vmatpush.bf16.msrb.mxu1 %v4640_v54  ;;  %v4740_v54 = vor.u32 %v6603_v44, %v4739_v42  ;;  %v4852_v9 = vor.u32 %v6631_v2, %v4851_v1  ;;  %v6627_v14 = vld [vmem:[#allocation7 + $0x2b4] sm:$0xf0]  ;;  %v4531_v44 = vld [vmem:[#allocation7 + $0x48] sm:$0xf] }
  0x6e   :  { %1136 = vmatpush.bf16.msrb.mxu2 %v4768_v55  ;;  %v6551_v45 = vld [vmem:[#allocation7 + $0x54] sm:$0xf0]  ;;  %v4771_v2 = vld [vmem:[#allocation7 + $0x228] sm:$0xf] }
  0x6f   :  { %1149 = vmatpush.bf16.msrb.mxu3 %v4896_v59  ;;  %v4595_v59 = vld [vmem:[#allocation7 + $0xc8] sm:$0xf]  ;;  %v6579_v1 = vld [vmem:[#allocation7 + $0x134] sm:$0xf0] }
  0x70   :  { %1111 = vmatpush.bf16.msrb.mxu0 %v4496_v63  ;;  %v4723_v63 = vld [vmem:[#allocation7 + $0x1c8] sm:$0xf]  ;;  %v4596_v5 = vor.u32 %v6567_v60, %v4595_v59 }
  0x71   :  { %1124 = vmatpush.bf16.msrb.mxu1 %v4624_v0  ;;  %v6599_v0 = vld [vmem:[#allocation7 + $0x1d4] sm:$0xf0]  ;;  %v4515_v60 = vld [vmem:[#allocation7 + $0x28] sm:$0xf] }
  0x72   :  { %1137 = vmatpush.bf16.msrb.mxu2 %v4752_v4  ;;  %v6663_v4 = vld [vmem:[#allocation7 + $0x3d4] sm:$0xf0] }
  0x73   :  { %1150 = vmatpush.bf16.msrb.mxu3 %v4880_v6  ;;  %v4724_v6 = vor.u32 %v6599_v0, %v4723_v63  ;;  %v4643_v0 = vld [vmem:[#allocation7 + $0x128] sm:$0xf] }
  0xaa   :  { %v215_v8 = vpop.permute.xlu0 %214 }
  0xab   :  { %v226_v19 = vmul.f32 %v218_v10, %v215_v8  ;;  %v227_v20 = vmul.f32 %v219_v11, %v215_v8  ;;  %v228_v21 = vmul.f32 %v220_v12, %v215_v8  ;;  %v229_v22 = vmul.f32 %v221_v13, %v215_v8  ;;  %v6563_v8 = vld [vmem:[#allocation7 + $0xb4] sm:$0xf0]  ;;  %v4707_v11 = vld [vmem:[#allocation7 + $0x1a8] sm:$0xf] }
  0xac   :  { %v4980_v10 = vor.u32 %v6663_v4, %v4979_v3  ;;  %v6595_v12 = vld [vmem:[#allocation7 + $0x1b4] sm:$0xf0]  ;;  %v4835_v13 = vld [vmem:[#allocation7 + $0x2a8] sm:$0xf] }
  0xad   :  { %v239_v27 = vadd.f32 %v231_v15, %v226_v19  ;;  %v240_v28 = vadd.f32 %v232_v16, %v227_v20  ;;  %v241_v29 = vadd.f32 %v233_v17, %v228_v21  ;;  %v242_v30 = vadd.f32 %v234_v18, %v229_v22  ;;  %v4963_v15 = vld [vmem:[#allocation7 + $0x3a8] sm:$0xf]  ;;  %v6659_v16 = vld [vmem:[#allocation7 + $0x3b4] sm:$0xf0] }
  0xae   :  { %v4580_v17 = vor.u32 %v6563_v8, %v4579_v7  ;;  %v4708_v18 = vor.u32 %v6595_v12, %v4707_v11  ;;  %v4563_v19 = vld [vmem:[#allocation7 + $0x88] sm:$0xf]  ;;  %v6559_v20 = vld [vmem:[#allocation7 + $0x94] sm:$0xf0]  ;;  %v4836_v21 = vor.u32 %v6627_v14, %v4835_v13  ;;  %v4964_v22 = vor.u32 %v6659_v16, %v4963_v15 }
  0xaf   :  { %v6611_v3 = vld [vmem:[#allocation7 + $0x234] sm:$0xf0]  ;;  %v4899_v4 = vld [vmem:[#allocation7 + $0x328] sm:$0xf]  ;;  %v4644_v8 = vor.u32 %v6579_v1, %v4643_v0  ;;  %v6589_v1 = vld [vmem:[#allocation7 + $0x18c] sm:$0xf] }
  0xb0   :  { %v6575_v11 = vld [vmem:[#allocation7 + $0x114] sm:$0xf0]  ;;  %v4772_v12 = vor.u32 %v6611_v3, %v4771_v2  ;;  %v4755_v14 = vld [vmem:[#allocation7 + $0x208] sm:$0xf]  ;;  %v4693_v2 = vld [vmem:[#allocation7 + $0x198] sm:$0xf0] }
  0xb1   :  { %v6607_v15 = vld [vmem:[#allocation7 + $0x214] sm:$0xf0]  ;;  %v4883_v16 = vld [vmem:[#allocation7 + $0x308] sm:$0xf]  ;;  %v6621_v3 = vld [vmem:[#allocation7 + $0x28c] sm:$0xf] }
  0xb3   :  { %v247_v31 = vpop.permute.xlu0 %246 }
  0xb4   :  { %v258_v32 = vmul.f32 %v250_v23, %v247_v31  ;;  %v259_v33 = vmul.f32 %v251_v24, %v247_v31  ;;  %v260_v34 = vmul.f32 %v252_v25, %v247_v31  ;;  %v261_v35 = vmul.f32 %v253_v26, %v247_v31  ;;  %v4691_v23 = vld [vmem:[#allocation7 + $0x188] sm:$0xf]  ;;  %v6591_v24 = vld [vmem:[#allocation7 + $0x194] sm:$0xf0] }
  0xb5   :  { %v4819_v25 = vld [vmem:[#allocation7 + $0x288] sm:$0xf]  ;;  %v6623_v26 = vld [vmem:[#allocation7 + $0x294] sm:$0xf0] }
  0xb6   :  { %v262_v37 = vadd.f32 %v258_v32, %v239_v27  ;;  %v263_v38 = vadd.f32 %v259_v33, %v240_v28  ;;  %v264_v39 = vadd.f32 %v260_v34, %v241_v29  ;;  %v265_v40 = vadd.f32 %v261_v35, %v242_v30  ;;  %v4947_v27 = vld [vmem:[#allocation7 + $0x388] sm:$0xf]  ;;  %v6655_v28 = vld [vmem:[#allocation7 + $0x394] sm:$0xf0] }
  0xb7   :  { %v4564_v29 = vor.u32 %v6559_v20, %v4563_v19  ;;  %v4692_v30 = vor.u32 %v6591_v24, %v4691_v23  ;;  %v4547_v31 = vld [vmem:[#allocation7 + $0x68] sm:$0xf]  ;;  %v6555_v32 = vld [vmem:[#allocation7 + $0x74] sm:$0xf0]  ;;  %v4820_v33 = vor.u32 %v6623_v26, %v4819_v25  ;;  %v4948_v34 = vor.u32 %v6655_v28, %v4947_v27  ;;  %v4613_v19 = vld [vmem:[#allocation7 + $0xf8] sm:$0xf0] }
  0xb8   :  { %v266_v48 = vmax.f32 %v262_v37, 0.0  ;;  %v267_v49 = vmax.f32 %v263_v38, 0.0  ;;  %v268_v50 = vmax.f32 %v264_v39, 0.0  ;;  %v269_v51 = vmax.f32 %v265_v40, 0.0  ;;  %v4675_v35 = vld [vmem:[#allocation7 + $0x168] sm:$0xf] }
  0xb9   :  { %v4803_v37 = vld [vmem:[#allocation7 + $0x268] sm:$0xf]  ;;  %v6619_v38 = vld [vmem:[#allocation7 + $0x274] sm:$0xf0]  ;;  %v4548_v41 = vor.u32 %v6555_v32, %v4547_v31  ;;  %v4676_v42 = vor.u32 %v6587_v36, %v4675_v35  ;;  %v6601_v20 = vld [vmem:[#allocation7 + $0x1ec] sm:$0xf]  ;;  %v4756_v28 = vor.u32 %v6607_v15, %v4755_v14 }
  0xba   :  { %v7498_v55 = vpack.c.bf16 %v266_v48, %v266_v48  ;;  %v7500_v56 = vpack.c.bf16 %v267_v49, %v267_v49  ;;  %v7502_v57 = vpack.c.bf16 %v268_v50, %v268_v50  ;;  %v7504_v58 = vpack.c.bf16 %v269_v51, %v269_v51  ;;  %v4931_v39 = vld [vmem:[#allocation7 + $0x368] sm:$0xf]  ;;  %v6651_v40 = vld [vmem:[#allocation7 + $0x374] sm:$0xf0]  ;;  %v4869_v25 = vld [vmem:[#allocation7 + $0x2f8] sm:$0xf0] }
  0xbb   :  { %v4804_v46 = vor.u32 %v6619_v38, %v4803_v37  ;;  %v4932_v47 = vor.u32 %v6651_v40, %v4931_v39  ;;  %v4659_v48 = vld [vmem:[#allocation7 + $0x148] sm:$0xf]  ;;  %v6583_v49 = vld [vmem:[#allocation7 + $0x154] sm:$0xf0]  ;;  %v6665_v26 = vld [vmem:[#allocation7 + $0x3ec] sm:$0xf] }
  0xbc   :  { %1060 = vmatmul.bf16.vlgmr.msra.gmra.mxu0 %v7498_v55  ;;  %1073 = vmatmul.bf16.vlgmr.msra.gmra.mxu1 %v7500_v56  ;;  %v4787_v50 = vld [vmem:[#allocation7 + $0x248] sm:$0xf]  ;;  %v6615_v51 = vld [vmem:[#allocation7 + $0x254] sm:$0xf0]  ;;  %v4660_v59 = vor.u32 %v6583_v49, %v4659_v48  ;;  %v4997_v27 = vld [vmem:[#allocation7 + $0x3f8] sm:$0xf0] }
  0xbd   :  { %1086 = vmatmul.bf16.vlgmr.msra.gmra.mxu2 %v7502_v57  ;;  %1099 = vmatmul.bf16.vlgmr.msra.gmra.mxu3 %v7504_v58  ;;  %v6565_v32 = vld [vmem:[#allocation7 + $0xcc] sm:$0xf]  ;;  %v5000_v35 = vor.u32 %v6665_v26, %v4997_v27  ;;  %v4725_v37 = vld [vmem:[#allocation7 + $0x1d8] sm:$0xf0] }
  0xbe   :  { %1156 = vmatpush.bf16.msra.mxu0 %v4612_v53  ;;  %1169 = vmatpush.bf16.msra.mxu1 %v4740_v54  ;;  %v6647_v53 = vld [vmem:[#allocation7 + $0x354] sm:$0xf0]  ;;  %v4532_v54 = vor.u32 %v6551_v45, %v4531_v44  ;;  %v6597_v36 = vld [vmem:[#allocation7 + $0x1cc] sm:$0xf]  ;;  %v4853_v39 = vld [vmem:[#allocation7 + $0x2d8] sm:$0xf0] }
  0xbf   :  { %1182 = vmatpush.bf16.msra.mxu2 %v4868_v61  ;;  %1195 = vmatpush.bf16.msra.mxu3 %v4996_v62  ;;  %v6547_v61 = vld [vmem:[#allocation7 + $0x34] sm:$0xf0]  ;;  %v4788_v62 = vor.u32 %v6615_v51, %v4787_v50  ;;  %v4916_v63 = vor.u32 %v6647_v53, %v4915_v52  ;;  %v6629_v38 = vld [vmem:[#allocation7 + $0x2cc] sm:$0xf]  ;;  %v4728_v44 = vor.u32 %v6597_v36, %v4725_v37  ;;  %v4709_v50 = vld [vmem:[#allocation7 + $0x1b8] sm:$0xf0] }
  0xc0   :  { %v4516_v7 = vor.u32 %v6547_v61, %v4515_v60  ;;  %v6661_v40 = vld [vmem:[#allocation7 + $0x3cc] sm:$0xf]  ;;  %v4837_v52 = vld [vmem:[#allocation7 + $0x2b8] sm:$0xf0] }
  0xc1   :  { %v6561_v45 = vld [vmem:[#allocation7 + $0xac] sm:$0xf]  ;;  %v4677_v14 = vld [vmem:[#allocation7 + $0x178] sm:$0xf0] }
  0xc2   :  { %1157 = vmatpush.bf16.msra.mxu0 %v4596_v5  ;;  %1170 = vmatpush.bf16.msra.mxu1 %v4724_v6  ;;  %v6643_v5 = vld [vmem:[#allocation7 + $0x334] sm:$0xf0]  ;;  %v4499_v6 = vld [vmem:[#allocation7 + $0x8] sm:$0xf]  ;;  %v6593_v49 = vld [vmem:[#allocation7 + $0x1ac] sm:$0xf] }
  0xc3   :  { %1183 = vmatpush.bf16.msra.mxu2 %v4852_v9  ;;  %1196 = vmatpush.bf16.msra.mxu3 %v4980_v10  ;;  %v6543_v9 = vld [vmem:[#allocation7 + $0x14] sm:$0xf0]  ;;  %v4627_v10 = vld [vmem:[#allocation7 + $0x108] sm:$0xf]  ;;  %v4900_v13 = vor.u32 %v6643_v5, %v4899_v4  ;;  %v6625_v51 = vld [vmem:[#allocation7 + $0x2ac] sm:$0xf]  ;;  %v4712_v60 = vor.u32 %v6593_v49, %v4709_v50 }
  0xc4   :  { %v4500_v23 = vor.u32 %v6543_v9, %v4499_v6  ;;  %v4628_v24 = vor.u32 %v6575_v11, %v4627_v10  ;;  %v6657_v53 = vld [vmem:[#allocation7 + $0x3ac] sm:$0xf]  ;;  %v4821_v4 = vld [vmem:[#allocation7 + $0x298] sm:$0xf0] }
  0xc5   :  { %v6557_v61 = vld [vmem:[#allocation7 + $0x8c] sm:$0xf]  ;;  %v4949_v6 = vld [vmem:[#allocation7 + $0x398] sm:$0xf0]  ;;  %v4824_v11 = vor.u32 %v6621_v3, %v4821_v4 }
  0xc6   :  { %1158 = vmatpush.bf16.msra.mxu0 %v4580_v17  ;;  %1171 = vmatpush.bf16.msra.mxu1 %v4708_v18  ;;  %v6639_v17 = vld [vmem:[#allocation7 + $0x314] sm:$0xf0]  ;;  %v6569_v18 = vld [vmem:[#allocation7 + $0xec] sm:$0xf]  ;;  %v4549_v10 = vld [vmem:[#allocation7 + $0x78] sm:$0xf0] }
  0xc7   :  { %1184 = vmatpush.bf16.msra.mxu2 %v4836_v21  ;;  %1197 = vmatpush.bf16.msra.mxu3 %v4964_v22  ;;  %v4741_v21 = vld [vmem:[#allocation7 + $0x1f8] sm:$0xf0]  ;;  %v6633_v22 = vld [vmem:[#allocation7 + $0x2ec] sm:$0xf] }
  0xc8   :  { %v4744_v31 = vor.u32 %v6601_v20, %v4741_v21  ;;  %v6653_v5 = vld [vmem:[#allocation7 + $0x38c] sm:$0xf]  ;;  %v4661_v26 = vld [vmem:[#allocation7 + $0x158] sm:$0xf0] }
  0xc9   :  { %v6553_v9 = vld [vmem:[#allocation7 + $0x6c] sm:$0xf] }
  0xca   :  { %1159 = vmatpush.bf16.msra.mxu0 %v4564_v29  ;;  %1172 = vmatpush.bf16.msra.mxu1 %v4692_v30  ;;  %v4884_v29 = vor.u32 %v6639_v17, %v4883_v16  ;;  %v4616_v30 = vor.u32 %v6569_v18, %v4613_v19  ;;  %v6617_v15 = vld [vmem:[#allocation7 + $0x26c] sm:$0xf]  ;;  %v4805_v16 = vld [vmem:[#allocation7 + $0x278] sm:$0xf0]  ;;  %v4552_v19 = vor.u32 %v6553_v9, %v4549_v10  ;;  %v6726_v9 = vld [vmem:[#allocation9 + $0x1cc] sm:$0xf0] }
  0xcb   :  { %1185 = vmatpush.bf16.msra.mxu2 %v4820_v33  ;;  %1198 = vmatpush.bf16.msra.mxu3 %v4948_v34  ;;  %v4597_v33 = vld [vmem:[#allocation7 + $0xd8] sm:$0xf0]  ;;  %v4872_v34 = vor.u32 %v6633_v22, %v4869_v25  ;;  %v6649_v17 = vld [vmem:[#allocation7 + $0x36c] sm:$0xf]  ;;  %v5371_v10 = vld [vmem:[#allocation9 + $0x2e0] sm:$0xf] }
  0xcc   :  { %1112 = vmatmul.bf16.vlgmr.msrb.gmra.mxu0 %v7498_v55  ;;  %1125 = vmatmul.bf16.vlgmr.msrb.gmra.mxu1 %v7500_v56  ;;  %v4933_v18 = vld [vmem:[#allocation7 + $0x378] sm:$0xf0]  ;;  %v6549_v21 = vld [vmem:[#allocation7 + $0x4c] sm:$0xf] }
  0xcd   :  { %1138 = vmatmul.bf16.vlgmr.msrb.gmra.mxu2 %v7502_v57  ;;  %1151 = vmatmul.bf16.vlgmr.msrb.gmra.mxu3 %v7504_v58  ;;  %v4533_v22 = vld [vmem:[#allocation7 + $0x58] sm:$0xf0]  ;;  %v6581_v25 = vld [vmem:[#allocation7 + $0x14c] sm:$0xf] }
  0xce   :  { %1160 = vmatpush.bf16.msra.mxu0 %v4548_v41  ;;  %1173 = vmatpush.bf16.msra.mxu1 %v4676_v42  ;;  %v4981_v41 = vld [vmem:[#allocation7 + $0x3d8] sm:$0xf0]  ;;  %v4600_v42 = vor.u32 %v6565_v32, %v4597_v33  ;;  %v6613_v27 = vld [vmem:[#allocation7 + $0x24c] sm:$0xf]  ;;  %v4664_v32 = vor.u32 %v6581_v25, %v4661_v26  ;;  %v6686_v25 = vld [vmem:[#allocation9 + $0x8c] sm:$0xf0] }
  0xcf   :  { %1186 = vmatpush.bf16.msra.mxu2 %v4804_v46  ;;  %1199 = vmatpush.bf16.msra.mxu3 %v4932_v47  ;;  %v4581_v46 = vld [vmem:[#allocation7 + $0xb8] sm:$0xf0]  ;;  %v4856_v47 = vor.u32 %v6629_v38, %v4853_v39  ;;  %v4984_v48 = vor.u32 %v6661_v40, %v4981_v41  ;;  %v6545_v33 = vld [vmem:[#allocation7 + $0x2c] sm:$0xf]  ;;  %v5195_v26 = vld [vmem:[#allocation9 + $0x180] sm:$0xf] }
  0xd0   :  { %v6577_v37 = vld [vmem:[#allocation7 + $0x12c] sm:$0xf]  ;;  %v4645_v38 = vld [vmem:[#allocation7 + $0x138] sm:$0xf0] }
  0xd1   :  { %v6609_v39 = vld [vmem:[#allocation7 + $0x22c] sm:$0xf]  ;;  %v4773_v40 = vld [vmem:[#allocation7 + $0x238] sm:$0xf0] }
  0xd2   :  { %1161 = vmatpush.bf16.msra.mxu0 %v4532_v54  ;;  %1174 = vmatpush.bf16.msra.mxu1 %v4660_v59  ;;  %v4965_v54 = vld [vmem:[#allocation7 + $0x3b8] sm:$0xf0]  ;;  %v4584_v59 = vor.u32 %v6561_v45, %v4581_v46  ;;  %v6641_v41 = vld [vmem:[#allocation7 + $0x32c] sm:$0xf]  ;;  %v4648_v45 = vor.u32 %v6577_v37, %v4645_v38  ;;  %v4776_v49 = vor.u32 %v6609_v39, %v4773_v40  ;;  %v6678_v37 = vld [vmem:[#allocation9 + $0x4c] sm:$0xf0] }
  0xd3   :  { %1187 = vmatpush.bf16.msra.mxu2 %v4788_v62  ;;  %1200 = vmatpush.bf16.msra.mxu3 %v4916_v63  ;;  %v4565_v62 = vld [vmem:[#allocation7 + $0x98] sm:$0xf0]  ;;  %v4840_v63 = vor.u32 %v6625_v51, %v4837_v52  ;;  %v4968_v0 = vor.u32 %v6657_v53, %v4965_v54  ;;  %v6541_v46 = vld [vmem:[#allocation7 + $0xc] sm:$0xf]  ;;  %v5163_v38 = vld [vmem:[#allocation9 + $0x140] sm:$0xf] }
  0xd4   :  { %v4629_v51 = vld [vmem:[#allocation7 + $0x118] sm:$0xf0]  ;;  %v6605_v52 = vld [vmem:[#allocation7 + $0x20c] sm:$0xf]  ;;  %v6710_v39 = vld [vmem:[#allocation9 + $0x14c] sm:$0xf0] }
  0xd5   :  { %v4757_v53 = vld [vmem:[#allocation7 + $0x218] sm:$0xf0]  ;;  %v6637_v54 = vld [vmem:[#allocation7 + $0x30c] sm:$0xf] }
  0xd6   :  { %1162 = vmatpush.bf16.msra.mxu0 %v4516_v7  ;;  %1175 = vmatpush.bf16.msra.mxu1 %v4644_v8  ;;  %v4568_v7 = vor.u32 %v6557_v61, %v4565_v62  ;;  %v4696_v8 = vor.u32 %v6589_v1, %v4693_v2  ;;  %v6698_v61 = vld [vmem:[#allocation9 + $0xec] sm:$0xf0]  ;;  %v5243_v62 = vld [vmem:[#allocation9 + $0x1e0] sm:$0xf]  ;;  %v4760_v2 = vor.u32 %v6605_v52, %v4757_v53 }
  0xd7   :  { %1188 = vmatpush.bf16.msra.mxu2 %v4772_v12  ;;  %1201 = vmatpush.bf16.msra.mxu3 %v4900_v13  ;;  %v4952_v12 = vor.u32 %v6653_v5, %v4949_v6  ;;  %v6585_v13 = vld [vmem:[#allocation7 + $0x16c] sm:$0xf]  ;;  %v5099_v5 = vld [vmem:[#allocation9 + $0xc0] sm:$0xf] }
  0xd8   :  { %v4680_v20 = vor.u32 %v6585_v13, %v4677_v14  ;;  %v5083_v14 = vld [vmem:[#allocation9 + $0xa0] sm:$0xf] }
  0xda   :  { %1163 = vmatpush.bf16.msra.mxu0 %v4500_v23  ;;  %1176 = vmatpush.bf16.msra.mxu1 %v4628_v24  ;;  %v4808_v23 = vor.u32 %v6617_v15, %v4805_v16  ;;  %v4936_v24 = vor.u32 %v6649_v17, %v4933_v18  ;;  %v6690_v15 = vld [vmem:[#allocation9 + $0xac] sm:$0xf0]  ;;  %v7521_v17 = vld [vmem:[%s7849_s30] sm:$0xff]  ;;  %v5211_v18 = vld [vmem:[#allocation9 + $0x1a0] sm:$0xf] }
  0xdb   :  { %1189 = vmatpush.bf16.msra.mxu2 %v4756_v28  ;;  %1202 = vmatpush.bf16.msra.mxu3 %v4884_v29  ;;  %v4789_v28 = vld [vmem:[#allocation7 + $0x258] sm:$0xf0]  ;;  %v6645_v29 = vld [vmem:[#allocation7 + $0x34c] sm:$0xf] }
  0xdc   :  { %2287 = vperm.xlu1 %7072, %v7521_v17  }
  0xdd   :  { %1164 = vmatmul.bf16.vlgmr.msra.gmra.mxu0 %v7498_v55  ;;  %1177 = vmatmul.bf16.vlgmr.msra.gmra.mxu1 %v7500_v56 }
  0xde   :  { %1208 = vmatpush.bf16.msrb.mxu0 %v4616_v30  ;;  %1221 = vmatpush.bf16.msrb.mxu1 %v4744_v31  ;;  %v4917_v30 = vld [vmem:[#allocation7 + $0x358] sm:$0xf0]  ;;  %v4536_v31 = vor.u32 %v6549_v21, %v4533_v22  ;;  %v6758_v21 = vld [vmem:[#allocation9 + $0x2cc] sm:$0xf0] }
  0xdf   :  { %1234 = vmatpush.bf16.msrb.mxu2 %v4872_v34  ;;  %1247 = vmatpush.bf16.msrb.mxu3 %v5000_v35  ;;  %v4517_v34 = vld [vmem:[#allocation7 + $0x38] sm:$0xf0]  ;;  %v4792_v35 = vor.u32 %v6613_v27, %v4789_v28  ;;  %v4920_v36 = vor.u32 %v6645_v29, %v4917_v30  ;;  %v5339_v27 = vld [vmem:[#allocation9 + $0x2a0] sm:$0xf]  ;;  %v6754_v28 = vld [vmem:[#allocation9 + $0x2ac] sm:$0xf0] }
  0xe0   :  { %1190 = vmatmul.bf16.vlgmr.msra.gmra.mxu2 %v7502_v57  ;;  %1203 = vmatmul.bf16.vlgmr.msra.gmra.mxu3 %v7504_v58  ;;  %v5340_v29 = vor.u32 %v6754_v28, %v5339_v27  ;;  %v5213_v27 = vld [vmem:[#allocation9 + $0x1b0] sm:$0xf0] }
  0xe2   :  { %1209 = vmatpush.bf16.msrb.mxu0 %v4600_v42  ;;  %1222 = vmatpush.bf16.msrb.mxu1 %v4728_v44  ;;  %v4901_v42 = vld [vmem:[#allocation7 + $0x338] sm:$0xf0]  ;;  %v4520_v44 = vor.u32 %v6545_v33, %v4517_v34  ;;  %v6714_v33 = vld [vmem:[#allocation9 + $0x16c] sm:$0xf0] }
  0xe3   :  { %1235 = vmatpush.bf16.msrb.mxu2 %v4856_v47  ;;  %1248 = vmatpush.bf16.msrb.mxu3 %v4984_v48  ;;  %v4501_v47 = vld [vmem:[#allocation7 + $0x18] sm:$0xf0]  ;;  %v6573_v48 = vld [vmem:[#allocation7 + $0x10c] sm:$0xf]  ;;  %v4904_v50 = vor.u32 %v6641_v41, %v4901_v42  ;;  %v5019_v41 = vld [vmem:[#allocation9 + $0x20] sm:$0xf]  ;;  %v5164_v42 = vor.u32 %v6710_v39, %v5163_v38 }
  0xe4   :  { %v4632_v1 = vor.u32 %v6573_v48, %v4629_v51  ;;  %7073 = vset.pattern.permute.xlu1 %v7338_v43  ;;  %v5003_v48 = vld [vmem:[#allocation9] sm:$0xf]  ;;  %v5117_v51 = vld [vmem:[#allocation9 + $0xf0] sm:$0xf0] }
  0xe5   :  { %2319 = vperm.xlu1 %7073, %v7521_v17  }
  0xe6   :  { %1210 = vmatpush.bf16.msrb.mxu0 %v4584_v59  ;;  %1223 = vmatpush.bf16.msrb.mxu1 %v4712_v60  ;;  %v4885_v59 = vld [vmem:[#allocation7 + $0x318] sm:$0xf0]  ;;  %v5115_v60 = vld [vmem:[#allocation9 + $0xe0] sm:$0xf] }
  0xe7   :  { %1236 = vmatpush.bf16.msrb.mxu2 %v4840_v63  ;;  %1249 = vmatpush.bf16.msrb.mxu3 %v4968_v0  ;;  %v6730_v63 = vld [vmem:[#allocation9 + $0x1ec] sm:$0xf0]  ;;  %v4504_v0 = vor.u32 %v6541_v46, %v4501_v47  ;;  %v4888_v3 = vor.u32 %v6637_v54, %v4885_v59  ;;  %v5116_v4 = vor.u32 %v6698_v61, %v5115_v60  ;;  %v6692_v54 = vld [vmem:[#allocation9 + $0xc4] sm:$0xf]  ;;  %v5101_v59 = vld [vmem:[#allocation9 + $0xd0] sm:$0xf0] }
  0xe8   :  { %v5244_v6 = vor.u32 %v6730_v63, %v5243_v62  ;;  %v6706_v46 = vld [vmem:[#allocation9 + $0x12c] sm:$0xf0]  ;;  %v5104_v60 = vor.u32 %v6692_v54, %v5101_v59  ;;  %v6688_v61 = vld [vmem:[#allocation9 + $0xa4] sm:$0xf]  ;;  %v5085_v62 = vld [vmem:[#allocation9 + $0xb0] sm:$0xf0] }
  0xe9   :  { %v5088_v63 = vor.u32 %v6688_v61, %v5085_v62  ;;  %v5165_v61 = vld [vmem:[#allocation9 + $0x150] sm:$0xf0]  ;;  %v6756_v62 = vld [vmem:[#allocation9 + $0x2c4] sm:$0xf] }
  0xea   :  { %1211 = vmatpush.bf16.msrb.mxu0 %v4568_v7  ;;  %1224 = vmatpush.bf16.msrb.mxu1 %v4696_v8  ;;  %v6694_v7 = vld [vmem:[#allocation9 + $0xcc] sm:$0xf0]  ;;  %v5227_v8 = vld [vmem:[#allocation9 + $0x1c0] sm:$0xf] }
  0xeb   :  { %1237 = vmatpush.bf16.msrb.mxu2 %v4824_v11  ;;  %1250 = vmatpush.bf16.msrb.mxu3 %v4952_v12  ;;  %v6762_v11 = vld [vmem:[#allocation9 + $0x2ec] sm:$0xf0]  ;;  %v5100_v13 = vor.u32 %v6694_v7, %v5099_v5  ;;  %v5228_v16 = vor.u32 %v6726_v9, %v5227_v8  ;;  %v6728_v8 = vld [vmem:[#allocation9 + $0x1e4] sm:$0xf]  ;;  %v5245_v9 = vld [vmem:[#allocation9 + $0x1f0] sm:$0xf0] }
  0xec   :  { %v5372_v12 = vor.u32 %v6762_v11, %v5371_v10  ;;  %v5248_v10 = vor.u32 %v6728_v8, %v5245_v9  ;;  %v7339_v11 = vmov 4   ;;  %v5149_v8 = vld [vmem:[#allocation9 + $0x130] sm:$0xf0]  ;;  %v6752_v9 = vld [vmem:[#allocation9 + $0x2a4] sm:$0xf] }
  0xed   :  { %7076 = vset.pattern.permute.xlu1 %v7339_v11  ;;  %v5341_v11 = vld [vmem:[#allocation9 + $0x2b0] sm:$0xf0] }
  0xee   :  { %1212 = vmatpush.bf16.msrb.mxu0 %v4552_v19  ;;  %1225 = vmatpush.bf16.msrb.mxu1 %v4680_v20  ;;  %v6722_v19 = vld [vmem:[#allocation9 + $0x1ac] sm:$0xf0]  ;;  %v5355_v20 = vld [vmem:[#allocation9 + $0x2c0] sm:$0xf] }
  0xef   :  { %1238 = vmatpush.bf16.msrb.mxu2 %v4808_v23  ;;  %1251 = vmatpush.bf16.msrb.mxu3 %v4936_v24  ;;  %v5356_v22 = vor.u32 %v6758_v21, %v5355_v20  ;;  %v5084_v23 = vor.u32 %v6690_v15, %v5083_v14  ;;  %v5067_v24 = vld [vmem:[#allocation9 + $0x80] sm:$0xf]  ;;  %v5229_v20 = vld [vmem:[#allocation9 + $0x1d0] sm:$0xf0] }
  0xf0   :  { %2388 = vperm.xlu1 %7076, %v7521_v17  }
  0xf2   :  { %1213 = vmatpush.bf16.msrb.mxu0 %v4536_v31  ;;  %1226 = vmatpush.bf16.msrb.mxu1 %v4664_v32  ;;  %v6682_v31 = vld [vmem:[#allocation9 + $0x6c] sm:$0xf0]  ;;  %v5179_v32 = vld [vmem:[#allocation9 + $0x160] sm:$0xf] }
  0xf3   :  { %1239 = vmatpush.bf16.msrb.mxu2 %v4792_v35  ;;  %1252 = vmatpush.bf16.msrb.mxu3 %v4920_v36  ;;  %v5035_v35 = vld [vmem:[#allocation9 + $0x40] sm:$0xf]  ;;  %v5180_v36 = vor.u32 %v6714_v33, %v5179_v32  ;;  %v7340_v32 = vmov 2  }
  0xf4   :  { %v5036_v40 = vor.u32 %v6678_v37, %v5035_v35  ;;  %7074 = vset.pattern.permute.xlu2 %v7340_v32  ;;  %v5197_v35 = vld [vmem:[#allocation9 + $0x190] sm:$0xf0] }
  0xf5   :  { %2342 = vperm.xlu2 %7074, %v7521_v17   ;;  %v5005_v37 = vld [vmem:[#allocation9 + $0x10] sm:$0xf0] }
  0xf6   :  { %1214 = vmatpush.bf16.msrb.mxu0 %v4520_v44  ;;  %1227 = vmatpush.bf16.msrb.mxu1 %v4648_v45  ;;  %v6674_v44 = vld [vmem:[#allocation9 + $0x2c] sm:$0xf0]  ;;  %v5147_v45 = vld [vmem:[#allocation9 + $0x120] sm:$0xf] }
  0xf7   :  { %1240 = vmatpush.bf16.msrb.mxu2 %v4776_v49  ;;  %1253 = vmatpush.bf16.msrb.mxu3 %v4904_v50  ;;  %v5020_v43 = vor.u32 %v6674_v44, %v5019_v41  ;;  %v5148_v47 = vor.u32 %v6706_v46, %v5147_v45  ;;  %v6670_v49 = vld [vmem:[#allocation9 + $0xc] sm:$0xf0]  ;;  %v6696_v50 = vld [vmem:[#allocation9 + $0xe4] sm:$0xf] }
  0xf8   :  { %v5004_v52 = vor.u32 %v6670_v49, %v5003_v48  ;;  %v5120_v53 = vor.u32 %v6696_v50, %v5117_v51  ;;  %v6734_v41 = vld [vmem:[#allocation9 + $0x20c] sm:$0xf0]  ;;  %v6712_v46 = vld [vmem:[#allocation9 + $0x164] sm:$0xf]  ;;  %v5373_v50 = vld [vmem:[#allocation9 + $0x2f0] sm:$0xf0] }
  0xf9   :  { %v6794_v45 = vld [vmem:[#allocation9 + $0x3ec] sm:$0xf0]  ;;  %v6760_v49 = vld [vmem:[#allocation9 + $0x2e4] sm:$0xf] }
  0xfa   :  { %1215 = vmatpush.bf16.msrb.mxu0 %v4504_v0  ;;  %1228 = vmatpush.bf16.msrb.mxu1 %v4632_v1  ;;  %v5131_v0 = vld [vmem:[#allocation9 + $0x100] sm:$0xf]  ;;  %v6702_v1 = vld [vmem:[#allocation9 + $0x10c] sm:$0xf0]  ;;  %v5376_v51 = vor.u32 %v6760_v49, %v5373_v50 }
  0xfb   :  { %1241 = vmatpush.bf16.msrb.mxu2 %v4760_v2  ;;  %1254 = vmatpush.bf16.msrb.mxu3 %v4888_v3  ;;  %v5323_v2 = vld [vmem:[#allocation9 + $0x280] sm:$0xf]  ;;  %v6684_v3 = vld [vmem:[#allocation9 + $0x84] sm:$0xf]  ;;  %v5132_v5 = vor.u32 %v6702_v1, %v5131_v0  ;;  %v5357_v1 = vld [vmem:[#allocation9 + $0x2d0] sm:$0xf0] }
  0xfd   :  { %1216 = vmatmul.bf16.vlgmr.msrb.gmra.mxu0 %v7498_v55  ;;  %1229 = vmatmul.bf16.vlgmr.msrb.gmra.mxu1 %v7500_v56  ;;  %v5212_v55 = vor.u32 %v6722_v19, %v5211_v18  ;;  %v6718_v56 = vld [vmem:[#allocation9 + $0x18c] sm:$0xf0]  ;;  %v5053_v18 = vld [vmem:[#allocation9 + $0x70] sm:$0xf0]  ;;  %v6724_v19 = vld [vmem:[#allocation9 + $0x1c4] sm:$0xf] }
  0xfe   :  { %2046 = vmatpush.bf16.msra.mxu0 %v5116_v4  ;;  %2059 = vmatpush.bf16.msra.mxu1 %v5244_v6  ;;  %v5196_v30 = vor.u32 %v6718_v56, %v5195_v26  ;;  %v5069_v4 = vld [vmem:[#allocation9 + $0x90] sm:$0xf0]  ;;  %v6750_v6 = vld [vmem:[#allocation9 + $0x28c] sm:$0xf0]  ;;  %v5232_v21 = vor.u32 %v6724_v19, %v5229_v20  ;;  %v6720_v56 = vld [vmem:[#allocation9 + $0x1a4] sm:$0xf] }
  0xff   :  { %1242 = vmatmul.bf16.vlgmr.msrb.gmra.mxu2 %v7502_v57  ;;  %1255 = vmatmul.bf16.vlgmr.msrb.gmra.mxu3 %v7504_v58  ;;  %v5068_v57 = vor.u32 %v6686_v25, %v5067_v24  ;;  %v5051_v58 = vld [vmem:[#allocation9 + $0x60] sm:$0xf]  ;;  %v5324_v7 = vor.u32 %v6750_v6, %v5323_v2  ;;  %v5072_v14 = vor.u32 %v6684_v3, %v5069_v4  ;;  %v6742_v24 = vld [vmem:[#allocation9 + $0x24c] sm:$0xf0]  ;;  %v6676_v25 = vld [vmem:[#allocation9 + $0x44] sm:$0xf] }
 0x100   :  { %2072 = vmatpush.bf16.msra.mxu2 %v5372_v12  ;;  %v5052_v34 = vor.u32 %v6682_v31, %v5051_v58  ;;  %v5307_v12 = vld [vmem:[#allocation9 + $0x260] sm:$0xf]  ;;  %v5216_v28 = vor.u32 %v6720_v56, %v5213_v27  ;;  %v6738_v58 = vld [vmem:[#allocation9 + $0x22c] sm:$0xf0]  ;;  %v5021_v31 = vld [vmem:[#allocation9 + $0x30] sm:$0xf0]  ;;  %v5360_v2 = vor.u32 %v6756_v62, %v5357_v1 }
 0x101   :  { %v7536_v3 = vld [vmem:[%s7827_s5] sm:$0xf]  ;;  %v5467_v4 = vld [vmem:[#allocation9 + $0x3a0] sm:$0xf]  ;;  %v6748_v20 = vld [vmem:[#allocation9 + $0x284] sm:$0xf] }
 0x102   :  { %2047 = vmatpush.bf16.msra.mxu0 %v5100_v13  ;;  %2060 = vmatpush.bf16.msra.mxu1 %v5228_v16  ;;  %v6746_v13 = vld [vmem:[#allocation9 + $0x26c] sm:$0xf0]  ;;  %v6680_v16 = vld [vmem:[#allocation9 + $0x64] sm:$0xf]  ;;  %v5133_v19 = vld [vmem:[#allocation9 + $0x110] sm:$0xf0] }
 0x103   :  { %v5308_v15 = vor.u32 %v6746_v13, %v5307_v12  ;;  %v5344_v12 = vor.u32 %v6752_v9, %v5341_v11  ;;  %v404_v13 = vperm.slane %v7536_v3, 0  ;;  %v5435_v56 = vld [vmem:[#allocation9 + $0x360] sm:$0xf]  ;;  %v6778_v27 = vld [vmem:[#allocation9 + $0x36c] sm:$0xf0] }
 0x104   :  { %2073 = vmatpush.bf16.msra.mxu2 %v5356_v22  ;;  %v5056_v22 = vor.u32 %v6680_v16, %v5053_v18  ;;  %v6700_v18 = vld [vmem:[#allocation9 + $0x104] sm:$0xf] }
 0x105   :  { %v6732_v1 = vld [vmem:[#allocation9 + $0x204] sm:$0xf] }
 0x106   :  { %2048 = vmatpush.bf16.msra.mxu0 %v5084_v23  ;;  %2061 = vmatpush.bf16.msra.mxu1 %v5212_v55  ;;  %v5291_v23 = vld [vmem:[#allocation9 + $0x240] sm:$0xf]  ;;  %v5037_v55 = vld [vmem:[#allocation9 + $0x50] sm:$0xf0] }
 0x107   :  { %v5292_v26 = vor.u32 %v6742_v24, %v5291_v23  ;;  %v5136_v23 = vor.u32 %v6700_v18, %v5133_v19  ;;  %v5325_v24 = vld [vmem:[#allocation9 + $0x290] sm:$0xf0] }
 0x108   :  { %2074 = vmatpush.bf16.msra.mxu2 %v5340_v29  ;;  %v5040_v29 = vor.u32 %v6676_v25, %v5037_v55  ;;  %v5328_v25 = vor.u32 %v6748_v20, %v5325_v24  ;;  %v7342_v55 = vmov 5   ;;  %v5075_v20 = vld [vmem:[#allocation9 + $0x88] sm:$0xf]  ;;  %v6784_v24 = vld [vmem:[#allocation9 + $0x3a4] sm:$0xf] }
 0x109   :  { %7078 = vset.pattern.permute.xlu0 %v7342_v55 }
 0x10a   :  { %2049 = vmatpush.bf16.msra.mxu0 %v5068_v57  ;;  %2062 = vmatpush.bf16.msra.mxu1 %v5196_v30  ;;  %v5275_v57 = vld [vmem:[#allocation9 + $0x220] sm:$0xf]  ;;  %v6672_v30 = vld [vmem:[#allocation9 + $0x24] sm:$0xf] }
 0x10b   :  { %v5276_v33 = vor.u32 %v6738_v58, %v5275_v57  ;;  %v5024_v39 = vor.u32 %v6672_v30, %v5021_v31  ;;  %v5309_v57 = vld [vmem:[#allocation9 + $0x270] sm:$0xf0]  ;;  %v5419_v30 = vld [vmem:[#allocation9 + $0x340] sm:$0xf]  ;;  %v6774_v31 = vld [vmem:[#allocation9 + $0x34c] sm:$0xf0] }
 0x10c   :  { %2075 = vmatpush.bf16.msra.mxu2 %v5324_v7  ;;  %v6704_v7 = vld [vmem:[#allocation9 + $0x124] sm:$0xf] }
 0x10e   :  { %2050 = vmatpush.bf16.msra.mxu0 %v5052_v34  ;;  %2063 = vmatpush.bf16.msra.mxu1 %v5180_v36  ;;  %v6716_v34 = vld [vmem:[#allocation9 + $0x184] sm:$0xf] }
 0x10f   :  { %v6668_v36 = vld [vmem:[#allocation9 + $0x4] sm:$0xf]  ;;  %v5200_v38 = vor.u32 %v6716_v34, %v5197_v35  ;;  %v5420_v35 = vor.u32 %v6774_v31, %v5419_v30  ;;  %v5251_v30 = vld [vmem:[#allocation9 + $0x1e8] sm:$0xf]  ;;  %v6731_v31 = vld [vmem:[#allocation9 + $0x1f4] sm:$0xf0] }
 0x110   :  { %2076 = vmatpush.bf16.msra.mxu2 %v5308_v15  ;;  %v5008_v54 = vor.u32 %v6668_v36, %v5005_v37  ;;  %v6782_v15 = vld [vmem:[#allocation9 + $0x38c] sm:$0xf0]  ;;  %v6740_v36 = vld [vmem:[#allocation9 + $0x244] sm:$0xf]  ;;  %v5293_v37 = vld [vmem:[#allocation9 + $0x250] sm:$0xf0] }
 0x112   :  { %2051 = vmatpush.bf16.msra.mxu0 %v5036_v40  ;;  %2064 = vmatpush.bf16.msra.mxu1 %v5164_v42  ;;  %v5259_v40 = vld [vmem:[#allocation9 + $0x200] sm:$0xf] }
 0x113   :  { %v5499_v42 = vld [vmem:[#allocation9 + $0x3e0] sm:$0xf]  ;;  %v5260_v44 = vor.u32 %v6734_v41, %v5259_v40  ;;  %v5296_v40 = vor.u32 %v6740_v36, %v5293_v37  ;;  %v5123_v41 = vld [vmem:[#allocation9 + $0xe8] sm:$0xf]  ;;  %v5252_v36 = vor.u32 %v6731_v31, %v5251_v30 }
 0x114   :  { %2077 = vmatpush.bf16.msra.mxu2 %v5292_v26  ;;  %v5043_v37 = vld [vmem:[#allocation9 + $0x48] sm:$0xf] }
 0x115   :  { %v5171_v31 = vld [vmem:[#allocation9 + $0x148] sm:$0xf] }
 0x116   :  { %2052 = vmatpush.bf16.msra.mxu0 %v5020_v43  ;;  %2065 = vmatpush.bf16.msra.mxu1 %v5148_v47  ;;  %v5181_v43 = vld [vmem:[#allocation9 + $0x170] sm:$0xf0]  ;;  %v5500_v47 = vor.u32 %v6794_v45, %v5499_v42  ;;  %v5403_v45 = vld [vmem:[#allocation9 + $0x320] sm:$0xf] }
 0x117   :  { %v5184_v48 = vor.u32 %v6712_v46, %v5181_v43  ;;  %v6770_v46 = vld [vmem:[#allocation9 + $0x32c] sm:$0xf0] }
 0x118   :  { %2078 = vmatpush.bf16.msra.mxu2 %v5276_v33  ;;  %2085 = vmatpush.bf16.msra.mxu3 %v5500_v47  ;;  %v5404_v43 = vor.u32 %v6770_v46, %v5403_v45  ;;  %v6736_v47 = vld [vmem:[#allocation9 + $0x224] sm:$0xf]  ;;  %v5437_v46 = vld [vmem:[#allocation9 + $0x370] sm:$0xf0] }
 0x119   :  { %v6776_v45 = vld [vmem:[#allocation9 + $0x364] sm:$0xf] }
 0x11a   :  { %2053 = vmatpush.bf16.msra.mxu0 %v5004_v52  ;;  %2066 = vmatpush.bf16.msra.mxu1 %v5132_v5  ;;  %v5483_v52 = vld [vmem:[#allocation9 + $0x3c0] sm:$0xf]  ;;  %v6786_v5 = vld [vmem:[#allocation9 + $0x3ac] sm:$0xf0] }
 0x11b   :  { %v5468_v6 = vor.u32 %v6786_v5, %v5467_v4  ;;  %v6792_v4 = vld [vmem:[#allocation9 + $0x3e4] sm:$0xf] }
 0x11c   :  { %2079 = vmatpush.bf16.msra.mxu2 %v5260_v44  ;;  %v6699_v44 = vld [vmem:[#allocation9 + $0xf4] sm:$0xf0] }
 0x11e   :  { %2098 = vmatpush.bf16.msrb.mxu0 %v5120_v53  ;;  %2111 = vmatpush.bf16.msrb.mxu1 %v5248_v10  ;;  %v6790_v53 = vld [vmem:[#allocation9 + $0x3cc] sm:$0xf0]  ;;  %v5152_v10 = vor.u32 %v6704_v7, %v5149_v8  ;;  %v5501_v8 = vld [vmem:[#allocation9 + $0x3f0] sm:$0xf0] }
 0x11f   :  { %v5484_v59 = vor.u32 %v6790_v53, %v5483_v52  ;;  %v405_v52 = vperm.slane %v7536_v3, 1  ;;  %v5107_v53 = vld [vmem:[#allocation9 + $0xc8] sm:$0xf] }
 0x120   :  { %2124 = vmatpush.bf16.msrb.mxu2 %v5376_v51  ;;  %v5124_v51 = vor.u32 %v6699_v44, %v5123_v41 }
 0x121   :  { %2086 = vmatpush.bf16.msra.mxu3 %v5484_v59  ;;  %v6695_v59 = vld [vmem:[#allocation9 + $0xd4] sm:$0xf0] }
 0x122   :  { %2099 = vmatpush.bf16.msrb.mxu0 %v5104_v60  ;;  %2112 = vmatpush.bf16.msrb.mxu1 %v5232_v21  ;;  %v6708_v60 = vld [vmem:[#allocation9 + $0x144] sm:$0xf]  ;;  %v5108_v9 = vor.u32 %v6695_v59, %v5107_v53  ;;  %v5219_v53 = vld [vmem:[#allocation9 + $0x1a8] sm:$0xf]  ;;  %v6723_v59 = vld [vmem:[#allocation9 + $0x1b4] sm:$0xf0] }
 0x123   :  { %v5168_v0 = vor.u32 %v6708_v60, %v5165_v61  ;;  %v5387_v60 = vld [vmem:[#allocation9 + $0x300] sm:$0xf]  ;;  %v6766_v61 = vld [vmem:[#allocation9 + $0x30c] sm:$0xf0] }
 0x124   :  { %2125 = vmatpush.bf16.msrb.mxu2 %v5360_v2  ;;  %v5261_v2 = vld [vmem:[#allocation9 + $0x210] sm:$0xf0] }
 0x125   :  { %2087 = vmatpush.bf16.msra.mxu3 %v5468_v6  ;;  %v5264_v7 = vor.u32 %v6732_v1, %v5261_v2  ;;  %v5220_v1 = vor.u32 %v6723_v59, %v5219_v53  ;;  %v5011_v2 = vld [vmem:[#allocation9 + $0x8] sm:$0xf]  ;;  %v6703_v59 = vld [vmem:[#allocation9 + $0x114] sm:$0xf0] }
 0x126   :  { %2100 = vmatpush.bf16.msrb.mxu0 %v5088_v63  ;;  %2113 = vmatpush.bf16.msrb.mxu1 %v5216_v28  ;;  %v7341_v63 = vmov 3   ;;  %v5436_v28 = vor.u32 %v6778_v27, %v5435_v56  ;;  %v5139_v53 = vld [vmem:[#allocation9 + $0x108] sm:$0xf] }
 0x127   :  { %7075 = vset.pattern.permute.xlu2 %v7341_v63 }
 0x128   :  { %2365 = vperm.xlu2 %7075, %v7521_v17   ;;  %2126 = vmatpush.bf16.msrb.mxu2 %v5344_v12  ;;  %v5091_v12 = vld [vmem:[#allocation9 + $0xa8] sm:$0xf] }
 0x12a   :  { %2101 = vmatpush.bf16.msrb.mxu0 %v5072_v14  ;;  %2114 = vmatpush.bf16.msrb.mxu1 %v5200_v38  ;;  %v5451_v14 = vld [vmem:[#allocation9 + $0x380] sm:$0xf] }
 0x12b   :  { %v5452_v16 = vor.u32 %v6782_v15, %v5451_v14  ;;  %v6788_v14 = vld [vmem:[#allocation9 + $0x3c4] sm:$0xf]  ;;  %v5485_v15 = vld [vmem:[#allocation9 + $0x3d0] sm:$0xf0] }
 0x12c   :  { %2127 = vmatpush.bf16.msrb.mxu2 %v5328_v25  ;;  %v5469_v25 = vld [vmem:[#allocation9 + $0x3b0] sm:$0xf0] }
 0x12d   :  { %2088 = vmatpush.bf16.msra.mxu3 %v5452_v16  ;;  %v5488_v16 = vor.u32 %v6788_v14, %v5485_v15  ;;  %v5472_v27 = vor.u32 %v6784_v24, %v5469_v25  ;;  %v5379_v25 = vld [vmem:[#allocation9 + $0x2e8] sm:$0xf] }
 0x12e   :  { %2102 = vmatpush.bf16.msrb.mxu0 %v5056_v22  ;;  %2115 = vmatpush.bf16.msrb.mxu1 %v5184_v48  ;;  %v5277_v48 = vld [vmem:[#allocation9 + $0x230] sm:$0xf0] }
 0x12f   :  { %v5280_v50 = vor.u32 %v6736_v47, %v5277_v48 }
 0x130   :  { %7077 = vset.pattern.permute.xlu2 %v7342_v55 }
 0x131   :  { %2411 = vperm.xlu2 %7077, %v7521_v17   ;;  %2089 = vmatpush.bf16.msra.mxu3 %v5436_v28 }
 0x132   :  { %2103 = vmatpush.bf16.msrb.mxu0 %v5040_v29  ;;  %2116 = vmatpush.bf16.msrb.mxu1 %v5168_v0  ;;  %v6744_v29 = vld [vmem:[#allocation9 + $0x264] sm:$0xf]  ;;  %v5388_v0 = vor.u32 %v6766_v61, %v5387_v60  ;;  %v5440_v60 = vor.u32 %v6776_v45, %v5437_v46  ;;  %v5155_v45 = vld [vmem:[#allocation9 + $0x128] sm:$0xf]  ;;  %v6707_v46 = vld [vmem:[#allocation9 + $0x134] sm:$0xf0] }
 0x133   :  { %v5312_v58 = vor.u32 %v6744_v29, %v5309_v57  ;;  %v5059_v29 = vld [vmem:[#allocation9 + $0x68] sm:$0xf]  ;;  %v6772_v61 = vld [vmem:[#allocation9 + $0x344] sm:$0xf] }
 0x135   :  { %2128 = vmatpush.bf16.msrb.mxu2 %v5312_v58  ;;  %2090 = vmatpush.bf16.msra.mxu3 %v5420_v35  ;;  %v6683_v58 = vld [vmem:[#allocation9 + $0x74] sm:$0xf0] }
 0x136   :  { %2104 = vmatpush.bf16.msrb.mxu0 %v5024_v39  ;;  %2117 = vmatpush.bf16.msrb.mxu1 %v5152_v10  ;;  %v5504_v10 = vor.u32 %v6792_v4, %v5501_v8  ;;  %v5060_v35 = vor.u32 %v6683_v58, %v5059_v29  ;;  %v6671_v4 = vld [vmem:[#allocation9 + $0x14] sm:$0xf0]  ;;  %v5389_v29 = vld [vmem:[#allocation9 + $0x310] sm:$0xf0] }
 0x137   :  { %v5012_v15 = vor.u32 %v6671_v4, %v5011_v2  ;;  %v6751_v2 = vld [vmem:[#allocation9 + $0x294] sm:$0xf0]  ;;  %v5140_v4 = vor.u32 %v6703_v59, %v5139_v53  ;;  %v5381_v53 = vld [vmem:[#allocation9 + $0x2f8] sm:$0xf0]  ;;  %v5611_v59 = vld [vmem:[#allocation15 + $0xc0] sm:$0xf] }
 0x139   :  { %v1061_v21 = vpop.f32.mrf.mxu0  ;;  %v1074_v22 = vpop.f32.mrf.mxu1  ;;  %2129 = vmatpush.bf16.msrb.mxu2 %v5296_v40  ;;  %2091 = vmatpush.bf16.msra.mxu3 %v5404_v43  ;;  %v6727_v40 = vld [vmem:[#allocation9 + $0x1d4] sm:$0xf0]  ;;  %v406_v43 = vperm.slane %v7536_v3, 2 }
 0x13a   :  { %2105 = vmatpush.bf16.msrb.mxu0 %v5008_v54  ;;  %v1062_v26 = vadd.f32 %v1061_v21, %v404_v13  ;;  %2118 = vmatpush.bf16.msrb.mxu1 %v5136_v23  ;;  %v6691_v13 = vld [vmem:[#allocation9 + $0xb4] sm:$0xf0] }
 0x13b   :  { %v5092_v18 = vor.u32 %v6691_v13, %v5091_v12  ;;  %v6687_v21 = vld [vmem:[#allocation9 + $0x94] sm:$0xf0] }
 0x13c   :  { %v1075_v32 = vadd.f32 %v1074_v22, %v1062_v26  ;;  %v5076_v28 = vor.u32 %v6687_v21, %v5075_v20 }
 0x13d   :  { %2130 = vmatpush.bf16.msrb.mxu2 %v5280_v50  ;;  %2092 = vmatpush.bf16.msra.mxu3 %v5388_v0 }
 0x140   :  { %v1087_v33 = vpop.f32.mrf.mxu2  ;;  %v1100_v34 = vpop.f32.mrf.mxu3 }
 0x141   :  { %v1088_v38 = vadd.f32 %v1087_v33, %v1075_v32  ;;  %v1063_v17 = vpop.f32.mrf.mxu0  ;;  %v1076_v39 = vpop.f32.mrf.mxu1  ;;  %2131 = vmatpush.bf16.msrb.mxu2 %v5264_v7  ;;  %2137 = vmatpush.bf16.msrb.mxu3 %v5504_v10  ;;  %v6780_v32 = vld [vmem:[#allocation9 + $0x384] sm:$0xf]  ;;  %v5453_v33 = vld [vmem:[#allocation9 + $0x390] sm:$0xf0]  ;;  %v6697_v7 = vld [vmem:[#allocation9 + $0xec] sm:$0xf] }
 0x142   :  { %v6679_v17 = vld [vmem:[#allocation9 + $0x54] sm:$0xf0]  ;;  %v5235_v39 = vld [vmem:[#allocation9 + $0x1c8] sm:$0xf]  ;;  %v5456_v41 = vor.u32 %v6780_v32, %v5453_v33  ;;  %v6768_v10 = vld [vmem:[#allocation9 + $0x324] sm:$0xf] }
 0x143   :  { %v1101_v42 = vadd.f32 %v1100_v34, %v1088_v38  ;;  %v5044_v47 = vor.u32 %v6679_v17, %v5043_v37  ;;  %v5236_v48 = vor.u32 %v6727_v40, %v5235_v39  ;;  %v6711_v32 = vld [vmem:[#allocation9 + $0x154] sm:$0xf0]  ;;  %v5363_v17 = vld [vmem:[#allocation9 + $0x2c8] sm:$0xf] }
 0x144   :  { %v6759_v39 = vld [vmem:[#allocation9 + $0x2d4] sm:$0xf0] }
 0x145   :  { %v1260_v49 = vmax.f32 %v1101_v42, 0.0  ;;  %2138 = vmatpush.bf16.msrb.mxu3 %v5488_v16 }
 0x147   :  { %v7541_v54 = vpack.c.bf16 %v1260_v49, %v1260_v49  ;;  %v5027_v49 = vld [vmem:[#allocation9 + $0x28] sm:$0xf] }
 0x148   :  { %v1089_v62 = vpop.f32.mrf.mxu2  ;;  %v1102_v63 = vpop.f32.mrf.mxu3 }
 0x149   :  { %2054 = vmatmul.bf16.vlgmr.msra.gmra.mxu0 %v7541_v54  ;;  %v1113_v5 = vpop.f32.mrf.mxu0  ;;  %v1126_v6 = vpop.f32.mrf.mxu1  ;;  %2139 = vmatpush.bf16.msrb.mxu3 %v5472_v27  ;;  %v5421_v62 = vld [vmem:[#allocation9 + $0x350] sm:$0xf0]  ;;  %v6763_v27 = vld [vmem:[#allocation9 + $0x2f4] sm:$0xf0] }
 0x14a   :  { %2150 = vmatpush.bf16.msra.mxu0 %v5124_v51  ;;  %v1114_v11 = vadd.f32 %v1113_v5, %v405_v52  ;;  %v6675_v52 = vld [vmem:[#allocation9 + $0x34] sm:$0xf0]  ;;  %v5203_v5 = vld [vmem:[#allocation9 + $0x188] sm:$0xf]  ;;  %v5424_v8 = vor.u32 %v6772_v61, %v5421_v62  ;;  %v5380_v33 = vor.u32 %v6763_v27, %v5379_v25  ;;  %v5061_v62 = vld [vmem:[#allocation9 + $0x78] sm:$0xf0] }
 0x14b   :  { %v5028_v0 = vor.u32 %v6675_v52, %v5027_v49  ;;  %v5347_v49 = vld [vmem:[#allocation9 + $0x2a8] sm:$0xf]  ;;  %v6721_v25 = vld [vmem:[#allocation9 + $0x1ac] sm:$0xf] }
 0x14c   :  { %v1127_v19 = vadd.f32 %v1126_v6, %v1114_v11  ;;  %v6719_v6 = vld [vmem:[#allocation9 + $0x194] sm:$0xf0]  ;;  %v5405_v11 = vld [vmem:[#allocation9 + $0x330] sm:$0xf0] }
 0x14d   :  { %2140 = vmatpush.bf16.msrb.mxu3 %v5456_v41  ;;  %v5204_v16 = vor.u32 %v6719_v6, %v5203_v5  ;;  %v5408_v24 = vor.u32 %v6768_v10, %v5405_v11  ;;  %v5045_v10 = vld [vmem:[#allocation9 + $0x58] sm:$0xf0]  ;;  %v6747_v11 = vld [vmem:[#allocation9 + $0x274] sm:$0xf0] }
 0x14e   :  { %2151 = vmatpush.bf16.msra.mxu0 %v5108_v9  ;;  %v5125_v9 = vld [vmem:[#allocation9 + $0xf8] sm:$0xf0] }
 0x14f   :  { %v5128_v21 = vor.u32 %v6697_v7, %v5125_v9  ;;  %v6677_v9 = vld [vmem:[#allocation9 + $0x4c] sm:$0xf] }
 0x150   :  { %v1139_v22 = vpop.f32.mrf.mxu2  ;;  %v1152_v23 = vpop.f32.mrf.mxu3 }
 0x151   :  { %v1140_v55 = vadd.f32 %v1139_v22, %v1127_v19  ;;  %v1115_v26 = vpop.f32.mrf.mxu0  ;;  %v1128_v56 = vpop.f32.mrf.mxu1  ;;  %2141 = vmatpush.bf16.msrb.mxu3 %v5440_v60  ;;  %v5187_v22 = vld [vmem:[#allocation9 + $0x168] sm:$0xf]  ;;  %v6681_v60 = vld [vmem:[#allocation9 + $0x6c] sm:$0xf] }
 0x152   :  { %2152 = vmatpush.bf16.msra.mxu0 %v5092_v18  ;;  %v5109_v26 = vld [vmem:[#allocation9 + $0xd8] sm:$0xf0]  ;;  %v5064_v5 = vor.u32 %v6681_v60, %v5061_v62  ;;  %v6822_v60 = vld [vmem:[#allocation15 + $0xcc] sm:$0xf0] }
 0x153   :  { %v1153_v57 = vadd.f32 %v1152_v23, %v1140_v55  ;;  %v6715_v23 = vld [vmem:[#allocation9 + $0x174] sm:$0xf0]  ;;  %v6693_v55 = vld [vmem:[#allocation9 + $0xcc] sm:$0xf] }
 0x154   :  { %v5112_v30 = vor.u32 %v6693_v55, %v5109_v26  ;;  %v5221_v55 = vld [vmem:[#allocation9 + $0x1b8] sm:$0xf0] }
 0x155   :  { %v1261_v34 = vmax.f32 %v1153_v57, 0.0  ;;  %2142 = vmatpush.bf16.msrb.mxu3 %v5424_v8  ;;  %v5188_v57 = vor.u32 %v6715_v23, %v5187_v22  ;;  %v5315_v8 = vld [vmem:[#allocation9 + $0x268] sm:$0xf]  ;;  %v6673_v22 = vld [vmem:[#allocation9 + $0x2c] sm:$0xf]  ;;  %v5224_v27 = vor.u32 %v6721_v25, %v5221_v55  ;;  %v7571_v55 = vpop.permute.xlu2 %2342 }
 0x156   :  { %2153 = vmatpush.bf16.msra.mxu0 %v5076_v28  ;;  %v6764_v28 = vld [vmem:[#allocation9 + $0x304] sm:$0xf]  ;;  %v5029_v23 = vld [vmem:[#allocation9 + $0x38] sm:$0xf0] }
 0x157   :  { %v7544_v38 = vpack.c.bf16 %v1261_v34, %v1261_v34  ;;  %v6689_v34 = vld [vmem:[#allocation9 + $0xac] sm:$0xf]  ;;  %v5349_v25 = vld [vmem:[#allocation9 + $0x2b8] sm:$0xf0] }
 0x158   :  { %v1141_v42 = vpop.f32.mrf.mxu2  ;;  %v1154_v44 = vpop.f32.mrf.mxu3 }
 0x159   :  { %2067 = vmatmul.bf16.vlgmr.msra.gmra.mxu1 %v7544_v38  ;;  %2106 = vmatmul.bf16.vlgmr.msrb.gmra.mxu0 %v7541_v54  ;;  %v5172_v42 = vor.u32 %v6711_v32, %v5171_v31  ;;  %v5205_v31 = vld [vmem:[#allocation9 + $0x198] sm:$0xf0] }
 0x15a   :  { %2154 = vmatpush.bf16.msra.mxu0 %v5060_v35  ;;  %2163 = vmatpush.bf16.msra.mxu1 %v5252_v36  ;;  %v1165_v50 = vpop.f32.mrf.mxu0  ;;  %v1178_v51 = vpop.f32.mrf.mxu1  ;;  %v5093_v35 = vld [vmem:[#allocation9 + $0xb8] sm:$0xf0]  ;;  %v5392_v36 = vor.u32 %v6764_v28, %v5389_v29  ;;  %v5283_v28 = vld [vmem:[#allocation9 + $0x228] sm:$0xf]  ;;  %v6669_v29 = vld [vmem:[#allocation9 + $0xc] sm:$0xf] }
 0x15b   :  { %v1166_v63 = vadd.f32 %v1165_v50, %v406_v43  ;;  %2143 = vmatpush.bf16.msrb.mxu3 %v5408_v24  ;;  %v5096_v44 = vor.u32 %v6689_v34, %v5093_v35  ;;  %v5364_v43 = vor.u32 %v6759_v39, %v5363_v17  ;;  %v6755_v50 = vld [vmem:[#allocation9 + $0x2b4] sm:$0xf0] }
 0x15c   :  { %v5348_v61 = vor.u32 %v6755_v50, %v5347_v49  ;;  %v6743_v24 = vld [vmem:[#allocation9 + $0x254] sm:$0xf0]  ;;  %v6713_v50 = vld [vmem:[#allocation9 + $0x16c] sm:$0xf] }
 0x15d   :  { %v1179_v12 = vadd.f32 %v1178_v51, %v1166_v63  ;;  %v5156_v51 = vor.u32 %v6707_v46, %v5155_v45  ;;  %v6729_v63 = vld [vmem:[#allocation9 + $0x1ec] sm:$0xf]  ;;  %v6826_v34 = vld [vmem:[#allocation15 + $0xec] sm:$0xf0]  ;;  %v5267_v45 = vld [vmem:[#allocation9 + $0x208] sm:$0xf] }
 0x15e   :  { %2155 = vmatpush.bf16.msra.mxu0 %v5044_v47  ;;  %2164 = vmatpush.bf16.msra.mxu1 %v5236_v48  ;;  %v6685_v47 = vld [vmem:[#allocation9 + $0x8c] sm:$0xf]  ;;  %v5077_v48 = vld [vmem:[#allocation9 + $0x98] sm:$0xf0] }
 0x15f   :  { %2144 = vmatpush.bf16.msrb.mxu3 %v5392_v36  ;;  %v5080_v52 = vor.u32 %v6685_v47, %v5077_v48  ;;  %v5507_v47 = vld [vmem:[#allocation9 + $0x3e8] sm:$0xf]  ;;  %v6795_v48 = vld [vmem:[#allocation9 + $0x3f4] sm:$0xf0] }
 0x162   :  { %2156 = vmatpush.bf16.msra.mxu0 %v5028_v0  ;;  %2165 = vmatpush.bf16.msra.mxu1 %v5220_v1  ;;  %v1167_v19 = vpop.f32.mrf.mxu0  ;;  %v1180_v20 = vpop.f32.mrf.mxu1  ;;  %v5253_v0 = vld [vmem:[#allocation9 + $0x1f8] sm:$0xf0]  ;;  %v5331_v1 = vld [vmem:[#allocation9 + $0x288] sm:$0xf] }
 0x163   :  { %v1191_v13 = vpop.f32.mrf.mxu2  ;;  %v1204_v14 = vpop.f32.mrf.mxu3  ;;  %v5256_v6 = vor.u32 %v6729_v63, %v5253_v0  ;;  %v5332_v7 = vor.u32 %v6751_v2, %v5331_v1  ;;  %v5316_v19 = vor.u32 %v6747_v11, %v5315_v8  ;;  %v5491_v63 = vld [vmem:[#allocation9 + $0x3c8] sm:$0xf]  ;;  %v6791_v0 = vld [vmem:[#allocation9 + $0x3d4] sm:$0xf0]  ;;  %v6709_v1 = vld [vmem:[#allocation9 + $0x14c] sm:$0xf]  ;;  %v5612_v11 = vor.u32 %v6822_v60, %v5611_v59 }
 0x164   :  { %v1192_v18 = vadd.f32 %v1191_v13, %v1179_v12  ;;  %v6725_v12 = vld [vmem:[#allocation9 + $0x1cc] sm:$0xf]  ;;  %v5237_v13 = vld [vmem:[#allocation9 + $0x1d8] sm:$0xf0]  ;;  %v7559_v8 = vpop.permute.xlu1 %2287  ;;  %v5755_v59 = vld [vmem:[#allocation15 + $0x1e0] sm:$0xf] }
 0x165   :  { %v5240_v20 = vor.u32 %v6725_v12, %v5237_v13  ;;  %v5173_v2 = vld [vmem:[#allocation9 + $0x158] sm:$0xf0]  ;;  %v5595_v13 = vld [vmem:[#allocation15 + $0xa0] sm:$0xf]  ;;  %v6858_v60 = vld [vmem:[#allocation15 + $0x1ec] sm:$0xf0] }
 0x166   :  { %v1205_v56 = vadd.f32 %v1204_v14, %v1192_v18  ;;  %2157 = vmatpush.bf16.msra.mxu0 %v5012_v15  ;;  %2166 = vmatpush.bf16.msra.mxu1 %v5204_v16  ;;  %v407_v14 = vperm.slane %v7536_v3, 3  ;;  %v5048_v15 = vor.u32 %v6677_v9, %v5045_v10  ;;  %v5032_v3 = vor.u32 %v6673_v22, %v5029_v23  ;;  %v5365_v12 = vld [vmem:[#allocation9 + $0x2d8] sm:$0xf0]  ;;  %v6787_v22 = vld [vmem:[#allocation9 + $0x3b4] sm:$0xf0] }
 0x167   :  { %v6705_v23 = vld [vmem:[#allocation9 + $0x12c] sm:$0xf] }
 0x168   :  { %v1262_v58 = vmax.f32 %v1205_v56, 0.0 }
 0x169   :  { %2119 = vmatmul.bf16.vlgmr.msrb.gmra.mxu1 %v7544_v38  ;;  %2158 = vmatmul.bf16.vlgmr.msra.gmra.mxu0 %v7541_v54 }
 0x16a   :  { %2202 = vmatpush.bf16.msrb.mxu0 %v5128_v21  ;;  %v7549_v37 = vpack.c.bf16 %v1262_v58, %v1262_v58  ;;  %2167 = vmatpush.bf16.msra.mxu1 %v5188_v57  ;;  %v5299_v21 = vld [vmem:[#allocation9 + $0x248] sm:$0xf]  ;;  %v5013_v57 = vld [vmem:[#allocation9 + $0x18] sm:$0xf0]  ;;  %v6739_v58 = vld [vmem:[#allocation9 + $0x234] sm:$0xf0] }
 0x16b   :  { %v1193_v40 = vpop.f32.mrf.mxu2  ;;  %v1206_v41 = vpop.f32.mrf.mxu3  ;;  %v5300_v56 = vor.u32 %v6743_v24, %v5299_v21  ;;  %v5016_v17 = vor.u32 %v6669_v29, %v5013_v57  ;;  %v5475_v21 = vld [vmem:[#allocation9 + $0x3a8] sm:$0xf]  ;;  %v7569_v24 = vld [vmem:[#allocation9 + $0x2ac] sm:$0xf]  ;;  %v6814_v57 = vld [vmem:[#allocation15 + $0x8c] sm:$0xf0] }
 0x16c   :  { %2080 = vmatmul.bf16.vlgmr.msra.gmra.mxu2 %v7549_v37 }
 0x16d   :  { %2176 = vmatpush.bf16.msra.mxu2 %v5380_v33  ;;  %v5627_v33 = vld [vmem:[#allocation15 + $0xe0] sm:$0xf] }
 0x16e   :  { %2203 = vmatpush.bf16.msrb.mxu0 %v5112_v30  ;;  %2168 = vmatpush.bf16.msra.mxu1 %v5172_v42  ;;  %v6717_v30 = vld [vmem:[#allocation9 + $0x18c] sm:$0xf]  ;;  %v5284_v42 = vor.u32 %v6739_v58, %v5283_v28  ;;  %v5628_v46 = vor.u32 %v6826_v34, %v5627_v33  ;;  %v7575_v58 = vld [vmem:[#allocation9 + $0x388] sm:$0xf] }
 0x16f   :  { %v7582_v33 = vld [vmem:[#allocation9 + $0x10c] sm:$0xf] }
 0x171   :  { %2177 = vmatpush.bf16.msra.mxu2 %v5364_v43  ;;  %v6735_v43 = vld [vmem:[#allocation9 + $0x214] sm:$0xf0] }
 0x172   :  { %2204 = vmatpush.bf16.msrb.mxu0 %v5096_v44  ;;  %2169 = vmatpush.bf16.msra.mxu1 %v5156_v51  ;;  %v5208_v44 = vor.u32 %v6717_v30, %v5205_v31  ;;  %v5189_v51 = vld [vmem:[#allocation9 + $0x178] sm:$0xf0]  ;;  %v5268_v62 = vor.u32 %v6735_v43, %v5267_v45  ;;  %v7593_v43 = vpop.permute.xlu1 %2319 }
 0x175   :  { %2178 = vmatpush.bf16.msra.mxu2 %v5348_v61 }
 0x176   :  { %2205 = vmatpush.bf16.msrb.mxu0 %v5080_v52  ;;  %2170 = vmatpush.bf16.msra.mxu1 %v5140_v4  ;;  %v6761_v52 = vld [vmem:[#allocation9 + $0x2ec] sm:$0xf]  ;;  %v5508_v4 = vor.u32 %v6795_v48, %v5507_v47  ;;  %v5563_v48 = vld [vmem:[#allocation15 + $0x60] sm:$0xf] }
 0x177   :  { %v5384_v10 = vor.u32 %v6761_v52, %v5381_v53 }
 0x179   :  { %2179 = vmatpush.bf16.msra.mxu2 %v5332_v7  ;;  %2171 = vmatmul.bf16.vlgmr.msra.gmra.mxu1 %v7544_v38  ;;  %v7557_v7 = vld [vmem:[#allocation12] ss:$8 sm:$0xf] }
 0x17a   :  { %2206 = vmatpush.bf16.msrb.mxu0 %v5064_v5  ;;  %2215 = vmatpush.bf16.msrb.mxu1 %v5256_v6  ;;  %v1217_v16 = vpop.f32.mrf.mxu0  ;;  %v1230_v18 = vpop.f32.mrf.mxu1  ;;  %v5192_v5 = vor.u32 %v6713_v50, %v5189_v51  ;;  %v6757_v6 = vld [vmem:[#allocation9 + $0x2cc] sm:$0xf]  ;;  %v2292_v50 = vperm.slane %v7557_v7, 1 }
 0x17b   :  { %v1218_v26 = vadd.f32 %v1217_v16, %v407_v14  ;;  %v2291_v14 = vperm.slane %v7557_v7, 0  ;;  %v5368_v28 = vor.u32 %v6757_v6, %v5365_v12  ;;  %v5317_v12 = vld [vmem:[#allocation9 + $0x278] sm:$0xf0] }
 0x17c   :  { %2132 = vmatmul.bf16.vlgmr.msrb.gmra.mxu2 %v7549_v37 }
 0x17d   :  { %2180 = vmatpush.bf16.msra.mxu2 %v5316_v19  ;;  %v1231_v32 = vadd.f32 %v1230_v18, %v1218_v26  ;;  %v6818_v18 = vld [vmem:[#allocation15 + $0xac] sm:$0xf0]  ;;  %v7565_v19 = vld [vmem:[#allocation13] sm:$0xf]  ;;  %v5492_v26 = vor.u32 %v6791_v0, %v5491_v63  ;;  %v2299_v31 = vmul.f32 %v2291_v14, %v7559_v8 }
 0x17e   :  { %2207 = vmatpush.bf16.msrb.mxu0 %v5048_v15  ;;  %2216 = vmatpush.bf16.msrb.mxu1 %v5240_v20  ;;  %v2294_v20 = vperm.slane %v7557_v7, 3  ;;  %v5596_v29 = vor.u32 %v6818_v18, %v5595_v13  ;;  %v2304_v30 = vperm.slane %v7565_v19, 0  ;;  %v2307_v34 = vperm.slane %v7565_v19, 3  ;;  %v5547_v18 = vld [vmem:[#allocation15 + $0x40] sm:$0xf] }
 0x17f   :  { %v2305_v13 = vperm.slane %v7565_v19, 1 }
 0x180   :  { %v2312_v51 = vadd.f32 %v2304_v30, %v2299_v31 }
 0x181   :  { %2181 = vmatpush.bf16.msra.mxu2 %v5300_v56  ;;  %v5579_v56 = vld [vmem:[#allocation15 + $0x80] sm:$0xf] }
 0x182   :  { %v1243_v35 = vpop.f32.mrf.mxu2  ;;  %v1256_v36 = vpop.f32.mrf.mxu3  ;;  %2208 = vmatpush.bf16.msrb.mxu0 %v5032_v3  ;;  %2217 = vmatpush.bf16.msrb.mxu1 %v5224_v27  ;;  %v5176_v3 = vor.u32 %v6709_v1, %v5173_v2  ;;  %v7573_v27 = vld [vmem:[#allocation12 + $0x2] ss:$8 sm:$0xf]  ;;  %v5580_v47 = vor.u32 %v6814_v57, %v5579_v56  ;;  %v5443_v1 = vld [vmem:[#allocation9 + $0x368] sm:$0xf] }
 0x183   :  { %v1244_v39 = vadd.f32 %v1243_v35, %v1231_v32  ;;  %v1219_v40 = vpop.f32.mrf.mxu0  ;;  %v1232_v41 = vpop.f32.mrf.mxu1  ;;  %v7580_v32 = vld [vmem:[#allocation9 + $0x394] sm:$0xf0]  ;;  %v2302_v35 = vmul.f32 %v2294_v20, %v7559_v8  ;;  %v2349_v45 = vperm.slane %v7573_v27, 3 }
 0x184   :  { %v5476_v40 = vor.u32 %v6787_v22, %v5475_v21  ;;  %v5460_v53 = vor.u32 %v7580_v32, %v7575_v58  ;;  %v6779_v2 = vld [vmem:[#allocation9 + $0x374] sm:$0xf0]  ;;  %v2300_v21 = vmul.f32 %v2292_v50, %v7559_v8  ;;  %v5411_v50 = vld [vmem:[#allocation9 + $0x328] sm:$0xf] }
 0x185   :  { %v1257_v49 = vadd.f32 %v1256_v36, %v1244_v39  ;;  %2182 = vmatpush.bf16.msra.mxu2 %v5284_v42  ;;  %v5141_v36 = vld [vmem:[#allocation9 + $0x118] sm:$0xf0]  ;;  %v2346_v39 = vperm.slane %v7573_v27, 0  ;;  %v5352_v42 = vor.u32 %v7569_v24, %v5349_v25  ;;  %v2357_v14 = vmul.f32 %v2349_v45, %v7571_v55  ;;  %v6806_v20 = vld [vmem:[#allocation15 + $0x4c] sm:$0xf0] }
 0x186   :  { %2209 = vmatpush.bf16.msrb.mxu0 %v5016_v17  ;;  %2218 = vmatpush.bf16.msrb.mxu1 %v5208_v44  ;;  %v7586_v17 = vld [vmem:[#allocation9 + $0x28c] sm:$0xf]  ;;  %v5333_v44 = vld [vmem:[#allocation9 + $0x298] sm:$0xf0]  ;;  %v5144_v63 = vor.u32 %v7582_v33, %v5141_v36  ;;  %v5756_v24 = vor.u32 %v6858_v60, %v5755_v59  ;;  %v5739_v25 = vld [vmem:[#allocation15 + $0x1c0] sm:$0xf]  ;;  %v5444_v56 = vor.u32 %v6779_v2, %v5443_v1 }
 0x187   :  { %v1263_v61 = vmax.f32 %v1257_v49, 0.0  ;;  %v6810_v49 = vld [vmem:[#allocation15 + $0x6c] sm:$0xf0]  ;;  %v5336_v0 = vor.u32 %v7586_v17, %v5333_v44  ;;  %v5548_v32 = vor.u32 %v6806_v20, %v5547_v18  ;;  %v6741_v33 = vld [vmem:[#allocation9 + $0x24c] sm:$0xf] }
 0x188   :  { %v6775_v57 = vld [vmem:[#allocation9 + $0x354] sm:$0xf0]  ;;  %v5531_v17 = vld [vmem:[#allocation15 + $0x20] sm:$0xf]  ;;  %v6824_v20 = vld [vmem:[#allocation15 + $0xe4] sm:$0xf] }
 0x189   :  { %v7561_v9 = vpack.c.bf16 %v1263_v61, %v1263_v61  ;;  %2210 = vmatmul.bf16.vlgmr.msrb.gmra.mxu0 %v7541_v54  ;;  %2183 = vmatpush.bf16.msra.mxu2 %v5268_v62  ;;  %v5157_v54 = vld [vmem:[#allocation9 + $0x138] sm:$0xf0]  ;;  %v2315_v61 = vadd.f32 %v2307_v34, %v2302_v35  ;;  %v2347_v35 = vperm.slane %v7573_v27, 1  ;;  %v7632_v2 = vld [vmem:[#allocation12 + $0x5] ss:$8 sm:$0xf] }
 0x18a   :  { %3217 = vmatpush.bf16.msra.mxu0 %v5628_v46  ;;  %v1245_v15 = vpop.f32.mrf.mxu2  ;;  %v1258_v16 = vpop.f32.mrf.mxu3  ;;  %2219 = vmatpush.bf16.msrb.mxu1 %v5192_v5  ;;  %v5160_v41 = vor.u32 %v6705_v23, %v5157_v54  ;;  %v7591_v46 = vld [vmem:[#allocation12 + $0x1] ss:$8 sm:$0xf]  ;;  %v2354_v5 = vmul.f32 %v2346_v39, %v7571_v55  ;;  %v6802_v39 = vld [vmem:[#allocation15 + $0x2c] sm:$0xf0] }
 0x18b   :  { %2093 = vmatmul.bf16.vlgmr.msra.gmra.mxu3 %v7561_v9  ;;  %v2323_v52 = vperm.slane %v7591_v46, 0  ;;  %v2326_v62 = vperm.slane %v7591_v46, 3  ;;  %v7611_v16 = vld [vmem:[#allocation12 + $0x3] ss:$8 sm:$0xf]  ;;  %v2324_v22 = vperm.slane %v7591_v46, 1  ;;  %v2355_v1 = vmul.f32 %v2347_v35, %v7571_v55 }
 0x18c   :  { %2189 = vmatpush.bf16.msra.mxu3 %v5508_v4  ;;  %2184 = vmatmul.bf16.vlgmr.msra.gmra.mxu2 %v7549_v37  ;;  %v7602_v4 = vld [vmem:[#allocation9 + $0x26c] sm:$0xf]  ;;  %v2369_v54 = vperm.slane %v7611_v16, 0  ;;  %v5301_v34 = vld [vmem:[#allocation9 + $0x258] sm:$0xf0] }
 0x18d   :  { %2228 = vmatpush.bf16.msrb.mxu2 %v5384_v10  ;;  %v2331_v6 = vmul.f32 %v2323_v52, %v7593_v43  ;;  %v7606_v10 = vpop.permute.xlu2 %2365  ;;  %v2334_v15 = vmul.f32 %v2326_v62, %v7593_v43  ;;  %v5320_v31 = vor.u32 %v7602_v4, %v5317_v12  ;;  %v6737_v52 = vld [vmem:[#allocation9 + $0x22c] sm:$0xf]  ;;  %v5304_v62 = vor.u32 %v6741_v33, %v5301_v34  ;;  %v6846_v18 = vld [vmem:[#allocation15 + $0x18c] sm:$0xf0] }
 0x18e   :  { %3218 = vmatpush.bf16.msra.mxu0 %v5612_v11  ;;  %2220 = vmatpush.bf16.msrb.mxu1 %v5176_v3  ;;  %v5564_v11 = vor.u32 %v6810_v49, %v5563_v48  ;;  %v2372_v3 = vperm.slane %v7611_v16, 3  ;;  %v2377_v30 = vmul.f32 %v2369_v54, %v7606_v10  ;;  %v7622_v48 = vld [vmem:[#allocation12 + $0x4] ss:$8 sm:$0xf]  ;;  %v7624_v49 = vpop.permute.xlu1 %2388 }
 0x18f   :  { %v2335_v23 = vadd.f32 %v2331_v6, %v2312_v51  ;;  %v6771_v51 = vld [vmem:[#allocation9 + $0x334] sm:$0xf0]  ;;  %v2392_v60 = vperm.slane %v7622_v48, 0 }
 0x190   :  { %2190 = vmatpush.bf16.msra.mxu3 %v5492_v26  ;;  %v2338_v26 = vadd.f32 %v2334_v15, %v2315_v61  ;;  %v2380_v44 = vmul.f32 %v2372_v3, %v7606_v10  ;;  %v5707_v15 = vld [vmem:[#allocation15 + $0x180] sm:$0xf] }
 0x191   :  { %2229 = vmatpush.bf16.msrb.mxu2 %v5368_v28  ;;  %v6854_v28 = vld [vmem:[#allocation15 + $0x1cc] sm:$0xf0]  ;;  %v2358_v58 = vadd.f32 %v2354_v5, %v2335_v23  ;;  %v2400_v12 = vmul.f32 %v2392_v60, %v7624_v49  ;;  %v5708_v34 = vor.u32 %v6846_v18, %v5707_v15 }
 0x192   :  { %3219 = vmatpush.bf16.msra.mxu0 %v5596_v29  ;;  %2221 = vmatpush.bf16.msrb.mxu1 %v5160_v41  ;;  %v5427_v29 = vld [vmem:[#allocation9 + $0x348] sm:$0xf]  ;;  %v2361_v36 = vadd.f32 %v2357_v14, %v2338_v26  ;;  %v2313_v41 = vadd.f32 %v2305_v13, %v2300_v21  ;;  %v5740_v45 = vor.u32 %v6854_v28, %v5739_v25  ;;  %v6798_v5 = vld [vmem:[#allocation15 + $0xc] sm:$0xf0]  ;;  %v2415_v13 = vperm.slane %v7632_v2, 0 }
 0x193   :  { %v5428_v61 = vor.u32 %v6775_v57, %v5427_v29  ;;  %v5629_v21 = vld [vmem:[#allocation15 + $0xf0] sm:$0xf0]  ;;  %v6767_v23 = vld [vmem:[#allocation9 + $0x314] sm:$0xf0]  ;;  %v5412_v25 = vor.u32 %v6771_v51, %v5411_v50  ;;  %v6733_v28 = vld [vmem:[#allocation9 + $0x20c] sm:$0xf] }
 0x194   :  { %2191 = vmatpush.bf16.msra.mxu3 %v5476_v40  ;;  %v5723_v40 = vld [vmem:[#allocation15 + $0x1a0] sm:$0xf]  ;;  %v7628_v59 = vadd.f32 %v2380_v44, %v2361_v36  ;;  %v5269_v29 = vld [vmem:[#allocation9 + $0x218] sm:$0xf0]  ;;  %v6793_v57 = vld [vmem:[#allocation9 + $0x3ec] sm:$0xf]  ;;  %v5632_v35 = vor.u32 %v6824_v20, %v5629_v21 }
 0x195   :  { %2230 = vmatpush.bf16.msrb.mxu2 %v5352_v42  ;;  %v2332_v42 = vmul.f32 %v2324_v22, %v7593_v43  ;;  %v7634_v4 = vpop.permute.xlu2 %2411  ;;  %v5395_v22 = vld [vmem:[#allocation9 + $0x308] sm:$0xf]  ;;  %v2306_v44 = vperm.slane %v7565_v19, 2  ;;  %v6820_v50 = vld [vmem:[#allocation15 + $0xc4] sm:$0xf] }
 0x196   :  { %3220 = vmatpush.bf16.msra.mxu0 %v5580_v47  ;;  %2222 = vmatpush.bf16.msrb.mxu1 %v5144_v63  ;;  %v6850_v47 = vld [vmem:[#allocation15 + $0x1ac] sm:$0xf0]  ;;  %v5532_v63 = vor.u32 %v6802_v39, %v5531_v17  ;;  %v5691_v36 = vld [vmem:[#allocation15 + $0x160] sm:$0xf]  ;;  %v5396_v39 = vor.u32 %v6767_v23, %v5395_v22  ;;  %v5613_v51 = vld [vmem:[#allocation15 + $0xd0] sm:$0xf0] }
 0x197   :  { %v2336_v6 = vadd.f32 %v2332_v42, %v2313_v41  ;;  %v5724_v14 = vor.u32 %v6850_v47, %v5723_v40  ;;  %v6842_v17 = vld [vmem:[#allocation15 + $0x16c] sm:$0xf0]  ;;  %v5272_v40 = vor.u32 %v6733_v28, %v5269_v29  ;;  %v2371_v29 = vperm.slane %v7611_v16, 2 }
 0x198   :  { %2192 = vmatpush.bf16.msra.mxu3 %v5460_v53  ;;  %v2381_v53 = vadd.f32 %v2377_v30, %v2358_v58  ;;  %v5509_v58 = vld [vmem:[#allocation9 + $0x3f8] sm:$0xf0]  ;;  %v6890_v41 = vld [vmem:[#allocation15 + $0x2ec] sm:$0xf0] }
 0x199   :  { %2231 = vmatpush.bf16.msrb.mxu2 %v5336_v0  ;;  %2223 = vmatmul.bf16.vlgmr.msrb.gmra.mxu1 %v7544_v38  ;;  %v5285_v0 = vld [vmem:[#allocation9 + $0x238] sm:$0xf0]  ;;  %v5515_v38 = vld [vmem:[#allocation15] sm:$0xf]  ;;  %v2359_v30 = vadd.f32 %v2355_v1, %v2336_v6  ;;  %v5512_v47 = vor.u32 %v6793_v57, %v5509_v58  ;;  %v6812_v57 = vld [vmem:[#allocation15 + $0x84] sm:$0xf] }
 0x19a   :  { %3221 = vmatpush.bf16.msra.mxu0 %v5564_v11  ;;  %3230 = vmatpush.bf16.msra.mxu1 %v5756_v24  ;;  %v2370_v11 = vperm.slane %v7611_v16, 1  ;;  %v2404_v54 = vadd.f32 %v2400_v12, %v2381_v53  ;;  %v2423_v24 = vmul.f32 %v2415_v13, %v7634_v4  ;;  %v5288_v26 = vor.u32 %v6737_v52, %v5285_v0  ;;  %v6789_v0 = vld [vmem:[#allocation9 + $0x3cc] sm:$0xf]  ;;  %v5675_v1 = vld [vmem:[#allocation15 + $0x140] sm:$0xf] }
 0x19b   :  { %2145 = vmatmul.bf16.vlgmr.msrb.gmra.mxu3 %v7561_v9  ;;  %v5516_v3 = vor.u32 %v6798_v5, %v5515_v38  ;;  %v2325_v52 = vperm.slane %v7591_v46, 2  ;;  %v5616_v38 = vor.u32 %v6820_v50, %v5613_v51  ;;  %v6838_v5 = vld [vmem:[#allocation15 + $0x14c] sm:$0xf0]  ;;  %v5867_v6 = vld [vmem:[#allocation15 + $0x2c0] sm:$0xf]  ;;  %v2348_v12 = vperm.slane %v7573_v27, 2 }
 0x19c   :  { %2193 = vmatpush.bf16.msra.mxu3 %v5444_v56  ;;  %v2293_v56 = vperm.slane %v7557_v7, 2  ;;  %v2427_v33 = vadd.f32 %v2423_v24, %v2404_v54  ;;  %v5883_v7 = vld [vmem:[#allocation15 + $0x2e0] sm:$0xf]  ;;  %v6886_v46 = vld [vmem:[#allocation15 + $0x2cc] sm:$0xf0]  ;;  %v5676_v22 = vor.u32 %v6838_v5, %v5675_v1  ;;  %v2379_v16 = vmul.f32 %v2371_v29, %v7606_v10 }
 0x19d   :  { %2232 = vmatpush.bf16.msrb.mxu2 %v5320_v31  ;;  %v2378_v31 = vmul.f32 %v2370_v11, %v7606_v10  ;;  %v5884_v19 = vor.u32 %v6890_v41, %v5883_v7  ;;  %v6816_v13 = vld [vmem:[#allocation15 + $0xa4] sm:$0xf]  ;;  %v2333_v15 = vmul.f32 %v2325_v52, %v7593_v43  ;;  %v5868_v23 = vor.u32 %v6886_v46, %v5867_v6  ;;  %v5477_v24 = vld [vmem:[#allocation9 + $0x3b8] sm:$0xf0]  ;;  %v6834_v43 = vld [vmem:[#allocation15 + $0x12c] sm:$0xf0] }
 0x19e   :  { %3222 = vmatpush.bf16.msra.mxu0 %v5548_v32  ;;  %3231 = vmatpush.bf16.msra.mxu1 %v5740_v45  ;;  %v2393_v32 = vperm.slane %v7622_v48, 1  ;;  %v2431_v42 = vmax.f32 %v2427_v33, 0.0  ;;  %v2301_v45 = vmul.f32 %v2293_v56, %v7559_v8  ;;  %v5493_v8 = vld [vmem:[#allocation9 + $0x3d8] sm:$0xf0]  ;;  %v6785_v54 = vld [vmem:[#allocation9 + $0x3ac] sm:$0xf]  ;;  %v2356_v56 = vmul.f32 %v2348_v12, %v7571_v55 }
 0x19f   :  { %v2382_v53 = vadd.f32 %v2378_v31, %v2359_v30  ;;  %v5496_v18 = vor.u32 %v6789_v0, %v5493_v8  ;;  %v5581_v58 = vld [vmem:[#allocation15 + $0x90] sm:$0xf0]  ;;  %v5480_v30 = vor.u32 %v6785_v54, %v5477_v24  ;;  %v6781_v31 = vld [vmem:[#allocation9 + $0x38c] sm:$0xf]  ;;  %v6874_v0 = vld [vmem:[#allocation15 + $0x26c] sm:$0xf0] }
 0x1a0   :  { %2194 = vmatpush.bf16.msra.mxu3 %v5428_v61  ;;  %v2401_v60 = vmul.f32 %v2393_v32, %v7624_v49  ;;  %v2416_v61 = vperm.slane %v7632_v2, 1  ;;  %v2314_v11 = vadd.f32 %v2306_v44, %v2301_v45  ;;  %v5584_v55 = vor.u32 %v6812_v57, %v5581_v58  ;;  %v5565_v41 = vld [vmem:[#allocation15 + $0x70] sm:$0xf0]  ;;  %v6804_v10 = vld [vmem:[#allocation15 + $0x44] sm:$0xf] }
 0x1a1   :  { %2233 = vmatpush.bf16.msrb.mxu2 %v5304_v62  ;;  %v7648_v62 = vpack.c.bf16 %v2431_v42, %v2431_v42  ;;  %v6856_v42 = vld [vmem:[#allocation15 + $0x1e4] sm:$0xf]  ;;  %v5757_v44 = vld [vmem:[#allocation15 + $0x1f0] sm:$0xf0]  ;;  %v5787_v58 = vld [vmem:[#allocation15 + $0x220] sm:$0xf] }
 0x1a2   :  { %3223 = vmatpush.bf16.msra.mxu0 %v5532_v63  ;;  %3232 = vmatpush.bf16.msra.mxu1 %v5724_v14  ;;  %v5692_v63 = vor.u32 %v6842_v17, %v5691_v36  ;;  %v5597_v14 = vld [vmem:[#allocation15 + $0xb0] sm:$0xf0]  ;;  %v2405_v20 = vadd.f32 %v2401_v60, %v2382_v53  ;;  %v2424_v21 = vmul.f32 %v2416_v61, %v7634_v4  ;;  %v5643_v36 = vld [vmem:[#allocation15 + $0x100] sm:$0xf]  ;;  %v6830_v17 = vld [vmem:[#allocation15 + $0x10c] sm:$0xf0] }
 0x1a3   :  { %v5600_v27 = vor.u32 %v6816_v13, %v5597_v14  ;;  %v2337_v28 = vadd.f32 %v2333_v15, %v2314_v11  ;;  %v5644_v51 = vor.u32 %v6830_v17, %v5643_v36  ;;  %v6777_v53 = vld [vmem:[#allocation9 + $0x36c] sm:$0xf]  ;;  %v5445_v60 = vld [vmem:[#allocation9 + $0x378] sm:$0xf0]  ;;  %v2417_v11 = vperm.slane %v7632_v2, 2 }
 0x1a4   :  { %2195 = vmatpush.bf16.msra.mxu3 %v5412_v25  ;;  %v5659_v25 = vld [vmem:[#allocation15 + $0x120] sm:$0xf]  ;;  %v2428_v32 = vadd.f32 %v2424_v21, %v2405_v20  ;;  %v5549_v1 = vld [vmem:[#allocation15 + $0x50] sm:$0xf0]  ;;  %v5448_v46 = vor.u32 %v6777_v53, %v5445_v60  ;;  %v6773_v14 = vld [vmem:[#allocation9 + $0x34c] sm:$0xf] }
 0x1a5   :  { %2234 = vmatpush.bf16.msrb.mxu2 %v5288_v26  ;;  %v5851_v26 = vld [vmem:[#allocation15 + $0x2a0] sm:$0xf]  ;;  %v5660_v33 = vor.u32 %v6834_v43, %v5659_v25  ;;  %v2360_v7 = vadd.f32 %v2356_v56, %v2337_v28  ;;  %v5741_v5 = vld [vmem:[#allocation15 + $0x1d0] sm:$0xf0]  ;;  %v6848_v24 = vld [vmem:[#allocation15 + $0x1a4] sm:$0xf]  ;;  %v2425_v43 = vmul.f32 %v2417_v11, %v7634_v4 }
 0x1a6   :  { %3224 = vmatpush.bf16.msra.mxu0 %v5516_v3  ;;  %3233 = vmatpush.bf16.msra.mxu1 %v5708_v34  ;;  %v6882_v3 = vld [vmem:[#allocation15 + $0x2ac] sm:$0xf0]  ;;  %v2432_v50 = vmax.f32 %v2428_v32, 0.0  ;;  %v5429_v15 = vld [vmem:[#allocation9 + $0x358] sm:$0xf0] }
 0x1a7   :  { %v5852_v34 = vor.u32 %v6882_v3, %v5851_v26  ;;  %v2383_v8 = vadd.f32 %v2379_v16, %v2360_v7  ;;  %v5803_v21 = vld [vmem:[#allocation15 + $0x240] sm:$0xf]  ;;  %v5533_v54 = vld [vmem:[#allocation15 + $0x30] sm:$0xf0]  ;;  %v5432_v26 = vor.u32 %v6773_v14, %v5429_v15  ;;  %v6769_v56 = vld [vmem:[#allocation9 + $0x32c] sm:$0xf] }
 0x1a8   :  { %2196 = vmatpush.bf16.msra.mxu3 %v5396_v39  ;;  %v5835_v39 = vld [vmem:[#allocation15 + $0x280] sm:$0xf]  ;;  %v7662_v12 = vpack.c.bf16 %v2432_v50, %v2432_v50  ;;  %v5725_v25 = vld [vmem:[#allocation15 + $0x1b0] sm:$0xf0]  ;;  %v5635_v17 = vld [vmem:[#allocation15 + $0xe8] sm:$0xf] }
 0x1a9   :  { %3225 = vmatmul.bf16.vlgmr.msra.gmra.mxu0 %v7648_v62  ;;  %2235 = vmatpush.bf16.msrb.mxu2 %v5272_v40  ;;  %v6808_v40 = vld [vmem:[#allocation15 + $0x64] sm:$0xf]  ;;  %v5413_v28 = vld [vmem:[#allocation9 + $0x338] sm:$0xf0]  ;;  %v5728_v57 = vor.u32 %v6848_v24, %v5725_v25  ;;  %v5771_v7 = vld [vmem:[#allocation15 + $0x200] sm:$0xf] }
 0x1aa   :  { %3269 = vmatpush.bf16.msrb.mxu0 %v5632_v35  ;;  %3234 = vmatpush.bf16.msra.mxu1 %v5692_v63  ;;  %v5461_v35 = vld [vmem:[#allocation9 + $0x398] sm:$0xf0]  ;;  %v5568_v61 = vor.u32 %v6808_v40, %v5565_v41  ;;  %v5760_v63 = vor.u32 %v6856_v42, %v5757_v44  ;;  %v5416_v36 = vor.u32 %v6769_v56, %v5413_v28  ;;  %v6862_v16 = vld [vmem:[#allocation15 + $0x20c] sm:$0xf0]  ;;  %v6011_v44 = vld [vmem:[#allocation15 + $0x3e0] sm:$0xf] }
 0x1ab   :  { %2197 = vmatmul.bf16.vlgmr.msra.gmra.mxu3 %v7561_v9  ;;  %v5464_v45 = vor.u32 %v6781_v31, %v5461_v35  ;;  %v6796_v31 = vld [vmem:[#allocation15 + $0x4] sm:$0xf]  ;;  %v5517_v32 = vld [vmem:[#allocation15 + $0x10] sm:$0xf0]  ;;  %v5979_v24 = vld [vmem:[#allocation15 + $0x3a0] sm:$0xf] }
 0x1ac   :  { %2241 = vmatpush.bf16.msrb.mxu3 %v5512_v47  ;;  %2236 = vmatmul.bf16.vlgmr.msrb.gmra.mxu2 %v7549_v37  ;;  %v6878_v37 = vld [vmem:[#allocation15 + $0x28c] sm:$0xf0]  ;;  %v2394_v47 = vperm.slane %v7622_v48, 2  ;;  %v5397_v40 = vld [vmem:[#allocation9 + $0x318] sm:$0xf0]  ;;  %v5520_v41 = vor.u32 %v6796_v31, %v5517_v32 }
 0x1ad   :  { %3243 = vmatpush.bf16.msra.mxu2 %v5884_v19  ;;  %v5836_v52 = vor.u32 %v6878_v37, %v5835_v39  ;;  %v5819_v19 = vld [vmem:[#allocation15 + $0x260] sm:$0xf]  ;;  %v6765_v39 = vld [vmem:[#allocation9 + $0x30c] sm:$0xf]  ;;  %v5885_v53 = vld [vmem:[#allocation15 + $0x2f0] sm:$0xf0] }
 0x1ae   :  { %3270 = vmatpush.bf16.msrb.mxu0 %v5616_v38  ;;  %3235 = vmatpush.bf16.msra.mxu1 %v5676_v22  ;;  %v6852_v38 = vld [vmem:[#allocation15 + $0x1c4] sm:$0xf]  ;;  %v2402_v6 = vmul.f32 %v2394_v47, %v7624_v49  ;;  %v5820_v13 = vor.u32 %v6874_v0, %v5819_v19  ;;  %v6870_v22 = vld [vmem:[#allocation15 + $0x24c] sm:$0xf0]  ;;  %v6823_v19 = vld [vmem:[#allocation15 + $0xd4] sm:$0xf0]  ;;  %v5772_v0 = vor.u32 %v6862_v16, %v5771_v7 }
 0x1af   :  { %v5744_v20 = vor.u32 %v6852_v38, %v5741_v5  ;;  %v5804_v3 = vor.u32 %v6870_v22, %v5803_v21  ;;  %v6840_v47 = vld [vmem:[#allocation15 + $0x164] sm:$0xf]  ;;  %v5995_v38 = vld [vmem:[#allocation15 + $0x3c0] sm:$0xf]  ;;  %v6918_v5 = vld [vmem:[#allocation15 + $0x3cc] sm:$0xf0] }
 0x1b0   :  { %2242 = vmatpush.bf16.msrb.mxu3 %v5496_v18  ;;  %v5552_v18 = vor.u32 %v6804_v10, %v5549_v1  ;;  %v5677_v11 = vld [vmem:[#allocation15 + $0x150] sm:$0xf0]  ;;  %v2395_v21 = vperm.slane %v7622_v48, 3  ;;  %v5996_v22 = vor.u32 %v6918_v5, %v5995_v38  ;;  %v6914_v25 = vld [vmem:[#allocation15 + $0x3ac] sm:$0xf0] }
 0x1b1   :  { %3244 = vmatpush.bf16.msra.mxu2 %v5868_v23  ;;  %v6800_v23 = vld [vmem:[#allocation15 + $0x24] sm:$0xf]  ;;  %v5869_v14 = vld [vmem:[#allocation15 + $0x2d0] sm:$0xf0]  ;;  %v5587_v48 = vld [vmem:[#allocation15 + $0x88] sm:$0xf] }
 0x1b2   :  { %3271 = vmatpush.bf16.msrb.mxu0 %v5600_v27  ;;  %3236 = vmatpush.bf16.msra.mxu1 %v5660_v33  ;;  %v2406_v27 = vadd.f32 %v2402_v6, %v2383_v8  ;;  %v5536_v29 = vor.u32 %v6800_v23, %v5533_v54  ;;  %v6844_v33 = vld [vmem:[#allocation15 + $0x184] sm:$0xf]  ;;  %v5853_v56 = vld [vmem:[#allocation15 + $0x2b0] sm:$0xf0]  ;;  %v6902_v38 = vld [vmem:[#allocation15 + $0x34c] sm:$0xf0] }
 0x1b3   :  { %v6836_v6 = vld [vmem:[#allocation15 + $0x144] sm:$0xf] }
 0x1b4   :  { %2243 = vmatpush.bf16.msrb.mxu3 %v5480_v30  ;;  %v6866_v30 = vld [vmem:[#allocation15 + $0x22c] sm:$0xf0]  ;;  %v2429_v35 = vadd.f32 %v2425_v43, %v2406_v27  ;;  %v5680_v23 = vor.u32 %v6836_v6, %v5677_v11  ;;  %v6832_v27 = vld [vmem:[#allocation15 + $0x124] sm:$0xf]  ;;  %v5805_v11 = vld [vmem:[#allocation15 + $0x250] sm:$0xf0] }
 0x1b5   :  { %3245 = vmatpush.bf16.msra.mxu2 %v5852_v34  ;;  %v5709_v34 = vld [vmem:[#allocation15 + $0x190] sm:$0xf0]  ;;  %v5788_v37 = vor.u32 %v6866_v30, %v5787_v58  ;;  %v2418_v58 = vperm.slane %v7632_v2, 3  ;;  %v5980_v30 = vor.u32 %v6914_v25, %v5979_v24  ;;  %v6898_v24 = vld [vmem:[#allocation15 + $0x32c] sm:$0xf0] }
 0x1b6   :  { %3272 = vmatpush.bf16.msrb.mxu0 %v5584_v55  ;;  %3237 = vmatpush.bf16.msra.mxu1 %v5644_v51  ;;  %v6827_v55 = vld [vmem:[#allocation15 + $0xf4] sm:$0xf0]  ;;  %v5712_v42 = vor.u32 %v6844_v33, %v5709_v34  ;;  %v5693_v51 = vld [vmem:[#allocation15 + $0x170] sm:$0xf0]  ;;  %v2433_v60 = vmax.f32 %v2429_v35, 0.0 }
 0x1b7   :  { %v5636_v50 = vor.u32 %v6827_v55, %v5635_v17  ;;  %v5696_v8 = vor.u32 %v6840_v47, %v5693_v51  ;;  %v6910_v33 = vld [vmem:[#allocation15 + $0x38c] sm:$0xf0]  ;;  %v6828_v34 = vld [vmem:[#allocation15 + $0x104] sm:$0xf]  ;;  %v5645_v35 = vld [vmem:[#allocation15 + $0x110] sm:$0xf0]  ;;  %v2426_v16 = vmul.f32 %v2418_v58, %v7634_v4 }
 0x1b8   :  { %2244 = vmatpush.bf16.msrb.mxu3 %v5464_v45  ;;  %v6922_v45 = vld [vmem:[#allocation15 + $0x3ec] sm:$0xf0]  ;;  %v7666_v15 = vpack.c.bf16 %v2433_v60, %v2433_v60  ;;  %v6876_v17 = vld [vmem:[#allocation15 + $0x284] sm:$0xf]  ;;  %v5837_v55 = vld [vmem:[#allocation15 + $0x290] sm:$0xf0] }
 0x1b9   :  { %3246 = vmatpush.bf16.msra.mxu2 %v5836_v52  ;;  %3238 = vmatmul.bf16.vlgmr.msra.gmra.mxu1 %v7662_v12  ;;  %v6888_v52 = vld [vmem:[#allocation15 + $0x2e4] sm:$0xf]  ;;  %v6012_v10 = vor.u32 %v6922_v45, %v6011_v44  ;;  %v5840_v44 = vor.u32 %v6876_v17, %v5837_v55  ;;  %v5947_v45 = vld [vmem:[#allocation15 + $0x360] sm:$0xf]  ;;  %v6906_v47 = vld [vmem:[#allocation15 + $0x36c] sm:$0xf0] }
 0x1ba   :  { %3273 = vmatpush.bf16.msrb.mxu0 %v5568_v61  ;;  %3282 = vmatpush.bf16.msrb.mxu1 %v5760_v63  ;;  %v5400_v61 = vor.u32 %v6765_v39, %v5397_v40  ;;  %v5619_v63 = vld [vmem:[#allocation15 + $0xc8] sm:$0xf]  ;;  %v5888_v1 = vor.u32 %v6888_v52, %v5885_v53  ;;  %v6872_v52 = vld [vmem:[#allocation15 + $0x264] sm:$0xf]  ;;  %v5773_v17 = vld [vmem:[#allocation15 + $0x210] sm:$0xf0] }
 0x1bb   :  { %v5571_v39 = vld [vmem:[#allocation15 + $0x68] sm:$0xf] }
 0x1bc   :  { %2245 = vmatpush.bf16.msrb.mxu3 %v5448_v46  ;;  %v5620_v46 = vor.u32 %v6823_v19, %v5619_v63  ;;  %v5763_v40 = vld [vmem:[#allocation15 + $0x1e8] sm:$0xf]  ;;  %v6855_v63 = vld [vmem:[#allocation15 + $0x1d4] sm:$0xf0]  ;;  %v5948_v19 = vor.u32 %v6906_v47, %v5947_v45  ;;  %v6821_v45 = vld [vmem:[#allocation15 + $0xcc] sm:$0xf] }
 0x1bd   :  { %3247 = vmatpush.bf16.msra.mxu2 %v5820_v13  ;;  %v6884_v13 = vld [vmem:[#allocation15 + $0x2c4] sm:$0xf]  ;;  %v5555_v53 = vld [vmem:[#allocation15 + $0x48] sm:$0xf]  ;;  %v5621_v47 = vld [vmem:[#allocation15 + $0xd8] sm:$0xf0] }
 0x1be   :  { %3274 = vmatpush.bf16.msrb.mxu0 %v5552_v18  ;;  %3283 = vmatpush.bf16.msrb.mxu1 %v5744_v20  ;;  %v5603_v18 = vld [vmem:[#allocation15 + $0xa8] sm:$0xf]  ;;  %v6819_v20 = vld [vmem:[#allocation15 + $0xb4] sm:$0xf0]  ;;  %v5872_v54 = vor.u32 %v6884_v13, %v5869_v14 }
 0x1bf   :  { %v5604_v43 = vor.u32 %v6819_v20, %v5603_v18  ;;  %v5747_v4 = vld [vmem:[#allocation15 + $0x1c8] sm:$0xf]  ;;  %v6803_v14 = vld [vmem:[#allocation15 + $0x34] sm:$0xf0] }
 0x1c0   :  { %2246 = vmatpush.bf16.msrb.mxu3 %v5432_v26  ;;  %v5661_v26 = vld [vmem:[#allocation15 + $0x130] sm:$0xf0]  ;;  %v5748_v6 = vor.u32 %v6855_v63, %v5747_v4  ;;  %v5539_v13 = vld [vmem:[#allocation15 + $0x28] sm:$0xf]  ;;  %v6851_v20 = vld [vmem:[#allocation15 + $0x1b4] sm:$0xf0] }
 0x1c1   :  { %3248 = vmatpush.bf16.msra.mxu2 %v5804_v3  ;;  %v6880_v3 = vld [vmem:[#allocation15 + $0x2a4] sm:$0xf]  ;;  %v5664_v31 = vor.u32 %v6832_v27, %v5661_v26  ;;  %v5731_v18 = vld [vmem:[#allocation15 + $0x1a8] sm:$0xf]  ;;  %v5540_v27 = vor.u32 %v6803_v14, %v5539_v13 }
 0x1c2   :  { %3275 = vmatpush.bf16.msrb.mxu0 %v5536_v29  ;;  %3284 = vmatpush.bf16.msrb.mxu1 %v5728_v57  ;;  %v6815_v29 = vld [vmem:[#allocation15 + $0x94] sm:$0xf0]  ;;  %v2403_v57 = vmul.f32 %v2395_v21, %v7624_v49  ;;  %v5856_v32 = vor.u32 %v6880_v3, %v5853_v56  ;;  %v6864_v26 = vld [vmem:[#allocation15 + $0x224] sm:$0xf]  ;;  %v5789_v3 = vld [vmem:[#allocation15 + $0x230] sm:$0xf0] }
 0x1c3   :  { %v6859_v49 = vld [vmem:[#allocation15 + $0x1f4] sm:$0xf0]  ;;  %v5523_v56 = vld [vmem:[#allocation15 + $0x8] sm:$0xf]  ;;  %v6912_v14 = vld [vmem:[#allocation15 + $0x3a4] sm:$0xf] }
 0x1c4   :  { %2247 = vmatpush.bf16.msrb.mxu3 %v5416_v36  ;;  %v5588_v36 = vor.u32 %v6815_v29, %v5587_v48  ;;  %v2407_v2 = vadd.f32 %v2403_v57, %v7628_v59  ;;  %v5764_v51 = vor.u32 %v6859_v49, %v5763_v40  ;;  %v5821_v59 = vld [vmem:[#allocation15 + $0x270] sm:$0xf0]  ;;  %v6799_v57 = vld [vmem:[#allocation15 + $0x14] sm:$0xf0]  ;;  %v5715_v58 = vld [vmem:[#allocation15 + $0x188] sm:$0xf] }
 0x1c5   :  { %3249 = vmatpush.bf16.msra.mxu2 %v5788_v37  ;;  %v6811_v37 = vld [vmem:[#allocation15 + $0x74] sm:$0xf0]  ;;  %v5524_v55 = vor.u32 %v6799_v57, %v5523_v56  ;;  %v6013_v40 = vld [vmem:[#allocation15 + $0x3f0] sm:$0xf0]  ;;  %v5699_v49 = vld [vmem:[#allocation15 + $0x168] sm:$0xf] }
 0x1c6   :  { %3276 = vmatpush.bf16.msrb.mxu0 %v5520_v41  ;;  %3285 = vmatpush.bf16.msrb.mxu1 %v5712_v42  ;;  %v7670_v28 = vpop.f32.mrf.mxu0  ;;  %v7681_v41 = vld [vmem:[%s7829_s7] sm:$0xf]  ;;  %v5648_v42 = vor.u32 %v6828_v34, %v5645_v35  ;;  %v5792_v34 = vor.u32 %v6864_v26, %v5789_v3  ;;  %v5651_v57 = vld [vmem:[#allocation15 + $0x108] sm:$0xf] }
 0x1c7   :  { %v6894_v35 = vld [vmem:[#allocation15 + $0x30c] sm:$0xf0] }
 0x1c8   :  { %2248 = vmatpush.bf16.msrb.mxu3 %v5400_v61  ;;  %v6807_v61 = vld [vmem:[#allocation15 + $0x54] sm:$0xf0] }
 0x1c9   :  { %3250 = vmatpush.bf16.msra.mxu2 %v5772_v0  ;;  %3277 = vmatmul.bf16.vlgmr.msrb.gmra.mxu0 %v7648_v62  ;;  %v7683_v0 = vadd.f32 %v2426_v16, %v2407_v2  ;;  %v5556_v5 = vor.u32 %v6807_v61, %v5555_v53  ;;  %v5891_v16 = vld [vmem:[#allocation15 + $0x2e8] sm:$0xf]  ;;  %v6916_v53 = vld [vmem:[#allocation15 + $0x3c4] sm:$0xf] }
 0x1ca   :  { %3321 = vmatpush.bf16.msra.mxu0 %v5636_v50  ;;  %3286 = vmatpush.bf16.msrb.mxu1 %v5696_v8  ;;  %v5572_v50 = vor.u32 %v6811_v37, %v5571_v39  ;;  %v5824_v8 = vor.u32 %v6872_v52, %v5821_v59  ;;  %v6920_v37 = vld [vmem:[#allocation15 + $0x3e4] sm:$0xf]  ;;  %v5683_v61 = vld [vmem:[#allocation15 + $0x148] sm:$0xf] }
 0x1cb   :  { %2249 = vmatmul.bf16.vlgmr.msrb.gmra.mxu3 %v7561_v9  ;;  %v5963_v9 = vld [vmem:[#allocation15 + $0x380] sm:$0xf] }
 0x1cc   :  { %3256 = vmatpush.bf16.msra.mxu3 %v6012_v10  ;;  %3251 = vmatmul.bf16.vlgmr.msra.gmra.mxu2 %v7666_v15  ;;  %v5964_v7 = vor.u32 %v6910_v33, %v5963_v9  ;;  %v1398_v10 = vperm.slane %v7681_v41, 0  ;;  %v5637_v33 = vld [vmem:[#allocation15 + $0xf8] sm:$0xf0] }
 0x1cd   :  { %3295 = vmatpush.bf16.msrb.mxu2 %v5888_v1  ;;  %v5931_v1 = vld [vmem:[#allocation15 + $0x340] sm:$0xf] }
 0x1ce   :  { %3322 = vmatpush.bf16.msra.mxu0 %v5620_v46  ;;  %3287 = vmatpush.bf16.msrb.mxu1 %v5680_v23  ;;  %v2057_v60 = vpop.f32.mrf.mxu0  ;;  %v6868_v46 = vld [vmem:[#allocation15 + $0x244] sm:$0xf]  ;;  %v5932_v21 = vor.u32 %v6902_v38, %v5931_v1  ;;  %v2056_v25 = vadd.f32 %v7670_v28, %v1398_v10  ;;  %v5899_v28 = vld [vmem:[#allocation15 + $0x300] sm:$0xf]  ;;  %v6839_v10 = vld [vmem:[#allocation15 + $0x154] sm:$0xf0] }
 0x1cf   :  { %v5808_v23 = vor.u32 %v6868_v46, %v5805_v11  ;;  %v5997_v60 = vld [vmem:[#allocation15 + $0x3d0] sm:$0xf0]  ;;  %v6887_v1 = vld [vmem:[#allocation15 + $0x2d4] sm:$0xf0]  ;;  %v6817_v38 = vld [vmem:[#allocation15 + $0xac] sm:$0xf]  ;;  %v5684_v11 = vor.u32 %v6839_v10, %v5683_v61 }
 0x1d0   :  { %3257 = vmatpush.bf16.msra.mxu3 %v5996_v22  ;;  %v2434_v22 = vmax.f32 %v7683_v0, 0.0  ;;  %v5624_v0 = vor.u32 %v6821_v45, %v5621_v47  ;;  %v6000_v46 = vor.u32 %v6916_v53, %v5997_v60  ;;  %v5557_v45 = vld [vmem:[#allocation15 + $0x58] sm:$0xf0]  ;;  %v6853_v47 = vld [vmem:[#allocation15 + $0x1cc] sm:$0xf] }
 0x1d1   :  { %3296 = vmatpush.bf16.msrb.mxu2 %v5872_v54  ;;  %v5915_v54 = vld [vmem:[#allocation15 + $0x320] sm:$0xf]  ;;  %v5933_v53 = vld [vmem:[#allocation15 + $0x350] sm:$0xf0]  ;;  %v6871_v10 = vld [vmem:[#allocation15 + $0x254] sm:$0xf0] }
 0x1d2   :  { %3323 = vmatpush.bf16.msra.mxu0 %v5604_v43  ;;  %3288 = vmatpush.bf16.msrb.mxu1 %v5664_v31  ;;  %v5732_v43 = vor.u32 %v6851_v20, %v5731_v18  ;;  %v5916_v31 = vor.u32 %v6898_v24, %v5915_v54  ;;  %v7693_v4 = vpack.c.bf16 %v2434_v22, %v2434_v22  ;;  %v5981_v18 = vld [vmem:[#allocation15 + $0x3b0] sm:$0xf0]  ;;  %v5667_v20 = vld [vmem:[#allocation15 + $0x128] sm:$0xf]  ;;  %v6835_v22 = vld [vmem:[#allocation15 + $0x134] sm:$0xf0] }
 0x1d3   :  { %v6883_v54 = vld [vmem:[#allocation15 + $0x2b4] sm:$0xf0]  ;;  %v6813_v24 = vld [vmem:[#allocation15 + $0x8c] sm:$0xf]  ;;  %v5668_v3 = vor.u32 %v6835_v22, %v5667_v20  ;;  %v5917_v20 = vld [vmem:[#allocation15 + $0x330] sm:$0xf0] }
 0x1d4   :  { %3258 = vmatpush.bf16.msra.mxu3 %v5980_v30  ;;  %v6847_v30 = vld [vmem:[#allocation15 + $0x194] sm:$0xf0] }
 0x1d5   :  { %3297 = vmatpush.bf16.msrb.mxu2 %v5856_v32  ;;  %v6825_v32 = vld [vmem:[#allocation15 + $0xec] sm:$0xf]  ;;  %v5716_v39 = vor.u32 %v6847_v30, %v5715_v58  ;;  %v6831_v58 = vld [vmem:[#allocation15 + $0x114] sm:$0xf0] }
 0x1d6   :  { %3324 = vmatpush.bf16.msra.mxu0 %v5588_v36  ;;  %3289 = vmatpush.bf16.msrb.mxu1 %v5648_v42  ;;  %v2068_v48 = vpop.f32.mrf.mxu1  ;;  %v7689_v29 = vpop.f32.mrf.mxu0  ;;  %v6860_v36 = vld [vmem:[#allocation15 + $0x204] sm:$0xf]  ;;  %v5640_v2 = vor.u32 %v6825_v32, %v5637_v33  ;;  %v6891_v42 = vld [vmem:[#allocation15 + $0x2f4] sm:$0xf0]  ;;  %v5843_v33 = vld [vmem:[#allocation15 + $0x288] sm:$0xf] }
 0x1d7   :  { %v7691_v9 = vadd.f32 %v2068_v48, %v2056_v25  ;;  %v5892_v59 = vor.u32 %v6891_v42, %v5891_v16  ;;  %v5589_v25 = vld [vmem:[#allocation15 + $0x98] sm:$0xf0]  ;;  %v5965_v48 = vld [vmem:[#allocation15 + $0x390] sm:$0xf0]  ;;  %v5827_v16 = vld [vmem:[#allocation15 + $0x268] sm:$0xf] }
 0x1d8   :  { %3259 = vmatpush.bf16.msra.mxu3 %v5964_v7  ;;  %v6843_v7 = vld [vmem:[#allocation15 + $0x174] sm:$0xf0]  ;;  %v5592_v32 = vor.u32 %v6813_v24, %v5589_v25  ;;  %v5525_v24 = vld [vmem:[#allocation15 + $0x18] sm:$0xf0]  ;;  %v6845_v25 = vld [vmem:[#allocation15 + $0x18c] sm:$0xf] }
 0x1d9   :  { %3298 = vmatpush.bf16.msrb.mxu2 %v5840_v44  ;;  %3290 = vmatmul.bf16.vlgmr.msrb.gmra.mxu1 %v7662_v12  ;;  %v5900_v44 = vor.u32 %v6894_v35, %v5899_v28  ;;  %v5700_v52 = vor.u32 %v6843_v7, %v5699_v49  ;;  %v6879_v28 = vld [vmem:[#allocation15 + $0x294] sm:$0xf0]  ;;  %v5949_v49 = vld [vmem:[#allocation15 + $0x370] sm:$0xf0] }
 0x1da   :  { %3325 = vmatpush.bf16.msra.mxu0 %v5572_v50  ;;  %3334 = vmatpush.bf16.msra.mxu1 %v5764_v51  ;;  %v5776_v50 = vor.u32 %v6860_v36, %v5773_v17  ;;  %v6016_v51 = vor.u32 %v6920_v37, %v6013_v40  ;;  %v5573_v36 = vld [vmem:[#allocation15 + $0x78] sm:$0xf0]  ;;  %v6857_v17 = vld [vmem:[#allocation15 + $0x1ec] sm:$0xf]  ;;  %v5844_v37 = vor.u32 %v6879_v28, %v5843_v33  ;;  %v6904_v40 = vld [vmem:[#allocation15 + $0x364] sm:$0xf] }
 0x1db   :  { %v6875_v42 = vld [vmem:[#allocation15 + $0x274] sm:$0xf0] }
 0x1dc   :  { %3260 = vmatpush.bf16.msra.mxu3 %v5948_v19  ;;  %v6863_v28 = vld [vmem:[#allocation15 + $0x214] sm:$0xf0] }
 0x1dd   :  { %3299 = vmatpush.bf16.msrb.mxu2 %v5824_v8  ;;  %v5875_v8 = vld [vmem:[#allocation15 + $0x2c8] sm:$0xf] }
 0x1de   :  { %3326 = vmatpush.bf16.msra.mxu0 %v5556_v5  ;;  %3335 = vmatpush.bf16.msra.mxu1 %v5748_v6  ;;  %v2070_v63 = vpop.f32.mrf.mxu1  ;;  %v2109_v19 = vpop.f32.mrf.mxu0  ;;  %v5605_v5 = vld [vmem:[#allocation15 + $0xb8] sm:$0xf0]  ;;  %v1399_v6 = vperm.slane %v7681_v41, 1  ;;  %v5876_v13 = vor.u32 %v6887_v1, %v5875_v8  ;;  %v6801_v8 = vld [vmem:[#allocation15 + $0x2c] sm:$0xf] }
 0x1e0   :  { %3261 = vmatpush.bf16.msra.mxu3 %v5932_v21  ;;  %v5608_v21 = vor.u32 %v6817_v38, %v5605_v5  ;;  %v2108_v26 = vadd.f32 %v7689_v29, %v1399_v6  ;;  %v5765_v29 = vld [vmem:[#allocation15 + $0x1f8] sm:$0xf0]  ;;  %v6849_v6 = vld [vmem:[#allocation15 + $0x1ac] sm:$0xf] }
 0x1e1   :  { %3300 = vmatpush.bf16.msrb.mxu2 %v5808_v23  ;;  %v5859_v23 = vld [vmem:[#allocation15 + $0x2a8] sm:$0xf]  ;;  %v5768_v7 = vor.u32 %v6857_v17, %v5765_v29  ;;  %v5541_v5 = vld [vmem:[#allocation15 + $0x38] sm:$0xf0]  ;;  %v6841_v29 = vld [vmem:[#allocation15 + $0x16c] sm:$0xf] }
 0x1e2   :  { %3327 = vmatpush.bf16.msra.mxu0 %v5540_v27  ;;  %3336 = vmatpush.bf16.msra.mxu1 %v5732_v43  ;;  %v5984_v27 = vor.u32 %v6912_v14, %v5981_v18  ;;  %v6908_v43 = vld [vmem:[#allocation15 + $0x384] sm:$0xf]  ;;  %v5860_v56 = vor.u32 %v6883_v54, %v5859_v23  ;;  %v6867_v23 = vld [vmem:[#allocation15 + $0x234] sm:$0xf0]  ;;  %v6797_v54 = vld [vmem:[#allocation15 + $0xc] sm:$0xf] }
 0x1e3   :  { %v6896_v18 = vld [vmem:[#allocation15 + $0x324] sm:$0xf] }
 0x1e4   :  { %3262 = vmatpush.bf16.msra.mxu3 %v5916_v31 }
 0x1e5   :  { %3301 = vmatpush.bf16.msrb.mxu2 %v5792_v34  ;;  %v6809_v34 = vld [vmem:[#allocation15 + $0x6c] sm:$0xf] }
 0x1e6   :  { %3328 = vmatpush.bf16.msra.mxu0 %v5524_v55  ;;  %3337 = vmatpush.bf16.msra.mxu1 %v5716_v39  ;;  %v2120_v30 = vpop.f32.mrf.mxu1  ;;  %v7700_v31 = vpop.f32.mrf.mxu0  ;;  %v5968_v55 = vor.u32 %v6908_v43, %v5965_v48  ;;  %v5652_v39 = vor.u32 %v6831_v58, %v5651_v57  ;;  %v5920_v43 = vor.u32 %v6896_v18, %v5917_v20  ;;  %v5901_v48 = vld [vmem:[#allocation15 + $0x310] sm:$0xf0]  ;;  %v5779_v57 = vld [vmem:[#allocation15 + $0x208] sm:$0xf]  ;;  %v6877_v18 = vld [vmem:[#allocation15 + $0x28c] sm:$0xf] }
 0x1e7   :  { %v7702_v35 = vadd.f32 %v2120_v30, %v2108_v26  ;;  %v5845_v20 = vld [vmem:[#allocation15 + $0x298] sm:$0xf0] }
 0x1e8   :  { %3263 = vmatpush.bf16.msra.mxu3 %v5900_v44  ;;  %v6805_v44 = vld [vmem:[#allocation15 + $0x4c] sm:$0xf] }
 0x1e9   :  { %3302 = vmatpush.bf16.msrb.mxu2 %v5776_v50  ;;  %3329 = vmatmul.bf16.vlgmr.msra.gmra.mxu0 %v7648_v62  ;;  %v5749_v50 = vld [vmem:[#allocation15 + $0x1d8] sm:$0xf0]  ;;  %v5560_v63 = vor.u32 %v6805_v44, %v5557_v45  ;;  %v6837_v44 = vld [vmem:[#allocation15 + $0x14c] sm:$0xf] }
 0x1ea   :  { %3373 = vmatpush.bf16.msrb.mxu0 %v5640_v2  ;;  %3338 = vmatpush.bf16.msra.mxu1 %v5700_v52  ;;  %v5576_v2 = vor.u32 %v6809_v34, %v5573_v36  ;;  %v5828_v52 = vor.u32 %v6875_v42, %v5827_v16  ;;  %v5752_v19 = vor.u32 %v6853_v47, %v5749_v50  ;;  %v6019_v34 = vld [vmem:[#allocation15 + $0x3e8] sm:$0xf]  ;;  %v6923_v36 = vld [vmem:[#allocation15 + $0x3f4] sm:$0xf0]  ;;  %v5685_v45 = vld [vmem:[#allocation15 + $0x158] sm:$0xf0] }
 0x1eb   :  { %3264 = vmatmul.bf16.vlgmr.msra.gmra.mxu3 %v7693_v4  ;;  %v6919_v16 = vld [vmem:[#allocation15 + $0x3d4] sm:$0xf0]  ;;  %v6885_v47 = vld [vmem:[#allocation15 + $0x2cc] sm:$0xf]  ;;  %v5877_v50 = vld [vmem:[#allocation15 + $0x2d8] sm:$0xf0] }
 0x1ec   :  { %3308 = vmatpush.bf16.msrb.mxu3 %v6016_v51  ;;  %3303 = vmatmul.bf16.vlgmr.msrb.gmra.mxu2 %v7666_v15  ;;  %v5952_v51 = vor.u32 %v6904_v40, %v5949_v49  ;;  %v5780_v40 = vor.u32 %v6863_v28, %v5779_v57  ;;  %v6020_v49 = vor.u32 %v6923_v36, %v6019_v34  ;;  %v5923_v28 = vld [vmem:[#allocation15 + $0x328] sm:$0xf]  ;;  %v6899_v34 = vld [vmem:[#allocation15 + $0x334] sm:$0xf0] }
 0x1ed   :  { %3347 = vmatpush.bf16.msra.mxu2 %v5892_v59  ;;  %v6900_v59 = vld [vmem:[#allocation15 + $0x344] sm:$0xf] }
 0x1ee   :  { %3374 = vmatpush.bf16.msrb.mxu0 %v5624_v0  ;;  %3339 = vmatpush.bf16.msra.mxu1 %v5684_v11  ;;  %v2122_v61 = vpop.f32.mrf.mxu1  ;;  %v5811_v0 = vld [vmem:[#allocation15 + $0x248] sm:$0xf]  ;;  %v2161_v38 = vpop.f32.mrf.mxu0  ;;  %v5936_v11 = vor.u32 %v6900_v59, %v5933_v53  ;;  %v5688_v53 = vor.u32 %v6837_v44, %v5685_v45  ;;  %v6861_v44 = vld [vmem:[#allocation15 + $0x20c] sm:$0xf]  ;;  %v5781_v45 = vld [vmem:[#allocation15 + $0x218] sm:$0xf0] }
 0x1ef   :  { %v2081_v60 = vpop.f32.mrf.mxu2  ;;  %v5812_v14 = vor.u32 %v6871_v10, %v5811_v0  ;;  %v6915_v61 = vld [vmem:[#allocation15 + $0x3b4] sm:$0xf0]  ;;  %v6833_v0 = vld [vmem:[#allocation15 + $0x12c] sm:$0xf]  ;;  %v5669_v10 = vld [vmem:[#allocation15 + $0x138] sm:$0xf0] }
 0x1f0   :  { %3309 = vmatpush.bf16.msrb.mxu3 %v6000_v46  ;;  %v7705_v1 = vadd.f32 %v2081_v60, %v7691_v9  ;;  %v5733_v46 = vld [vmem:[#allocation15 + $0x1b8] sm:$0xf0]  ;;  %v5795_v9 = vld [vmem:[#allocation15 + $0x228] sm:$0xf] }
 0x1f1   :  { %3348 = vmatpush.bf16.msra.mxu2 %v5876_v13  ;;  %v1400_v13 = vperm.slane %v7681_v41, 2  ;;  %v5736_v22 = vor.u32 %v6849_v6, %v5733_v46  ;;  %v5987_v60 = vld [vmem:[#allocation15 + $0x3a8] sm:$0xf]  ;;  %v5861_v38 = vld [vmem:[#allocation15 + $0x2b8] sm:$0xf0] }
 0x1f2   :  { %3375 = vmatpush.bf16.msrb.mxu0 %v5608_v21  ;;  %3340 = vmatpush.bf16.msra.mxu1 %v5668_v3  ;;  %v5544_v21 = vor.u32 %v6801_v8, %v5541_v5  ;;  %v5796_v3 = vor.u32 %v6867_v23, %v5795_v9  ;;  %v6881_v8 = vld [vmem:[#allocation15 + $0x2ac] sm:$0xf]  ;;  %v5672_v5 = vor.u32 %v6833_v0, %v5669_v10  ;;  %v5971_v6 = vld [vmem:[#allocation15 + $0x388] sm:$0xf]  ;;  %v6911_v46 = vld [vmem:[#allocation15 + $0x394] sm:$0xf0] }
 0x1f3   :  { %v2160_v26 = vadd.f32 %v7700_v31, %v1400_v13  ;;  %v5864_v13 = vor.u32 %v6881_v8, %v5861_v38  ;;  %v5955_v23 = vld [vmem:[#allocation15 + $0x368] sm:$0xf]  ;;  %v6005_v0 = vld [vmem:[#allocation15 + $0x3d8] sm:$0xf0]  ;;  %v7726_v8 = vld [vmem:[#allocation10] sm:$0xf] }
 0x1f4   :  { %3310 = vmatpush.bf16.msrb.mxu3 %v5984_v27  ;;  %v5717_v27 = vld [vmem:[#allocation15 + $0x198] sm:$0xf0]  ;;  %v6107_v38 = vld [vmem:[#allocation16 + $0xa0] sm:$0xf] }
 0x1f5   :  { %3349 = vmatpush.bf16.msra.mxu2 %v5860_v56  ;;  %v6892_v56 = vld [vmem:[#allocation15 + $0x304] sm:$0xf]  ;;  %v5720_v33 = vor.u32 %v6845_v25, %v5717_v27  ;;  %v6873_v25 = vld [vmem:[#allocation15 + $0x26c] sm:$0xf]  ;;  %v5829_v27 = vld [vmem:[#allocation15 + $0x278] sm:$0xf0] }
 0x1f6   :  { %3376 = vmatpush.bf16.msrb.mxu0 %v5592_v32  ;;  %3341 = vmatpush.bf16.msra.mxu1 %v5652_v39  ;;  %v2172_v30 = vpop.f32.mrf.mxu1  ;;  %v5528_v32 = vor.u32 %v6797_v54, %v5525_v24  ;;  %v5904_v31 = vor.u32 %v6892_v56, %v5901_v48  ;;  %v6889_v39 = vld [vmem:[#allocation15 + $0x2ec] sm:$0xf]  ;;  %v6907_v54 = vld [vmem:[#allocation15 + $0x374] sm:$0xf0]  ;;  %v5848_v24 = vor.u32 %v6877_v18, %v5845_v20  ;;  %v5989_v20 = vld [vmem:[#allocation15 + $0x3b8] sm:$0xf0] }
 0x1f7   :  { %v2083_v58 = vpop.f32.mrf.mxu2  ;;  %v7710_v17 = vadd.f32 %v2172_v30, %v2160_v26  ;;  %v5939_v26 = vld [vmem:[#allocation15 + $0x348] sm:$0xf]  ;;  %v5832_v57 = vor.u32 %v6873_v25, %v5829_v27  ;;  %v5813_v30 = vld [vmem:[#allocation15 + $0x258] sm:$0xf0]  ;;  %v6913_v18 = vld [vmem:[#allocation15 + $0x3ac] sm:$0xf] }
 0x1f8   :  { %3311 = vmatpush.bf16.msrb.mxu3 %v5968_v55  ;;  %v5701_v55 = vld [vmem:[#allocation15 + $0x178] sm:$0xf0]  ;;  %v6869_v58 = vld [vmem:[#allocation15 + $0x24c] sm:$0xf]  ;;  %v5992_v27 = vor.u32 %v6913_v18, %v5989_v20  ;;  %v6125_v20 = vld [vmem:[#allocation16 + $0xd0] sm:$0xf0] }
 0x1f9   :  { %3350 = vmatpush.bf16.msra.mxu2 %v5844_v37  ;;  %3342 = vmatmul.bf16.vlgmr.msra.gmra.mxu1 %v7662_v12  ;;  %v5893_v37 = vld [vmem:[#allocation15 + $0x2f8] sm:$0xf0]  ;;  %v5816_v36 = vor.u32 %v6869_v58, %v5813_v30 }
 0x1fa   :  { %3377 = vmatpush.bf16.msrb.mxu0 %v5576_v2  ;;  %3386 = vmatpush.bf16.msrb.mxu1 %v5768_v7  ;;  %v5704_v2 = vor.u32 %v6841_v29, %v5701_v55  ;;  %v6003_v7 = vld [vmem:[#allocation15 + $0x3c8] sm:$0xf]  ;;  %v5896_v42 = vor.u32 %v6889_v39, %v5893_v37  ;;  %v6865_v29 = vld [vmem:[#allocation15 + $0x22c] sm:$0xf]  ;;  %v5797_v55 = vld [vmem:[#allocation15 + $0x238] sm:$0xf0]  ;;  %v5924_v39 = vor.u32 %v6899_v34, %v5923_v28 }
 0x1fb   :  { %v6954_v37 = vld [vmem:[#allocation16 + $0xec] sm:$0xf0]  ;;  %v6905_v34 = vld [vmem:[#allocation15 + $0x36c] sm:$0xf] }
 0x1fc   :  { %3312 = vmatpush.bf16.msrb.mxu3 %v5952_v51  ;;  %v6004_v51 = vor.u32 %v6919_v16, %v6003_v7  ;;  %v5800_v16 = vor.u32 %v6865_v29, %v5797_v55  ;;  %v6901_v55 = vld [vmem:[#allocation15 + $0x34c] sm:$0xf] }
 0x1fd   :  { %3351 = vmatpush.bf16.msra.mxu2 %v5828_v52 }
 0x1fe   :  { %3378 = vmatpush.bf16.msrb.mxu0 %v5560_v63  ;;  %3387 = vmatpush.bf16.msrb.mxu1 %v5752_v19  ;;  %v2174_v59 = vpop.f32.mrf.mxu1  ;;  %v5880_v19 = vor.u32 %v6885_v47, %v5877_v50  ;;  %v6123_v47 = vld [vmem:[#allocation16 + $0xc0] sm:$0xf] }
 0x1ff   :  { %v2133_v52 = vpop.f32.mrf.mxu2 }
 0x200   :  { %3313 = vmatpush.bf16.msrb.mxu3 %v5936_v11  ;;  %v7715_v63 = vadd.f32 %v2133_v52, %v7702_v35  ;;  %v5653_v35 = vld [vmem:[#allocation15 + $0x118] sm:$0xf0]  ;;  %v6950_v52 = vld [vmem:[#allocation16 + $0xcc] sm:$0xf0] }
 0x201   :  { %3352 = vmatpush.bf16.msra.mxu2 %v5812_v14  ;;  %v6829_v14 = vld [vmem:[#allocation15 + $0x10c] sm:$0xf] }
 0x202   :  { %3379 = vmatpush.bf16.msrb.mxu0 %v5544_v21  ;;  %3388 = vmatpush.bf16.msrb.mxu1 %v5736_v22  ;;  %v5972_v21 = vor.u32 %v6911_v46, %v5971_v6  ;;  %v5656_v9 = vor.u32 %v6829_v14, %v5653_v35  ;;  %v6091_v6 = vld [vmem:[#allocation16 + $0x80] sm:$0xf]  ;;  %v6942_v46 = vld [vmem:[#allocation16 + $0x8c] sm:$0xf0]  ;;  %v2260_v14 = vperm.slane %v7726_v8, 0 }
 0x204   :  { %3314 = vmatpush.bf16.msrb.mxu3 %v5920_v43  ;;  %v5956_v43 = vor.u32 %v6907_v54, %v5955_v23  ;;  %v6075_v54 = vld [vmem:[#allocation16 + $0x60] sm:$0xf] }
 0x205   :  { %3353 = vmatpush.bf16.msra.mxu2 %v5796_v3  ;;  %v6903_v3 = vld [vmem:[#allocation15 + $0x354] sm:$0xf0] }
 0x206   :  { %3380 = vmatpush.bf16.msrb.mxu0 %v5528_v32  ;;  %3389 = vmatpush.bf16.msrb.mxu1 %v5720_v33  ;;  %v7718_v11 = vpop.f32.mrf.mxu0  ;;  %v5940_v32 = vor.u32 %v6903_v3, %v5939_v26  ;;  %v5973_v26 = vld [vmem:[#allocation15 + $0x398] sm:$0xf0] }
 0x207   :  { %v2135_v22 = vpop.f32.mrf.mxu2 }
 0x208   :  { %3315 = vmatpush.bf16.msrb.mxu3 %v5904_v31  ;;  %v6139_v31 = vld [vmem:[#allocation16 + $0xe0] sm:$0xf]  ;;  %v2261_v22 = vperm.slane %v7726_v8, 1 }
 0x209   :  { %3354 = vmatpush.bf16.msra.mxu2 %v5780_v40  ;;  %3381 = vmatmul.bf16.vlgmr.msrb.gmra.mxu0 %v7648_v62  ;;  %v5988_v62 = vor.u32 %v6915_v61, %v5987_v60  ;;  %v5907_v40 = vld [vmem:[#allocation15 + $0x308] sm:$0xf]  ;;  %v6124_v60 = vor.u32 %v6950_v52, %v6123_v47  ;;  %v5784_v61 = vor.u32 %v6861_v44, %v5781_v45  ;;  %v2262_v45 = vperm.slane %v7726_v8, 2  ;;  %v6926_v52 = vld [vmem:[#allocation16 + $0xc] sm:$0xf0] }
 0x20a   :  { %3390 = vmatpush.bf16.msrb.mxu1 %v5704_v2  ;;  %v6140_v2 = vor.u32 %v6954_v37, %v6139_v31  ;;  %v5941_v31 = vld [vmem:[#allocation15 + $0x358] sm:$0xf0]  ;;  %v6930_v37 = vld [vmem:[#allocation16 + $0x2c] sm:$0xf0] }
 0x20b   :  { %3316 = vmatmul.bf16.vlgmr.msrb.gmra.mxu3 %v7693_v4 }
 0x20c   :  { %3360 = vmatpush.bf16.msra.mxu3 %v6020_v49  ;;  %3355 = vmatmul.bf16.vlgmr.msra.gmra.mxu2 %v7666_v15  ;;  %v6895_v49 = vld [vmem:[#allocation15 + $0x314] sm:$0xf0] }
 0x20d   :  { %3399 = vmatpush.bf16.msrb.mxu2 %v5896_v42  ;;  %v6021_v42 = vld [vmem:[#allocation15 + $0x3f8] sm:$0xf0]  ;;  %4211 = vmatpush.bf16.msra.mxu0 %v6140_v2  ;;  %v5944_v2 = vor.u32 %v6901_v55, %v5941_v31  ;;  %v6187_v55 = vld [vmem:[#allocation16 + $0x140] sm:$0xf]  ;;  %v6966_v31 = vld [vmem:[#allocation16 + $0x14c] sm:$0xf0] }
 0x20e   :  { %3391 = vmatpush.bf16.msrb.mxu1 %v5688_v53  ;;  %v2094_v56 = vpop.f32.mrf.mxu3  ;;  %v2213_v48 = vpop.f32.mrf.mxu0 }
 0x20f   :  { %v7721_v33 = vpop.f32.mrf.mxu2  ;;  %v2095_v10 = vadd.f32 %v2094_v56, %v7705_v1  ;;  %v6059_v48 = vld [vmem:[#allocation16 + $0x40] sm:$0xf] }
 0x210   :  { %3361 = vmatpush.bf16.msra.mxu3 %v6004_v51  ;;  %v5908_v51 = vor.u32 %v6895_v49, %v5907_v40  ;;  %v2186_v49 = vadd.f32 %v7721_v33, %v7710_v17 }
 0x211   :  { %3400 = vmatpush.bf16.msrb.mxu2 %v5880_v19  ;;  %v6917_v19 = vld [vmem:[#allocation15 + $0x3cc] sm:$0xf]  ;;  %4212 = vmatpush.bf16.msra.mxu0 %v6124_v60  ;;  %v6986_v60 = vld [vmem:[#allocation16 + $0x1ec] sm:$0xf0] }
 0x212   :  { %3392 = vmatpush.bf16.msrb.mxu1 %v5672_v5 }
 0x214   :  { %3362 = vmatpush.bf16.msra.mxu3 %v5988_v62  ;;  %v6946_v62 = vld [vmem:[#allocation16 + $0xac] sm:$0xf0] }
 0x215   :  { %3401 = vmatpush.bf16.msrb.mxu2 %v5864_v13  ;;  %v6108_v5 = vor.u32 %v6946_v62, %v6107_v38  ;;  %v6008_v13 = vor.u32 %v6917_v19, %v6005_v0  ;;  %v6141_v0 = vld [vmem:[#allocation16 + $0xf0] sm:$0xf0]  ;;  %v5909_v38 = vld [vmem:[#allocation15 + $0x318] sm:$0xf0] }
 0x216   :  { %3393 = vmatpush.bf16.msrb.mxu1 %v5656_v9  ;;  %v2096_v7 = vpop.f32.mrf.mxu3  ;;  %v7723_v50 = vpop.f32.mrf.mxu1  ;;  %v6092_v9 = vor.u32 %v6942_v46, %v6091_v6  ;;  %v6251_v6 = vld [vmem:[#allocation16 + $0x1c0] sm:$0xf]  ;;  %v6982_v46 = vld [vmem:[#allocation16 + $0x1cc] sm:$0xf0] }
 0x217   :  { %v2187_v59 = vpop.f32.mrf.mxu2  ;;  %4213 = vmatpush.bf16.msra.mxu0 %v6108_v5  ;;  %v6252_v18 = vor.u32 %v6982_v46, %v6251_v6  ;;  %v6984_v6 = vld [vmem:[#allocation16 + $0x1e4] sm:$0xf]  ;;  %v6269_v46 = vld [vmem:[#allocation16 + $0x1f0] sm:$0xf0] }
 0x218   :  { %3363 = vmatpush.bf16.msra.mxu3 %v5972_v21  ;;  %v2254_v21 = vmax.f32 %v2095_v10, 0.0  ;;  %v6893_v10 = vld [vmem:[#allocation15 + $0x30c] sm:$0xf] }
 0x219   :  { %3402 = vmatpush.bf16.msrb.mxu2 %v5848_v24  ;;  %3394 = vmatmul.bf16.vlgmr.msrb.gmra.mxu1 %v7662_v12  ;;  %v6921_v12 = vld [vmem:[#allocation15 + $0x3ec] sm:$0xf]  ;;  %v6938_v24 = vld [vmem:[#allocation16 + $0x6c] sm:$0xf0] }
 0x21a   :  { %v6024_v53 = vor.u32 %v6921_v12, %v6021_v42  ;;  %v2268_v3 = vmul.f32 %v2260_v14, %v2254_v21  ;;  %v6897_v12 = vld [vmem:[#allocation15 + $0x32c] sm:$0xf]  ;;  %v5925_v42 = vld [vmem:[#allocation15 + $0x338] sm:$0xf0]  ;;  %v5912_v14 = vor.u32 %v6893_v10, %v5909_v38  ;;  %v6235_v21 = vld [vmem:[#allocation16 + $0x1a0] sm:$0xf] }
 0x21b   :  { %4214 = vmatpush.bf16.msra.mxu0 %v6092_v9  ;;  %v5928_v17 = vor.u32 %v6897_v12, %v5925_v42  ;;  %v6171_v12 = vld [vmem:[#allocation16 + $0x120] sm:$0xf]  ;;  %v6962_v42 = vld [vmem:[#allocation16 + $0x12c] sm:$0xf0] }
 0x21c   :  { %3364 = vmatpush.bf16.msra.mxu3 %v5956_v43  ;;  %v6909_v43 = vld [vmem:[#allocation15 + $0x38c] sm:$0xf]  ;;  %v7018_v10 = vld [vmem:[#allocation16 + $0x2ec] sm:$0xf0] }
 0x21d   :  { %3403 = vmatpush.bf16.msrb.mxu2 %v5832_v57  ;;  %v6934_v57 = vld [vmem:[#allocation16 + $0x4c] sm:$0xf0]  ;;  %v5976_v30 = vor.u32 %v6909_v43, %v5973_v26  ;;  %v6219_v26 = vld [vmem:[#allocation16 + $0x180] sm:$0xf] }
 0x21e   :  { %v2146_v35 = vpop.f32.mrf.mxu3  ;;  %v2226_v23 = vpop.f32.mrf.mxu1 }
 0x21f   :  { %v2147_v1 = vadd.f32 %v2146_v35, %v7715_v63  ;;  %v6076_v63 = vor.u32 %v6938_v24, %v6075_v54  ;;  %v6978_v23 = vld [vmem:[#allocation16 + $0x1ac] sm:$0xf0]  ;;  %v6944_v54 = vld [vmem:[#allocation16 + $0xa4] sm:$0xf]  ;;  %v6109_v24 = vld [vmem:[#allocation16 + $0xb0] sm:$0xf0] }
 0x220   :  { %3365 = vmatpush.bf16.msra.mxu3 %v5940_v32  ;;  %v6112_v43 = vor.u32 %v6944_v54, %v6109_v24 }
 0x221   :  { %3404 = vmatpush.bf16.msrb.mxu2 %v5816_v36  ;;  %v2255_v25 = vmax.f32 %v2147_v1, 0.0  ;;  %v5957_v36 = vld [vmem:[#allocation15 + $0x378] sm:$0xf0]  ;;  %4215 = vmatpush.bf16.msra.mxu0 %v6076_v63  ;;  %v6093_v63 = vld [vmem:[#allocation16 + $0x90] sm:$0xf0] }
 0x222   :  { %v5960_v29 = vor.u32 %v6905_v34, %v5957_v36  ;;  %v6077_v34 = vld [vmem:[#allocation16 + $0x70] sm:$0xf0] }
 0x223   :  { %v2269_v56 = vmul.f32 %v2261_v22, %v2255_v25 }
 0x224   :  { %3366 = vmatpush.bf16.msra.mxu3 %v5924_v39  ;;  %v6043_v39 = vld [vmem:[#allocation16 + $0x20] sm:$0xf] }
 0x225   :  { %3405 = vmatpush.bf16.msrb.mxu2 %v5800_v16  ;;  %v2272_v58 = vadd.f32 %v2269_v56, %v2268_v3  ;;  %v6044_v40 = vor.u32 %v6930_v37, %v6043_v39  ;;  %v6974_v3 = vld [vmem:[#allocation16 + $0x18c] sm:$0xf0]  ;;  %v6940_v56 = vld [vmem:[#allocation16 + $0x84] sm:$0xf]  ;;  %v6061_v37 = vld [vmem:[#allocation16 + $0x50] sm:$0xf0] }
 0x226   :  { %v7733_v32 = vpop.f32.mrf.mxu0  ;;  %v2148_v28 = vpop.f32.mrf.mxu3  ;;  %v6932_v39 = vld [vmem:[#allocation16 + $0x44] sm:$0xf] }
 0x227   :  { %v6936_v28 = vld [vmem:[#allocation16 + $0x64] sm:$0xf] }
 0x228   :  { %3367 = vmatpush.bf16.msra.mxu3 %v5908_v51  ;;  %v6027_v51 = vld [vmem:[#allocation16] sm:$0xf] }
 0x229   :  { %3406 = vmatpush.bf16.msrb.mxu2 %v5784_v61  ;;  %v6028_v59 = vor.u32 %v6926_v52, %v6027_v51  ;;  %v6952_v61 = vld [vmem:[#allocation16 + $0xe4] sm:$0xf]  ;;  %v6045_v51 = vld [vmem:[#allocation16 + $0x30] sm:$0xf0] }
 0x22a   :  { %v6144_v62 = vor.u32 %v6952_v61, %v6141_v0  ;;  %v6155_v61 = vld [vmem:[#allocation16 + $0x100] sm:$0xf] }
 0x22b   :  { %3368 = vmatmul.bf16.vlgmr.msra.gmra.mxu3 %v7693_v4  ;;  %v6395_v0 = vld [vmem:[#allocation16 + $0x2e0] sm:$0xf] }
 0x22c   :  { %3412 = vmatpush.bf16.msrb.mxu3 %v6024_v53  ;;  %3407 = vmatmul.bf16.vlgmr.msrb.gmra.mxu2 %v7666_v15  ;;  %v6060_v15 = vor.u32 %v6934_v57, %v6059_v48  ;;  %v6267_v53 = vld [vmem:[#allocation16 + $0x1e0] sm:$0xf]  ;;  %v6220_v48 = vor.u32 %v6974_v3, %v6219_v26  ;;  %v6096_v57 = vor.u32 %v6940_v56, %v6093_v63  ;;  %v6976_v26 = vld [vmem:[#allocation16 + $0x1a4] sm:$0xf]  ;;  %v6237_v56 = vld [vmem:[#allocation16 + $0x1b0] sm:$0xf0] }
 0x22d   :  { %v6268_v33 = vor.u32 %v6986_v60, %v6267_v53  ;;  %v2263_v53 = vperm.slane %v7726_v8, 3  ;;  %v6272_v8 = vor.u32 %v6984_v6, %v6269_v46  ;;  %v7760_v63 = vld [vmem:[%s7835_s13] sm:$0xf]  ;;  %v6523_v46 = vld [vmem:[#allocation16 + $0x3e0] sm:$0xf] }
 0x22e   :  { %4216 = vmatpush.bf16.msra.mxu0 %v6060_v15  ;;  %v3228_v7 = vpop.f32.mrf.mxu0  ;;  %v2198_v16 = vpop.f32.mrf.mxu3 }
 0x22f   :  { %v2199_v44 = vadd.f32 %v2198_v16, %v2186_v49  ;;  %v7738_v47 = vpop.f32.mrf.mxu2  ;;  %4224 = vmatpush.bf16.msra.mxu1 %v6268_v33  ;;  %v6188_v49 = vor.u32 %v6966_v31, %v6187_v55  ;;  %v6029_v33 = vld [vmem:[#allocation16 + $0x10] sm:$0xf0]  ;;  %v6331_v55 = vld [vmem:[#allocation16 + $0x260] sm:$0xf]  ;;  %v7002_v31 = vld [vmem:[#allocation16 + $0x26c] sm:$0xf0] }
 0x230   :  { %3413 = vmatpush.bf16.msrb.mxu3 %v6008_v13  ;;  %v6948_v13 = vld [vmem:[#allocation16 + $0xc4] sm:$0xf] }
 0x231   :  { %v2256_v19 = vmax.f32 %v2199_v44, 0.0  ;;  %v6128_v9 = vor.u32 %v6948_v13, %v6125_v20  ;;  %v6928_v44 = vld [vmem:[#allocation16 + $0x24] sm:$0xf] }
 0x232   :  { %4217 = vmatpush.bf16.msra.mxu0 %v6044_v40  ;;  %v1401_v40 = vperm.slane %v7681_v41, 3  ;;  %v6048_v41 = vor.u32 %v6928_v44, %v6045_v51  ;;  %v6980_v20 = vld [vmem:[#allocation16 + $0x1c4] sm:$0xf]  ;;  %v6189_v44 = vld [vmem:[#allocation16 + $0x150] sm:$0xf0] }
 0x233   :  { %v2270_v5 = vmul.f32 %v2262_v45, %v2256_v19  ;;  %4225 = vmatpush.bf16.msra.mxu1 %v6252_v18  ;;  %v6172_v45 = vor.u32 %v6962_v42, %v6171_v12  ;;  %v6958_v19 = vld [vmem:[#allocation16 + $0x10c] sm:$0xf0] }
 0x234   :  { %3414 = vmatpush.bf16.msrb.mxu3 %v5992_v27  ;;  %v6236_v27 = vor.u32 %v6978_v23, %v6235_v21  ;;  %v7014_v18 = vld [vmem:[#allocation16 + $0x2cc] sm:$0xf0] }
 0x235   :  { %v7740_v35 = vadd.f32 %v2272_v58, %v2270_v5  ;;  %v6203_v58 = vld [vmem:[#allocation16 + $0x160] sm:$0xf] }
 0x236   :  { %4218 = vmatpush.bf16.msra.mxu0 %v6028_v59  ;;  %v2200_v1 = vpop.f32.mrf.mxu3  ;;  %v7742_v22 = vpop.f32.mrf.mxu1 }
 0x237   :  { %v2239_v25 = vpop.f32.mrf.mxu2  ;;  %4226 = vmatpush.bf16.msra.mxu1 %v6236_v27  ;;  %v6363_v27 = vld [vmem:[#allocation16 + $0x2a0] sm:$0xf] }
 0x238   :  { %3415 = vmatpush.bf16.msrb.mxu3 %v5976_v30  ;;  %v6970_v30 = vld [vmem:[#allocation16 + $0x16c] sm:$0xf0] }
 0x239   :  { %v6204_v15 = vor.u32 %v6970_v30, %v6203_v58  ;;  %v6972_v58 = vld [vmem:[#allocation16 + $0x184] sm:$0xf]  ;;  %v2569_v30 = vperm.slane %v7760_v63, 0 }
 0x23a   :  { %4263 = vmatpush.bf16.msrb.mxu0 %v6144_v62 }
 0x23b   :  { %4227 = vmatpush.bf16.msra.mxu1 %v6220_v48  ;;  %v6347_v48 = vld [vmem:[#allocation16 + $0x280] sm:$0xf] }
 0x23c   :  { %3416 = vmatpush.bf16.msrb.mxu3 %v5960_v29  ;;  %v6080_v29 = vor.u32 %v6936_v28, %v6077_v34  ;;  %v6221_v34 = vld [vmem:[#allocation16 + $0x190] sm:$0xf0] }
 0x23e   :  { %4264 = vmatpush.bf16.msrb.mxu0 %v6128_v9  ;;  %v3241_v36 = vpop.f32.mrf.mxu1  ;;  %v6253_v9 = vld [vmem:[#allocation16 + $0x1d0] sm:$0xf0] }
 0x23f   :  { %4228 = vmatpush.bf16.msra.mxu1 %v6204_v15  ;;  %v6256_v24 = vor.u32 %v6980_v20, %v6253_v9  ;;  %v6224_v36 = vor.u32 %v6972_v58, %v6221_v34  ;;  %v6397_v20 = vld [vmem:[#allocation16 + $0x2f0] sm:$0xf0]  ;;  %v6951_v9 = vld [vmem:[#allocation16 + $0xd4] sm:$0xf0]  ;;  %v7042_v34 = vld [vmem:[#allocation16 + $0x3ac] sm:$0xf0] }
 0x240   :  { %3417 = vmatpush.bf16.msrb.mxu3 %v5944_v2  ;;  %v2212_v2 = vadd.f32 %v7718_v11, %v1401_v40  ;;  %v6205_v40 = vld [vmem:[#allocation16 + $0x170] sm:$0xf0] }
 0x242   :  { %4265 = vmatpush.bf16.msrb.mxu0 %v6112_v43  ;;  %v2225_v16 = vadd.f32 %v7723_v50, %v2212_v2  ;;  %v6924_v50 = vld [vmem:[#allocation16 + $0x4] sm:$0xf]  ;;  %v7010_v43 = vld [vmem:[#allocation16 + $0x2ac] sm:$0xf0] }
 0x243   :  { %4229 = vmatpush.bf16.msra.mxu1 %v6188_v49  ;;  %v6032_v5 = vor.u32 %v6924_v50, %v6029_v33  ;;  %v6364_v3 = vor.u32 %v7010_v43, %v6363_v27  ;;  %v6998_v2 = vld [vmem:[#allocation16 + $0x24c] sm:$0xf0]  ;;  %v6147_v50 = vld [vmem:[#allocation16 + $0xe8] sm:$0xf]  ;;  %v7012_v27 = vld [vmem:[#allocation16 + $0x2c4] sm:$0xf] }
 0x244   :  { %3418 = vmatpush.bf16.msrb.mxu3 %v5928_v17  ;;  %v2238_v52 = vadd.f32 %v7738_v47, %v2225_v16  ;;  %v6156_v17 = vor.u32 %v6958_v19, %v6155_v61  ;;  %v6396_v47 = vor.u32 %v7018_v10, %v6395_v0  ;;  %v6964_v16 = vld [vmem:[#allocation16 + $0x144] sm:$0xf]  ;;  %v6283_v0 = vld [vmem:[#allocation16 + $0x200] sm:$0xf]  ;;  %v6990_v10 = vld [vmem:[#allocation16 + $0x20c] sm:$0xf0] }
 0x246   :  { %4266 = vmatpush.bf16.msrb.mxu0 %v6096_v57  ;;  %v7747_v7 = vpop.f32.mrf.mxu0  ;;  %4237 = vmatpush.bf16.msra.mxu2 %v6396_v47  ;;  %v7006_v57 = vld [vmem:[#allocation16 + $0x28c] sm:$0xf0] }
 0x247   :  { %4230 = vmatpush.bf16.msra.mxu1 %v6172_v45  ;;  %v6348_v28 = vor.u32 %v7006_v57, %v6347_v48  ;;  %v6192_v45 = vor.u32 %v6964_v16, %v6189_v44  ;;  %v6115_v48 = vld [vmem:[#allocation16 + $0xa8] sm:$0xf]  ;;  %v6947_v57 = vld [vmem:[#allocation16 + $0xb4] sm:$0xf0]  ;;  %v6349_v16 = vld [vmem:[#allocation16 + $0x290] sm:$0xf0] }
 0x248   :  { %3419 = vmatpush.bf16.msrb.mxu3 %v5912_v14  ;;  %v6379_v14 = vld [vmem:[#allocation16 + $0x2c0] sm:$0xf] }
 0x249   :  { %v6380_v1 = vor.u32 %v7014_v18, %v6379_v14  ;;  %v7016_v18 = vld [vmem:[#allocation16 + $0x2e4] sm:$0xf] }
 0x24a   :  { %4267 = vmatpush.bf16.msrb.mxu0 %v6080_v29  ;;  %v3227_v29 = vadd.f32 %v7733_v32, %v2569_v30 }
 0x24b   :  { %3420 = vmatmul.bf16.vlgmr.msrb.gmra.mxu3 %v7693_v4  ;;  %v6064_v4 = vor.u32 %v6932_v39, %v6061_v37  ;;  %4231 = vmatpush.bf16.msra.mxu1 %v6156_v17  ;;  %v6968_v39 = vld [vmem:[#allocation16 + $0x164] sm:$0xf]  ;;  %v6332_v37 = vor.u32 %v7002_v31, %v6331_v55  ;;  %v6955_v17 = vld [vmem:[#allocation16 + $0xf4] sm:$0xf0]  ;;  %v6116_v31 = vor.u32 %v6947_v57, %v6115_v48  ;;  %v6149_v48 = vld [vmem:[#allocation16 + $0xf8] sm:$0xf0] }
 0x24c   :  { %4238 = vmatpush.bf16.msra.mxu2 %v6380_v1  ;;  %v6208_v49 = vor.u32 %v6968_v39, %v6205_v40  ;;  %v3240_v12 = vadd.f32 %v7742_v22, %v3227_v29  ;;  %v6131_v1 = vld [vmem:[#allocation16 + $0xc8] sm:$0xf]  ;;  %v6365_v29 = vld [vmem:[#allocation16 + $0x2b0] sm:$0xf0]  ;;  %v6475_v40 = vld [vmem:[#allocation16 + $0x380] sm:$0xf] }
 0x24d   :  { %v6099_v39 = vld [vmem:[#allocation16 + $0x88] sm:$0xf] }
 0x24e   :  { %4268 = vmatpush.bf16.msrb.mxu0 %v6064_v4  ;;  %v2250_v59 = vpop.f32.mrf.mxu3  ;;  %v3280_v62 = vpop.f32.mrf.mxu0  ;;  %v6315_v4 = vld [vmem:[#allocation16 + $0x240] sm:$0xf] }
 0x24f   :  { %v2251_v60 = vadd.f32 %v2250_v59, %v2238_v52  ;;  %v7752_v11 = vpop.f32.mrf.mxu2  ;;  %4276 = vmatpush.bf16.msrb.mxu1 %v6272_v8  ;;  %v6316_v42 = vor.u32 %v6998_v2, %v6315_v4  ;;  %v6299_v52 = vld [vmem:[#allocation16 + $0x220] sm:$0xf]  ;;  %v6960_v59 = vld [vmem:[#allocation16 + $0x124] sm:$0xf]  ;;  %v6284_v62 = vor.u32 %v6990_v10, %v6283_v0  ;;  %v7050_v8 = vld [vmem:[#allocation16 + $0x3ec] sm:$0xf0] }
 0x250   :  { %4239 = vmatpush.bf16.msra.mxu2 %v6364_v3  ;;  %v3253_v32 = vadd.f32 %v7752_v11, %v3240_v12  ;;  %v6157_v11 = vld [vmem:[#allocation16 + $0x110] sm:$0xf0]  ;;  %v6524_v14 = vor.u32 %v7050_v8, %v6523_v46  ;;  %v7004_v4 = vld [vmem:[#allocation16 + $0x284] sm:$0xf]  ;;  %v6935_v0 = vld [vmem:[#allocation16 + $0x54] sm:$0xf0] }
 0x251   :  { %v2257_v38 = vmax.f32 %v2251_v60, 0.0  ;;  %v6173_v60 = vld [vmem:[#allocation16 + $0x130] sm:$0xf0]  ;;  %v6352_v12 = vor.u32 %v7004_v4, %v6349_v16  ;;  %v6443_v10 = vld [vmem:[#allocation16 + $0x340] sm:$0xf] }
 0x252   :  { %4269 = vmatpush.bf16.msrb.mxu0 %v6048_v41  ;;  %v6994_v41 = vld [vmem:[#allocation16 + $0x22c] sm:$0xf0]  ;;  %v6176_v61 = vor.u32 %v6960_v59, %v6173_v60  ;;  %4250 = vmatpush.bf16.msra.mxu3 %v6524_v14  ;;  %v7000_v60 = vld [vmem:[#allocation16 + $0x264] sm:$0xf]  ;;  %v6051_v8 = vld [vmem:[#allocation16 + $0x28] sm:$0xf] }
 0x253   :  { %v2271_v13 = vmul.f32 %v2263_v53, %v2257_v38  ;;  %4277 = vmatpush.bf16.msrb.mxu1 %v6256_v24  ;;  %v6300_v53 = vor.u32 %v6994_v41, %v6299_v52  ;;  %v6956_v38 = vld [vmem:[#allocation16 + $0x104] sm:$0xf]  ;;  %v6507_v24 = vld [vmem:[#allocation16 + $0x3c0] sm:$0xf]  ;;  %v6939_v52 = vld [vmem:[#allocation16 + $0x74] sm:$0xf0] }
 0x254   :  { %4240 = vmatpush.bf16.msra.mxu2 %v6348_v28  ;;  %v6160_v6 = vor.u32 %v6956_v38, %v6157_v11  ;;  %v6491_v28 = vld [vmem:[#allocation16 + $0x3a0] sm:$0xf]  ;;  %v7034_v59 = vld [vmem:[#allocation16 + $0x36c] sm:$0xf0]  ;;  %v6525_v4 = vld [vmem:[#allocation16 + $0x3f0] sm:$0xf0] }
 0x255   :  { %v2274_v21 = vadd.f32 %v7740_v35, %v2271_v13  ;;  %v6240_v35 = vor.u32 %v6976_v26, %v6237_v56  ;;  %v6148_v13 = vor.u32 %v6955_v17, %v6147_v50  ;;  %v6381_v26 = vld [vmem:[#allocation16 + $0x2d0] sm:$0xf0]  ;;  %v6132_v56 = vor.u32 %v6951_v9, %v6131_v1  ;;  %v6459_v41 = vld [vmem:[#allocation16 + $0x360] sm:$0xf]  ;;  %v7030_v38 = vld [vmem:[#allocation16 + $0x34c] sm:$0xf0] }
 0x256   :  { %4270 = vmatpush.bf16.msrb.mxu0 %v6032_v5  ;;  %v2252_v23 = vpop.f32.mrf.mxu3  ;;  %v7755_v54 = vpop.f32.mrf.mxu1  ;;  %v6384_v58 = vor.u32 %v7012_v27, %v6381_v26  ;;  %v6427_v14 = vld [vmem:[#allocation16 + $0x320] sm:$0xf]  ;;  %v6301_v9 = vld [vmem:[#allocation16 + $0x230] sm:$0xf0]  ;;  %v6927_v27 = vld [vmem:[#allocation16 + $0x14] sm:$0xf0] }
 0x257   :  { %2275 = vadd.xlane.f32.xlu0 %v2274_v21  ;;  %v3254_v25 = vpop.f32.mrf.mxu2  ;;  %4278 = vmatpush.bf16.msrb.mxu1 %v6240_v35  ;;  %v6400_v23 = vor.u32 %v7016_v18, %v6397_v20  ;;  %v7026_v18 = vld [vmem:[#allocation16 + $0x32c] sm:$0xf0]  ;;  %v6992_v20 = vld [vmem:[#allocation16 + $0x224] sm:$0xf]  ;;  %v6983_v16 = vld [vmem:[#allocation16 + $0x1d4] sm:$0xf0] }
 0x258   :  { %4241 = vmatpush.bf16.msra.mxu2 %v6332_v37  ;;  %v7046_v25 = vld [vmem:[#allocation16 + $0x3cc] sm:$0xf0]  ;;  %v6943_v37 = vld [vmem:[#allocation16 + $0x94] sm:$0xf0]  ;;  %v6428_v1 = vor.u32 %v7026_v18, %v6427_v14  ;;  %v6304_v26 = vor.u32 %v6992_v20, %v6301_v9 }
 0x259   :  { %v6508_v43 = vor.u32 %v7046_v25, %v6507_v24  ;;  %v6035_v25 = vld [vmem:[#allocation16 + $0x8] sm:$0xf]  ;;  %v6971_v9 = vld [vmem:[#allocation16 + $0x174] sm:$0xf0] }
 0x25b   :  { %4279 = vmatpush.bf16.msrb.mxu1 %v6224_v36  ;;  %v7008_v36 = vld [vmem:[#allocation16 + $0x2a4] sm:$0xf]  ;;  %4251 = vmatpush.bf16.msra.mxu3 %v6508_v43  ;;  %v6275_v43 = vld [vmem:[#allocation16 + $0x1e8] sm:$0xf] }
 0x25c   :  { %4242 = vmatpush.bf16.msra.mxu2 %v6316_v42  ;;  %v6368_v55 = vor.u32 %v7008_v36, %v6365_v29  ;;  %v2570_v42 = vperm.slane %v7760_v63, 1  ;;  %v6988_v36 = vld [vmem:[#allocation16 + $0x204] sm:$0xf] }
 0x25e   :  { %v3293_v15 = vpop.f32.mrf.mxu1  ;;  %v3279_v50 = vadd.f32 %v7747_v7, %v2570_v42  ;;  %v6133_v42 = vld [vmem:[#allocation16 + $0xd8] sm:$0xf0] }
 0x25f   :  { %4280 = vmatpush.bf16.msrb.mxu1 %v6208_v49  ;;  %v6492_v15 = vor.u32 %v7042_v34, %v6491_v28  ;;  %v7038_v49 = vld [vmem:[#allocation16 + $0x38c] sm:$0xf0]  ;;  %v6411_v28 = vld [vmem:[#allocation16 + $0x300] sm:$0xf] }
 0x260   :  { %4243 = vmatpush.bf16.msra.mxu2 %v6300_v53  ;;  %v6476_v2 = vor.u32 %v7038_v49, %v6475_v40  ;;  %v6460_v53 = vor.u32 %v7034_v59, %v6459_v41  ;;  %v3292_v46 = vadd.f32 %v7755_v54, %v3279_v50  ;;  %v7022_v34 = vld [vmem:[#allocation16 + $0x30c] sm:$0xf0]  ;;  %v6259_v40 = vld [vmem:[#allocation16 + $0x1c8] sm:$0xf]  ;;  %v7048_v49 = vld [vmem:[#allocation16 + $0x3e4] sm:$0xf] }
 0x261   :  { %4252 = vmatpush.bf16.msra.mxu3 %v6492_v15  ;;  %v6285_v15 = vld [vmem:[#allocation16 + $0x210] sm:$0xf0]  ;;  %v6260_v59 = vor.u32 %v6983_v16, %v6259_v40  ;;  %v6945_v50 = vld [vmem:[#allocation16 + $0xac] sm:$0xf] }
 0x262   :  { %v6429_v16 = vld [vmem:[#allocation16 + $0x330] sm:$0xf0] }
 0x263   :  { %4281 = vmatpush.bf16.msrb.mxu1 %v6192_v45  ;;  %v6100_v45 = vor.u32 %v6943_v37, %v6099_v39 }
 0x264   :  { %4244 = vmatpush.bf16.msra.mxu2 %v6284_v62  ;;  %v6996_v62 = vld [vmem:[#allocation16 + $0x244] sm:$0xf] }
 0x265   :  { %4253 = vmatpush.bf16.msra.mxu3 %v6476_v2 }
 0x266   :  { %v7765_v51 = vpop.f32.mrf.mxu0 }
 0x267   :  { %4282 = vmatpush.bf16.msrb.mxu1 %v6176_v61  ;;  %v6333_v61 = vld [vmem:[#allocation16 + $0x270] sm:$0xf0] }
 0x268   :  { %4289 = vmatpush.bf16.msrb.mxu2 %v6400_v23 }
 0x269   :  { %4254 = vmatpush.bf16.msra.mxu3 %v6460_v53 }
 0x26b   :  { %4283 = vmatpush.bf16.msrb.mxu1 %v6160_v6 }
 0x26c   :  { %4290 = vmatpush.bf16.msrb.mxu2 %v6384_v58 }
 0x26e   :  { %v3265_v19 = vpop.f32.mrf.mxu3  ;;  %v3332_v47 = vpop.f32.mrf.mxu0 }
 0x26f   :  { %v3266_v22 = vadd.f32 %v3265_v19, %v3253_v32  ;;  %v7768_v33 = vpop.f32.mrf.mxu2  ;;  %v6083_v32 = vld [vmem:[#allocation16 + $0x68] sm:$0xf]  ;;  %v6336_v19 = vor.u32 %v7000_v60, %v6333_v61  ;;  %v6317_v47 = vld [vmem:[#allocation16 + $0x250] sm:$0xf0] }
 0x270   :  { %4291 = vmatpush.bf16.msrb.mxu2 %v6368_v55  ;;  %v6084_v17 = vor.u32 %v6939_v52, %v6083_v32  ;;  %v6320_v6 = vor.u32 %v6996_v62, %v6317_v47  ;;  %v3305_v23 = vadd.f32 %v7768_v33, %v3292_v46  ;;  %v6412_v33 = vor.u32 %v7022_v34, %v6411_v28  ;;  %v6509_v32 = vld [vmem:[#allocation16 + $0x3d0] sm:$0xf0]  ;;  %v6243_v60 = vld [vmem:[#allocation16 + $0x1a8] sm:$0xf]  ;;  %v6975_v47 = vld [vmem:[#allocation16 + $0x194] sm:$0xf0] }
 0x271   :  { %v3425_v5 = vmax.f32 %v3266_v22, 0.0  ;;  %v6067_v22 = vld [vmem:[#allocation16 + $0x48] sm:$0xf]  ;;  %v6036_v55 = vor.u32 %v6927_v27, %v6035_v25  ;;  %v6101_v46 = vld [vmem:[#allocation16 + $0x98] sm:$0xf0]  ;;  %v2571_v27 = vperm.slane %v7760_v63, 2 }
 0x272   :  { %v6068_v7 = vor.u32 %v6935_v0, %v6067_v22  ;;  %v7040_v0 = vld [vmem:[#allocation16 + $0x3a4] sm:$0xf] }
 0x273   :  { %v7770_v21 = vpack.c.bf16 %v3425_v5, %v3425_v5  ;;  %v6444_v5 = vor.u32 %v7030_v38, %v6443_v10  ;;  %v6493_v10 = vld [vmem:[#allocation16 + $0x3b0] sm:$0xf0]  ;;  %v3331_v34 = vadd.f32 %v7765_v51, %v2571_v27 }
 0x274   :  { %4292 = vmatpush.bf16.msrb.mxu2 %v6352_v12  ;;  %v6949_v12 = vld [vmem:[#allocation16 + $0xcc] sm:$0xf] }
 0x275   :  { %4219 = vmatmul.bf16.vlgmr.msra.gmra.mxu0 %v7770_v21  ;;  %4255 = vmatpush.bf16.msra.mxu3 %v6444_v5  ;;  %v6136_v53 = vor.u32 %v6949_v12, %v6133_v42  ;;  %v6227_v5 = vld [vmem:[#allocation16 + $0x188] sm:$0xf] }
 0x276   :  { %4315 = vmatpush.bf16.msra.mxu0 %v6148_v13  ;;  %v7773_v3 = vpop.f32.mrf.mxu1  ;;  %v3267_v35 = vpop.f32.mrf.mxu3  ;;  %v6931_v13 = vld [vmem:[#allocation16 + $0x34] sm:$0xf0]  ;;  %v6228_v18 = vor.u32 %v6975_v47, %v6227_v5 }
 0x277   :  { %v3306_v30 = vpop.f32.mrf.mxu2  ;;  %v6052_v24 = vor.u32 %v6931_v13, %v6051_v8  ;;  %v6953_v35 = vld [vmem:[#allocation16 + $0xec] sm:$0xf]  ;;  %v7036_v8 = vld [vmem:[#allocation16 + $0x384] sm:$0xf]  ;;  %v6477_v13 = vld [vmem:[#allocation16 + $0x390] sm:$0xf0] }
 0x278   :  { %4293 = vmatpush.bf16.msrb.mxu2 %v6336_v19  ;;  %v6152_v37 = vor.u32 %v6953_v35, %v6149_v48  ;;  %v6979_v19 = vld [vmem:[#allocation16 + $0x1b4] sm:$0xf0]  ;;  %v6480_v25 = vor.u32 %v7036_v8, %v6477_v13  ;;  %v6195_v35 = vld [vmem:[#allocation16 + $0x148] sm:$0xf] }
 0x279   :  { %4256 = vmatpush.bf16.msra.mxu3 %v6428_v1  ;;  %v6244_v38 = vor.u32 %v6979_v19, %v6243_v60  ;;  %v6211_v1 = vld [vmem:[#allocation16 + $0x168] sm:$0xf]  ;;  %v6967_v48 = vld [vmem:[#allocation16 + $0x154] sm:$0xf0]  ;;  %v6985_v19 = vld [vmem:[#allocation16 + $0x1ec] sm:$0xf] }
 0x27a   :  { %4316 = vmatpush.bf16.msra.mxu0 %v6132_v56  ;;  %v6987_v56 = vld [vmem:[#allocation16 + $0x1f4] sm:$0xf0]  ;;  %v6387_v8 = vld [vmem:[#allocation16 + $0x2c8] sm:$0xf] }
 0x27b   :  { %v6276_v39 = vor.u32 %v6987_v56, %v6275_v43  ;;  %v7032_v43 = vld [vmem:[#allocation16 + $0x364] sm:$0xf]  ;;  %v7015_v13 = vld [vmem:[#allocation16 + $0x2d4] sm:$0xf0] }
 0x27c   :  { %4294 = vmatpush.bf16.msrb.mxu2 %v6320_v6  ;;  %v6941_v6 = vld [vmem:[#allocation16 + $0x8c] sm:$0xf] }
 0x27d   :  { %4257 = vmatpush.bf16.msra.mxu3 %v6412_v33  ;;  %v6104_v20 = vor.u32 %v6941_v6, %v6101_v46  ;;  %v6445_v33 = vld [vmem:[#allocation16 + $0x350] sm:$0xf0]  ;;  %v6981_v6 = vld [vmem:[#allocation16 + $0x1cc] sm:$0xf]  ;;  %v6261_v46 = vld [vmem:[#allocation16 + $0x1d8] sm:$0xf0] }
 0x27e   :  { %4317 = vmatpush.bf16.msra.mxu0 %v6116_v31  ;;  %v3345_v44 = vpop.f32.mrf.mxu1  ;;  %v6288_v31 = vor.u32 %v6988_v36, %v6285_v15  ;;  %v7028_v36 = vld [vmem:[#allocation16 + $0x344] sm:$0xf]  ;;  %v6196_v15 = vor.u32 %v6967_v48, %v6195_v35  ;;  %v7007_v35 = vld [vmem:[#allocation16 + $0x294] sm:$0xf0] }
 0x27f   :  { %v6528_v44 = vor.u32 %v7048_v49, %v6525_v4  ;;  %v6448_v40 = vor.u32 %v7028_v36, %v6445_v33  ;;  %v3344_v49 = vadd.f32 %v7773_v3, %v3331_v34  ;;  %v7024_v4 = vld [vmem:[#allocation16 + $0x324] sm:$0xf]  ;;  %v6339_v34 = vld [vmem:[#allocation16 + $0x268] sm:$0xf]  ;;  %v2572_v36 = vperm.slane %v7760_v63, 3 }
 0x280   :  { %4295 = vmatpush.bf16.msrb.mxu2 %v6304_v26  ;;  %v6461_v26 = vld [vmem:[#allocation16 + $0x370] sm:$0xf0] }
 0x281   :  { %4302 = vmatpush.bf16.msrb.mxu3 %v6528_v44  ;;  %v6464_v28 = vor.u32 %v7032_v43, %v6461_v26  ;;  %v6163_v44 = vld [vmem:[#allocation16 + $0x108] sm:$0xf]  ;;  %v6973_v26 = vld [vmem:[#allocation16 + $0x18c] sm:$0xf] }
 0x282   :  { %4318 = vmatpush.bf16.msra.mxu0 %v6100_v45  ;;  %v7044_v45 = vld [vmem:[#allocation16 + $0x3c4] sm:$0xf] }
 0x283   :  { %v6512_v22 = vor.u32 %v7044_v45, %v6509_v32  ;;  %v6959_v32 = vld [vmem:[#allocation16 + $0x114] sm:$0xf0] }
 0x284   :  { %4296 = vmatpush.bf16.msrb.mxu2 %v6288_v31  ;;  %v6963_v31 = vld [vmem:[#allocation16 + $0x134] sm:$0xf0] }
 0x285   :  { %4271 = vmatmul.bf16.vlgmr.msrb.gmra.mxu0 %v7770_v21  ;;  %4303 = vmatpush.bf16.msrb.mxu3 %v6512_v22  ;;  %v7020_v22 = vld [vmem:[#allocation16 + $0x304] sm:$0xf] }
 0x286   :  { %v7777_v11 = vpop.f32.mrf.mxu0  ;;  %4319 = vmatpush.bf16.msra.mxu0 %v6084_v17  ;;  %v6117_v17 = vld [vmem:[#allocation16 + $0xb8] sm:$0xf0] }
 0x287   :  { %v6120_v62 = vor.u32 %v6945_v50, %v6117_v17  ;;  %v6277_v50 = vld [vmem:[#allocation16 + $0x1f8] sm:$0xf0]  ;;  %v7019_v17 = vld [vmem:[#allocation16 + $0x2f4] sm:$0xf0] }
 0x28a   :  { %4320 = vmatpush.bf16.msra.mxu0 %v6068_v7  ;;  %v6496_v7 = vor.u32 %v7040_v0, %v6493_v10  ;;  %v6164_v10 = vor.u32 %v6959_v32, %v6163_v44 }
 0x28c   :  { %4304 = vmatpush.bf16.msrb.mxu3 %v6496_v7 }
 0x28e   :  { %v3317_v54 = vpop.f32.mrf.mxu3  ;;  %v3384_v58 = vpop.f32.mrf.mxu0  ;;  %4321 = vmatpush.bf16.msra.mxu0 %v6052_v24  ;;  %v6085_v24 = vld [vmem:[#allocation16 + $0x78] sm:$0xf0] }
 0x28f   :  { %v3318_v57 = vadd.f32 %v3317_v54, %v3305_v23  ;;  %v7782_v30 = vpop.f32.mrf.mxu2  ;;  %v6937_v23 = vld [vmem:[#allocation16 + $0x6c] sm:$0xf]  ;;  %v6212_v54 = vor.u32 %v6971_v9, %v6211_v1  ;;  %v6069_v58 = vld [vmem:[#allocation16 + $0x58] sm:$0xf0] }
 0x290   :  { %v6088_v56 = vor.u32 %v6937_v23, %v6085_v24  ;;  %4305 = vmatpush.bf16.msrb.mxu3 %v6480_v25  ;;  %v3357_v51 = vadd.f32 %v7782_v30, %v3344_v49  ;;  %v6413_v30 = vld [vmem:[#allocation16 + $0x310] sm:$0xf0]  ;;  %v6977_v1 = vld [vmem:[#allocation16 + $0x1ac] sm:$0xf]  ;;  %v6245_v9 = vld [vmem:[#allocation16 + $0x1b8] sm:$0xf0] }
 0x291   :  { %v3426_v29 = vmax.f32 %v3318_v57, 0.0  ;;  %v6933_v57 = vld [vmem:[#allocation16 + $0x4c] sm:$0xf]  ;;  %v6416_v7 = vor.u32 %v7020_v22, %v6413_v30  ;;  %v6371_v24 = vld [vmem:[#allocation16 + $0x2a8] sm:$0xf]  ;;  %v6248_v27 = vor.u32 %v6977_v1, %v6245_v9 }
 0x292   :  { %4322 = vmatpush.bf16.msra.mxu0 %v6036_v55  ;;  %v6179_v55 = vld [vmem:[#allocation16 + $0x128] sm:$0xf]  ;;  %v7011_v25 = vld [vmem:[#allocation16 + $0x2b4] sm:$0xf0] }
 0x293   :  { %v7784_v2 = vpack.c.bf16 %v3426_v29, %v3426_v29  ;;  %v6072_v29 = vor.u32 %v6933_v57, %v6069_v58  ;;  %v6180_v12 = vor.u32 %v6963_v31, %v6179_v55  ;;  %v6372_v43 = vor.u32 %v7011_v25, %v6371_v24  ;;  %v6969_v58 = vld [vmem:[#allocation16 + $0x16c] sm:$0xf]  ;;  %v6197_v55 = vld [vmem:[#allocation16 + $0x158] sm:$0xf0]  ;;  %v6323_v31 = vld [vmem:[#allocation16 + $0x248] sm:$0xf] }
 0x294   :  { %4306 = vmatpush.bf16.msrb.mxu3 %v6464_v28  ;;  %v6213_v28 = vld [vmem:[#allocation16 + $0x178] sm:$0xf0]  ;;  %v7039_v24 = vld [vmem:[#allocation16 + $0x394] sm:$0xf0]  ;;  %v7005_v25 = vld [vmem:[#allocation16 + $0x28c] sm:$0xf] }
 0x295   :  { %4232 = vmatmul.bf16.vlgmr.msra.gmra.mxu1 %v7784_v2  ;;  %4323 = vmatmul.bf16.vlgmr.msra.gmra.mxu0 %v7770_v21  ;;  %v6216_v33 = vor.u32 %v6969_v58, %v6213_v28  ;;  %v6451_v58 = vld [vmem:[#allocation16 + $0x348] sm:$0xf]  ;;  %v7031_v28 = vld [vmem:[#allocation16 + $0x354] sm:$0xf0] }
 0x296   :  { %4328 = vmatpush.bf16.msra.mxu1 %v6276_v39  ;;  %4367 = vmatpush.bf16.msrb.mxu0 %v6152_v37  ;;  %v3319_v52 = vpop.f32.mrf.mxu3  ;;  %v7787_v41 = vpop.f32.mrf.mxu1  ;;  %v6929_v39 = vld [vmem:[#allocation16 + $0x2c] sm:$0xf]  ;;  %v6053_v37 = vld [vmem:[#allocation16 + $0x38] sm:$0xf0] }
 0x297   :  { %v3358_v61 = vpop.f32.mrf.mxu2  ;;  %v6056_v42 = vor.u32 %v6929_v39, %v6053_v37  ;;  %v6925_v52 = vld [vmem:[#allocation16 + $0xc] sm:$0xf]  ;;  %v6999_v39 = vld [vmem:[#allocation16 + $0x254] sm:$0xf0]  ;;  %v3383_v37 = vadd.f32 %v7777_v11, %v2572_v36  ;;  %v6291_v11 = vld [vmem:[#allocation16 + $0x208] sm:$0xf]  ;;  %v6452_v36 = vor.u32 %v7031_v28, %v6451_v58 }
 0x298   :  { %4307 = vmatpush.bf16.msrb.mxu3 %v6448_v40  ;;  %v6403_v61 = vld [vmem:[#allocation16 + $0x2e8] sm:$0xf]  ;;  %v6324_v49 = vor.u32 %v6999_v39, %v6323_v31  ;;  %v6309_v31 = vld [vmem:[#allocation16 + $0x238] sm:$0xf0] }
 0x299   :  { %v6404_v47 = vor.u32 %v7019_v17, %v6403_v61  ;;  %v3396_v63 = vadd.f32 %v7787_v41, %v3383_v37  ;;  %v6531_v61 = vld [vmem:[#allocation16 + $0x3e8] sm:$0xf]  ;;  %v6405_v17 = vld [vmem:[#allocation16 + $0x2f8] sm:$0xf0] }
 0x29a   :  { %4329 = vmatpush.bf16.msra.mxu1 %v6260_v59  ;;  %4368 = vmatpush.bf16.msrb.mxu0 %v6136_v53  ;;  %v6037_v59 = vld [vmem:[#allocation16 + $0x18] sm:$0xf0]  ;;  %v6432_v53 = vor.u32 %v7024_v4, %v6429_v16  ;;  %v6961_v4 = vld [vmem:[#allocation16 + $0x12c] sm:$0xf] }
 0x29b   :  { %v6181_v16 = vld [vmem:[#allocation16 + $0x138] sm:$0xf0] }
 0x29c   :  { %4308 = vmatpush.bf16.msrb.mxu3 %v6432_v53  ;;  %v6184_v44 = vor.u32 %v6961_v4, %v6181_v16  ;;  %v6989_v4 = vld [vmem:[#allocation16 + $0x20c] sm:$0xf]  ;;  %v6293_v16 = vld [vmem:[#allocation16 + $0x218] sm:$0xf0] }
 0x29e   :  { %4330 = vmatpush.bf16.msra.mxu1 %v6244_v38  ;;  %4369 = vmatpush.bf16.msrb.mxu0 %v6120_v62  ;;  %v3397_v14 = vpop.f32.mrf.mxu1  ;;  %v6040_v38 = vor.u32 %v6925_v52, %v6037_v59  ;;  %v6280_v62 = vor.u32 %v6985_v19, %v6277_v50  ;;  %v6957_v52 = vld [vmem:[#allocation16 + $0x10c] sm:$0xf]  ;;  %v6165_v59 = vld [vmem:[#allocation16 + $0x118] sm:$0xf0]  ;;  %v7051_v19 = vld [vmem:[#allocation16 + $0x3f4] sm:$0xf0] }
 0x29f   :  { %v7017_v50 = vld [vmem:[#allocation16 + $0x2ec] sm:$0xf]  ;;  %v6168_v41 = vor.u32 %v6957_v52, %v6165_v59  ;;  %v6501_v59 = vld [vmem:[#allocation16 + $0x3b8] sm:$0xf0] }
 0x2a0   :  { %4309 = vmatpush.bf16.msrb.mxu3 %v6416_v7  ;;  %v7041_v52 = vld [vmem:[#allocation16 + $0x3ac] sm:$0xf] }
 0x2a2   :  { %4331 = vmatpush.bf16.msra.mxu1 %v6228_v18  ;;  %4370 = vmatpush.bf16.msrb.mxu0 %v6104_v20  ;;  %v6264_v18 = vor.u32 %v6981_v6, %v6261_v46  ;;  %v6388_v20 = vor.u32 %v7015_v13, %v6387_v8  ;;  %v6389_v6 = vld [vmem:[#allocation16 + $0x2d8] sm:$0xf0]  ;;  %v6499_v13 = vld [vmem:[#allocation16 + $0x3a8] sm:$0xf] }
 0x2a5   :  { %4284 = vmatmul.bf16.vlgmr.msrb.gmra.mxu1 %v7784_v2 }
 0x2a6   :  { %4332 = vmatpush.bf16.msra.mxu1 %v6212_v54  ;;  %4371 = vmatpush.bf16.msrb.mxu0 %v6088_v56  ;;  %v6229_v54 = vld [vmem:[#allocation16 + $0x198] sm:$0xf0]  ;;  %v6355_v56 = vld [vmem:[#allocation16 + $0x288] sm:$0xf] }
 0x2a7   :  { %v6232_v48 = vor.u32 %v6973_v26, %v6229_v54  ;;  %v6356_v57 = vor.u32 %v7007_v35, %v6355_v56  ;;  %v6467_v54 = vld [vmem:[#allocation16 + $0x368] sm:$0xf]  ;;  %v7035_v56 = vld [vmem:[#allocation16 + $0x374] sm:$0xf0]  ;;  %v7001_v35 = vld [vmem:[#allocation16 + $0x26c] sm:$0xf] }
 0x2aa   :  { %4333 = vmatpush.bf16.msra.mxu1 %v6196_v15  ;;  %4372 = vmatpush.bf16.msrb.mxu0 %v6072_v29  ;;  %v6965_v29 = vld [vmem:[#allocation16 + $0x14c] sm:$0xf] }
 0x2ab   :  { %v6200_v40 = vor.u32 %v6965_v29, %v6197_v55  ;;  %v7027_v29 = vld [vmem:[#allocation16 + $0x334] sm:$0xf0]  ;;  %v6993_v55 = vld [vmem:[#allocation16 + $0x22c] sm:$0xf] }
 0x2ac   :  { %v6312_v37 = vor.u32 %v6993_v55, %v6309_v31 }
 0x2ae   :  { %v3369_v45 = vpop.f32.mrf.mxu3  ;;  %4334 = vmatpush.bf16.msra.mxu1 %v6180_v12  ;;  %4373 = vmatpush.bf16.msrb.mxu0 %v6056_v42  ;;  %v6995_v12 = vld [vmem:[#allocation16 + $0x234] sm:$0xf0] }
 0x2af   :  { %v3370_v60 = vadd.f32 %v3369_v45, %v3357_v51  ;;  %v7795_v3 = vpop.f32.mrf.mxu2  ;;  %v6307_v51 = vld [vmem:[#allocation16 + $0x228] sm:$0xf] }
 0x2b0   :  { %v3409_v42 = vadd.f32 %v7795_v3, %v3396_v63  ;;  %v6308_v32 = vor.u32 %v6995_v12, %v6307_v51  ;;  %v6532_v3 = vor.u32 %v7051_v19, %v6531_v61  ;;  %v7049_v63 = vld [vmem:[#allocation16 + $0x3ec] sm:$0xf]  ;;  %v6533_v51 = vld [vmem:[#allocation16 + $0x3f8] sm:$0xf0] }
 0x2b1   :  { %v3427_v0 = vmax.f32 %v3370_v60, 0.0  ;;  %v6991_v60 = vld [vmem:[#allocation16 + $0x214] sm:$0xf0]  ;;  %v6485_v61 = vld [vmem:[#allocation16 + $0x398] sm:$0xf0] }
 0x2b2   :  { %4335 = vmatpush.bf16.msra.mxu1 %v6164_v10  ;;  %4374 = vmatpush.bf16.msrb.mxu0 %v6040_v38  ;;  %v6292_v30 = vor.u32 %v6991_v60, %v6291_v11  ;;  %v6408_v10 = vor.u32 %v7017_v50, %v6405_v17  ;;  %v6515_v38 = vld [vmem:[#allocation16 + $0x3c8] sm:$0xf]  ;;  %v7037_v60 = vld [vmem:[#allocation16 + $0x38c] sm:$0xf] }
 0x2b3   :  { %v7797_v5 = vpack.c.bf16 %v3427_v0, %v3427_v0  ;;  %v6488_v50 = vor.u32 %v7037_v60, %v6485_v61  ;;  %v7033_v17 = vld [vmem:[#allocation16 + $0x36c] sm:$0xf] }
 0x2b5   :  { %4245 = vmatmul.bf16.vlgmr.msra.gmra.mxu2 %v7797_v5  ;;  %4375 = vmatmul.bf16.vlgmr.msrb.gmra.mxu0 %v7770_v21  ;;  %v7003_v21 = vld [vmem:[#allocation16 + $0x274] sm:$0xf0] }
 0x2b6   :  { %4380 = vmatpush.bf16.msrb.mxu1 %v6280_v62  ;;  %v3371_v14 = vpop.f32.mrf.mxu3  ;;  %4341 = vmatpush.bf16.msra.mxu2 %v6404_v47  ;;  %v6340_v15 = vor.u32 %v7003_v21, %v6339_v34  ;;  %v7047_v62 = vld [vmem:[#allocation16 + $0x3d4] sm:$0xf0]  ;;  %v7013_v47 = vld [vmem:[#allocation16 + $0x2cc] sm:$0xf]  ;;  %v6325_v21 = vld [vmem:[#allocation16 + $0x258] sm:$0xf0] }
 0x2b7   :  { %v3410_v23 = vpop.f32.mrf.mxu2  ;;  %4336 = vmatmul.bf16.vlgmr.msra.gmra.mxu1 %v7784_v2  ;;  %v6516_v7 = vor.u32 %v7047_v62, %v6515_v38  ;;  %v6392_v8 = vor.u32 %v7013_v47, %v6389_v6  ;;  %v7043_v14 = vld [vmem:[#allocation16 + $0x3b4] sm:$0xf0]  ;;  %v6997_v34 = vld [vmem:[#allocation16 + $0x24c] sm:$0xf]  ;;  %v6437_v47 = vld [vmem:[#allocation16 + $0x338] sm:$0xf0] }
 0x2b8   :  { %v6500_v1 = vor.u32 %v7043_v14, %v6499_v13  ;;  %v6483_v23 = vld [vmem:[#allocation16 + $0x388] sm:$0xf]  ;;  %v7025_v62 = vld [vmem:[#allocation16 + $0x32c] sm:$0xf]  ;;  %v3561_v13 = vld [vmem:[#allocation18] sm:$0xf] }
 0x2b9   :  { %v7021_v6 = vld [vmem:[#allocation16 + $0x30c] sm:$0xf]  ;;  %v3563_v14 = vperm.slane %v3561_v13, 0 }
 0x2ba   :  { %4381 = vmatpush.bf16.msrb.mxu1 %v6264_v18  ;;  %4342 = vmatpush.bf16.msra.mxu2 %v6388_v20  ;;  %v7009_v18 = vld [vmem:[#allocation16 + $0x2ac] sm:$0xf]  ;;  %v6373_v20 = vld [vmem:[#allocation16 + $0x2b8] sm:$0xf0] }
 0x2bb   :  { %v6376_v9 = vor.u32 %v7009_v18, %v6373_v20 }
 0x2be   :  { %4382 = vmatpush.bf16.msrb.mxu1 %v6248_v27  ;;  %4343 = vmatpush.bf16.msra.mxu2 %v6372_v43  ;;  %v6357_v27 = vld [vmem:[#allocation16 + $0x298] sm:$0xf0]  ;;  %v6484_v43 = vor.u32 %v7039_v24, %v6483_v23 }
 0x2bf   :  { %v6360_v26 = vor.u32 %v7005_v25, %v6357_v27  ;;  %v3564_v25 = vperm.slane %v3561_v13, 1 }
 0x2c2   :  { %4383 = vmatpush.bf16.msrb.mxu1 %v6232_v48  ;;  %4344 = vmatpush.bf16.msra.mxu2 %v6356_v57  ;;  %v6468_v48 = vor.u32 %v7035_v56, %v6467_v54 }
 0x2c5   :  { %4297 = vmatmul.bf16.vlgmr.msrb.gmra.mxu2 %v7797_v5 }
 0x2c6   :  { %4384 = vmatpush.bf16.msrb.mxu1 %v6216_v33  ;;  %4345 = vmatpush.bf16.msra.mxu2 %v6340_v15  ;;  %v6328_v33 = vor.u32 %v6997_v34, %v6325_v21  ;;  %v6435_v15 = vld [vmem:[#allocation16 + $0x328] sm:$0xf] }
 0x2c7   :  { %v6436_v39 = vor.u32 %v7027_v29, %v6435_v15 }
 0x2ca   :  { %4385 = vmatpush.bf16.msrb.mxu1 %v6200_v40  ;;  %4346 = vmatpush.bf16.msra.mxu2 %v6324_v49  ;;  %v6419_v40 = vld [vmem:[#allocation16 + $0x308] sm:$0xf]  ;;  %v7023_v49 = vld [vmem:[#allocation16 + $0x314] sm:$0xf0] }
 0x2cb   :  { %v6420_v12 = vor.u32 %v7023_v49, %v6419_v40 }
 0x2ce   :  { %v3421_v45 = vpop.f32.mrf.mxu3  ;;  %4386 = vmatpush.bf16.msrb.mxu1 %v6184_v44  ;;  %4347 = vmatpush.bf16.msra.mxu2 %v6308_v32  ;;  %v6536_v44 = vor.u32 %v7049_v63, %v6533_v51  ;;  %v6517_v32 = vld [vmem:[#allocation16 + $0x3d8] sm:$0xf0] }
 0x2cf   :  { %v3422_v53 = vadd.f32 %v3421_v45, %v3409_v42  ;;  %v6296_v42 = vor.u32 %v6989_v4, %v6293_v16  ;;  %v7045_v45 = vld [vmem:[#allocation16 + $0x3cc] sm:$0xf] }
 0x2d0   :  { %v6520_v11 = vor.u32 %v7045_v45, %v6517_v32  ;;  %v4423_v16 = vld [vmem:[%s7838_s16] sm:$0xf]  ;;  %s4447_s16 = sld [smem:[#allocation19]] }
 0x2d1   :  { %v3428_v22 = vmax.f32 %v3422_v53, 0.0  ;;  %v6504_v53 = vor.u32 %v7041_v52, %v6501_v59 }
 0x2d2   :  { %4387 = vmatpush.bf16.msrb.mxu1 %v6168_v41  ;;  %4348 = vmatpush.bf16.msra.mxu2 %v6292_v30  ;;  %v7029_v30 = vld [vmem:[#allocation16 + $0x34c] sm:$0xf] }
 0x2d3   :  { %v7807_v0 = vpack.c.bf16 %v3428_v22, %v3428_v22  ;;  %v6469_v22 = vld [vmem:[#allocation16 + $0x378] sm:$0xf0] }
 0x2d4   :  { %v6472_v41 = vor.u32 %v7033_v17, %v6469_v22 }
 0x2d5   :  { %4258 = vmatmul.bf16.vlgmr.msra.gmra.mxu3 %v7807_v0  ;;  %4388 = vmatmul.bf16.vlgmr.msrb.gmra.mxu1 %v7784_v2  ;;  %v6341_v2 = vld [vmem:[#allocation16 + $0x278] sm:$0xf0] }
 0x2d6   :  { %4354 = vmatpush.bf16.msra.mxu3 %v6532_v3  ;;  %v3423_v46 = vpop.f32.mrf.mxu3  ;;  %4393 = vmatpush.bf16.msrb.mxu2 %v6408_v10  ;;  %v6344_v57 = vor.u32 %v7001_v35, %v6341_v2  ;;  %v6453_v3 = vld [vmem:[#allocation16 + $0x358] sm:$0xf0]  ;;  %v3565_v35 = vperm.slane %v3561_v13, 2 }
 0x2d7   :  { %4349 = vmatmul.bf16.vlgmr.msra.gmra.mxu2 %v7797_v5  ;;  %v6456_v38 = vor.u32 %v7029_v30, %v6453_v3  ;;  %v6421_v46 = vld [vmem:[#allocation16 + $0x318] sm:$0xf0] }
 0x2da   :  { %4355 = vmatpush.bf16.msra.mxu3 %v6516_v7  ;;  %4394 = vmatpush.bf16.msrb.mxu2 %v6392_v8  ;;  %v6424_v8 = vor.u32 %v7021_v6, %v6421_v46  ;;  %v4428_v46 = vperm.slane %v4423_v16, 3 }
 0x2de   :  { %4356 = vmatpush.bf16.msra.mxu3 %v6500_v1  ;;  %4395 = vmatpush.bf16.msrb.mxu2 %v6376_v9 }
 0x2e2   :  { %4357 = vmatpush.bf16.msra.mxu3 %v6484_v43  ;;  %4396 = vmatpush.bf16.msrb.mxu2 %v6360_v26 }
 0x2e5   :  { %4310 = vmatmul.bf16.vlgmr.msrb.gmra.mxu3 %v7807_v0 }
 0x2e6   :  { %4358 = vmatpush.bf16.msra.mxu3 %v6468_v48  ;;  %4397 = vmatpush.bf16.msrb.mxu2 %v6344_v57 }
 0x2ea   :  { %4359 = vmatpush.bf16.msra.mxu3 %v6452_v36  ;;  %4398 = vmatpush.bf16.msrb.mxu2 %v6328_v33 }
 0x2ee   :  { %4360 = vmatpush.bf16.msra.mxu3 %v6436_v39  ;;  %4399 = vmatpush.bf16.msrb.mxu2 %v6312_v37 }
 0x2f2   :  { %4361 = vmatpush.bf16.msra.mxu3 %v6420_v12  ;;  %4400 = vmatpush.bf16.msrb.mxu2 %v6296_v42  ;;  %v4220_v19 = vpop.f32.mrf.mxu0  ;;  %v4425_v12 = vperm.slane %v4423_v16, 0 }
 0x2f3   :  { %v4221_v20 = vadd.f32 %v4220_v19, %v3563_v14 }
 0x2f5   :  { %4362 = vmatmul.bf16.vlgmr.msra.gmra.mxu3 %v7807_v0  ;;  %4401 = vmatmul.bf16.vlgmr.msrb.gmra.mxu2 %v7797_v5  ;;  %v6440_v5 = vor.u32 %v7025_v62, %v6437_v47 }
 0x2f6   :  { %4406 = vmatpush.bf16.msrb.mxu3 %v6536_v44  ;;  %v4426_v44 = vperm.slane %v4423_v16, 1 }
 0x2fa   :  { %4407 = vmatpush.bf16.msrb.mxu3 %v6520_v11  ;;  %v4222_v10 = vpop.f32.mrf.mxu0 }
 0x2fb   :  { %v3566_v10 = vperm.slane %v3561_v13, 3  ;;  %v4451_v13 = vstv %s6537_s22 }
 0x2fe   :  { %4408 = vmatpush.bf16.msrb.mxu3 %v6504_v53 }
 0x302   :  { %4409 = vmatpush.bf16.msrb.mxu3 %v6488_v50  ;;  %v4272_v7 = vpop.f32.mrf.mxu0  ;;  %v4427_v50 = vperm.slane %v4423_v16, 2 }
 0x303   :  { %v4273_v43 = vadd.f32 %v4272_v7, %v3564_v25 }
 0x306   :  { %4410 = vmatpush.bf16.msrb.mxu3 %v6472_v41 }
 0x30a   :  { %4411 = vmatpush.bf16.msrb.mxu3 %v6456_v38  ;;  %v4274_v18 = vpop.f32.mrf.mxu0 }
 0x30e   :  { %4412 = vmatpush.bf16.msrb.mxu3 %v6440_v5 }
 0x312   :  { %4413 = vmatpush.bf16.msrb.mxu3 %v6424_v8  ;;  %v4233_v1 = vpop.f32.mrf.mxu1  ;;  %v4324_v23 = vpop.f32.mrf.mxu0 }
 0x313   :  { %v4234_v9 = vadd.f32 %v4233_v1, %v4221_v20  ;;  %v4325_v2 = vadd.f32 %v4324_v23, %v3565_v35  ;;  %v7079_v20 = vld [vmem:[#allocation2] ss:$0 sm:$0xff]  ;;  %v2276_v1 = vpop.xlane.xlu0 %2275 }
 0x314   :  { %v2281_v23 = vadd.f32 %v7079_v20, %v2276_v1 }
 0x315   :  { %4414 = vmatmul.bf16.vlgmr.msrb.gmra.mxu3 %v7807_v0 }
 0x31a   :  { %v4235_v24 = vpop.f32.mrf.mxu1  ;;  %v4326_v27 = vpop.f32.mrf.mxu0 }
 0x31b   :  { %v4448_v24 = vstv %s4447_s16 }
 0x322   :  { %v4285_v26 = vpop.f32.mrf.mxu1 }
 0x323   :  { %v4286_v54 = vadd.f32 %v4285_v26, %v4273_v43  ;;  %v4449_v43 = vmul.f32 %v4448_v24, %v2281_v23 }
 0x32a   :  { %v4287_v56 = vpop.f32.mrf.mxu1 }
 0x332   :  { %v4376_v48 = vpop.f32.mrf.mxu0 }
 0x333   :  { %v4377_v38 = vadd.f32 %v4376_v48, %v3566_v10 }
 0x334   :  { %v4337_v57 = vpop.f32.mrf.mxu1 }
 0x335   :  { %v4338_v58 = vadd.f32 %v4337_v57, %v4325_v2 }
 0x338   :  { %v4246_v28 = vpop.f32.mrf.mxu2 }
 0x339   :  { %v4247_v0 = vadd.f32 %v4246_v28, %v4234_v9  ;;  %v7080_v9 = vld [vmem:[#allocation3] ss:$0 sm:$0xff] }
 0x33a   :  { %v4378_v34 = vpop.f32.mrf.mxu0 }
 0x33c   :  { %v4339_v21 = vpop.f32.mrf.mxu1 }
 0x340   :  { %v4248_v36 = vpop.f32.mrf.mxu2 }
 0x348   :  { %v4298_v33 = vpop.f32.mrf.mxu2 }
 0x349   :  { %v4299_v15 = vadd.f32 %v4298_v33, %v4286_v54  ;;  %v4455_v54 = vstv %s6538_s2 }
 0x350   :  { %v4300_v29 = vpop.f32.mrf.mxu2 }
 0x352   :  { %v4389_v55 = vpop.f32.mrf.mxu1 }
 0x353   :  { %v4390_v62 = vadd.f32 %v4389_v55, %v4377_v38 }
 0x358   :  { %v4259_v31 = vpop.f32.mrf.mxu3 }
 0x359   :  { %v4260_v4 = vadd.f32 %v4259_v31, %v4247_v0 }
 0x35a   :  { %v4350_v39 = vpop.f32.mrf.mxu2  ;;  %v4391_v37 = vpop.f32.mrf.mxu1 }
 0x35b   :  { %v4419_v51 = vmax.f32 %v4260_v4, 0.0  ;;  %v4351_v53 = vadd.f32 %v4350_v39, %v4338_v58 }
 0x35d   :  { %v4433_v32 = vmul.f32 %v4425_v12, %v4419_v51 }
 0x360   :  { %v4261_v40 = vpop.f32.mrf.mxu3 }
 0x362   :  { %v4352_v49 = vpop.f32.mrf.mxu2 }
 0x368   :  { %v4311_v63 = vpop.f32.mrf.mxu3 }
 0x369   :  { %v4312_v42 = vadd.f32 %v4311_v63, %v4299_v15 }
 0x36b   :  { %v4420_v45 = vmax.f32 %v4312_v42, 0.0 }
 0x36d   :  { %v4434_v11 = vmul.f32 %v4426_v44, %v4420_v45 }
 0x36f   :  { %v4437_v52 = vadd.f32 %v4434_v11, %v4433_v32 }
 0x370   :  { %v4313_v59 = vpop.f32.mrf.mxu3 }
 0x378   :  { %v4363_v60 = vpop.f32.mrf.mxu3  ;;  %v4402_v61 = vpop.f32.mrf.mxu2 }
 0x379   :  { %v4364_v19 = vadd.f32 %v4363_v60, %v4351_v53  ;;  %v4403_v47 = vadd.f32 %v4402_v61, %v4390_v62 }
 0x37b   :  { %v4421_v17 = vmax.f32 %v4364_v19, 0.0 }
 0x37d   :  { %v4435_v22 = vmul.f32 %v4427_v50, %v4421_v17 }
 0x37f   :  { %v4438_v41 = vadd.f32 %v4437_v52, %v4435_v22 }
 0x380   :  { %v4365_v30 = vpop.f32.mrf.mxu3  ;;  %v4404_v3 = vpop.f32.mrf.mxu2 }
 0x398   :  { %v4415_v5 = vpop.f32.mrf.mxu3 }
 0x399   :  { %v4416_v6 = vadd.f32 %v4415_v5, %v4403_v47 }
 0x39b   :  { %v4422_v7 = vmax.f32 %v4416_v6, 0.0 }
 0x39d   :  { %v4436_v8 = vmul.f32 %v4428_v46, %v4422_v7 }
 0x39f   :  { %v4439_v14 = vadd.f32 %v4438_v41, %v4436_v8 }
 0x3a0   :  { %v4417_v18 = vpop.f32.mrf.mxu3 }
 0x3a1   :  { %4440 = vadd.xlane.f32.xlu1 %v4439_v14 }
 0x414   :  { %v4441_v25 = vpop.xlane.xlu1 %4440 }
 0x415   :  { %v4446_v27 = vadd.f32 %v7080_v9, %v4441_v25 }
 0x417   :  { %v4452_v26 = vmul.f32 %v4451_v13, %v4446_v27 }
 0x419   :  { %v4453_v56 = vadd.f32 %v4452_v26, %v4449_v43 }
 0x41b   :  { %v4456_v35 = vadd.f32 %v4455_v54, %v4453_v56 }
 0x41d   :  { %v6539_v2 = vmul.f32 -1.442695, %v4456_v35 }
 0x41f   :  { %7081 = vpow2.f32 %v6539_v2 }
 0x425   :  { %v7082_v48 = vpop.eup %7081 }
 0x426   :  { %v4460_v57 = vadd.f32 1.0, %v7082_v48 }
 0x428   :  { %7083 = vrcp.f32 %v4460_v57  ;;  %v4472_v34 = vand.u32 2147483648, %v4460_v57  ;;  %v4470_v36 = vand.u32 2147483647, %v4460_v57  ;;  %vm4466_vm1 = vweird.f32 %v4460_v57 }
 0x42a   :  { %v4473_v15 = vor.u32 1.1754944e-38, %v4472_v34  ;;  %vm4471_vm3 = vcmp.eq.f32.partialorder %v4470_v36, 8.507059e+37 }
 0x42e   :  { %v7084_v58 = vpop.eup %7083 }
 0x42f   :  { %v4462_v28 = vmul.f32 %v7084_v58, %v4460_v57  ;;  %vm4467_vm0 = vweird.f32 %v7084_v58 }
 0x430   :  { %vm4468_vm2 = vmor %vm4466_vm1, %vm4467_vm0 }
 0x431   :  { %v4463_v0 = vsub.f32 1.0, %v4462_v28 }
 0x433   :  { %v4464_v21 = vmul.f32 %v7084_v58, %v4463_v0 }
 0x435   :  { %v4465_v33 = vadd.f32 %v7084_v58, %v4464_v21 }
 0x437   :  { %v4469_v29 = vsel %vm4468_vm2, %v7084_v58, %v4465_v33 }
 0x438   :  { %v4474_v55 = vsel %vm4471_vm3, %v4473_v15, %v4469_v29 }
 0x439   :  { %v4476_v31 = vmul.f32 0.5, %v4474_v55 }
 0x43b   :  { %4478 = vst.msk [vmem:[%s7840_s19] sm:$0xff] %vm4477_vm4, %v4476_v31 }
 0x43c   :  { %4483 = vsyncpa [#allocation5], 1 }
 0x43d   :  { %4484 = vsyncpa [#allocation8], 1 }
 0x43e   :  { %4485 = vsyncpa [#allocation11], 1 }
 0x43f   :  { %4486 = vsyncpa [#allocation14], 1 }
 0x440   :  { %4487 = vsyncpa [#allocation17], 1 }
 0x441   :  { %4488 = vsyncpa [#allocation6], 1 }

</bundles_post_ra>
